<compile_context>
chip_gen: v5e
topology: v5e:2x2
jax: 0.10.0
libtpu: 0.0.40
codegen_flags: <defaults>
</compile_context>

<pallas_src>
import functools

import jax
import jax.numpy as jnp
from jax import lax
from jax.experimental import pallas as pl
from jax.experimental.pallas import tpu as pltpu

LN_EPS = 1e-5   # torch.nn.LayerNorm default
GN_EPS = 1e-5   # torch.nn.GroupNorm default

# MXU operand dtype: bf16 operands, f32 accumulation (applies to v5e/v6e/v7x).
MXU_DTYPE = jnp.bfloat16


# ----------------------------- in-kernel helpers -----------------------------

def _mm(a, w):
    """(M, K) x (K, O) matmul on the MXU with f32 accumulation."""
    return jnp.dot(a.astype(MXU_DTYPE), w.astype(MXU_DTYPE),
                   preferred_element_type=jnp.float32)


def _mm_rt(a, w):
    """(M, K) x (O, K) -> (M, O): contracts the shared LAST dims (no transpose copies)."""
    return lax.dot_general(a.astype(MXU_DTYPE), w.astype(MXU_DTYPE),
                           dimension_numbers=(((1,), (1,)), ((), ())),
                           preferred_element_type=jnp.float32)


def _layernorm(x, d_real, gamma=None, beta=None):
    # x: (M, Dp) with zero padded lanes; stats over the d_real real channels only.
    # One-pass E[x^2]-E[x]^2 keeps the zero-padded lanes out of the statistics.
    s = jnp.sum(x, axis=-1, keepdims=True)
    ss = jnp.sum(x * x, axis=-1, keepdims=True)
    mu = s / d_real
    var = ss / d_real - mu * mu
    xn = (x - mu) * lax.rsqrt(var + LN_EPS)
    if gamma is not None:
        xn = xn * gamma + beta
    return xn


def _groupnorm(h, bm, bmT, gmT, gamma, beta, count):
    """GroupNorm with per-batch-element statistics on the flattened (B*N, Cp) activation.

    h:   (M, Cp)  zero-padded channels
    bm:  (M, B) / bmT: (B, M)  one-hot row->batch maps
    gmT: (G, Cp)  one-hot group->channel map (zero columns for padded channels)
    The tiny statistics matmuls stay f32 (numerically sensitive, negligible cost).
    """
    sum_bc = jnp.dot(bmT, h, preferred_element_type=jnp.float32)        # (B, Cp)
    sumsq_bc = jnp.dot(bmT, h * h, preferred_element_type=jnp.float32)  # (B, Cp)
    gsum = jnp.einsum("bc,gc->bg", sum_bc, gmT, preferred_element_type=jnp.float32)
    gsumsq = jnp.einsum("bc,gc->bg", sumsq_bc, gmT, preferred_element_type=jnp.float32)
    mean_bg = gsum / count
    var_bg = gsumsq / count - mean_bg * mean_bg
    mean_rows = jnp.dot(bm, jnp.dot(mean_bg, gmT, preferred_element_type=jnp.float32),
                        preferred_element_type=jnp.float32)             # (M, Cp)
    var_rows = jnp.dot(bm, jnp.dot(var_bg, gmT, preferred_element_type=jnp.float32),
                       preferred_element_type=jnp.float32)
    return (h - mean_rows) * lax.rsqrt(var_rows + GN_EPS) * gamma + beta


def _erf(z):
    # Abramowitz-Stegun 7.1.26 (|err| < 1.5e-7): exp/mul/add only, always lowers.
    a1, a2, a3, a4, a5 = 0.254829592, -0.284496736, 1.421413741, -1.453152027, 1.061405429
    p = 0.3275911
    sgn = jnp.where(z >= 0.0, 1.0, -1.0)
    az = jnp.abs(z)
    t = 1.0 / (1.0 + p * az)
    poly = ((((a5 * t + a4) * t + a3) * t + a2) * t + a1) * t
    return sgn * (1.0 - poly * jnp.exp(-az * az))


def _gelu(x):
    # exact (erf-based) GELU, matching the torch.nn.GELU default
    return 0.5 * x * (1.0 + _erf(x * 0.7071067811865476))


# ------------------------------- fused layer kernel ----------------------------

def layer_kernel(x_ref, dvec_ref, hvec_ref, wq_ref, wk_ref, wv_ref, wout_ref,
                 w1_ref, w2_ref, w3_ref, gmhT_ref, gmdT_ref,
                 o_ref, x_acc,
                 *, heads, d_real, h_real, groups, n_seq, batch):
    d_idx = pl.program_id(0)

    @pl.when(d_idx == 0)
    def _():
        x_acc[...] = x_ref[...]       # activation becomes VMEM-resident for all layers

    x = x_acc[...]                    # (M, Dp), M = B*N
    m = x.shape[0]

    # ---- batch bookkeeping on the flattened rows (iota + compares, no integer div) ----
    r_mb = lax.broadcasted_iota(jnp.int32, (m, batch), 0)
    b_mb = lax.broadcasted_iota(jnp.int32, (m, batch), 1)
    bm = ((r_mb >= b_mb * n_seq) & (r_mb < (b_mb + 1) * n_seq)).astype(jnp.float32)
    r_bm = lax.broadcasted_iota(jnp.int32, (batch, m), 1)
    b_bm = lax.broadcasted_iota(jnp.int32, (batch, m), 0)
    bmT = ((r_bm >= b_bm * n_seq) & (r_bm < (b_bm + 1) * n_seq)).astype(jnp.float32)
    same_b = jnp.dot(bm, bmT, preferred_element_type=jnp.float32)        # (M, M) 0/1
    attn_bias = (same_b - 1.0) * 1e30                                    # block-diag mask
    m_first = 1.0 - jnp.max((r_mb == b_mb * n_seq).astype(jnp.float32),
                            axis=1, keepdims=True)                       # (M, 1)
    m_last = 1.0 - jnp.max((r_mb == b_mb * n_seq + (n_seq - 1)).astype(jnp.float32),
                           axis=1, keepdims=True)                        # (M, 1)

    dv = dvec_ref[0]   # (6, Dp): attn ln_g, ln_b, bout, conv b3, g3, bt3
    hv = hvec_ref[0]   # (6, Hp): conv b1', g1, bt1, b2, g2, bt2

    # ------------------- PreNorm(Attention) + residual -------------------
    xn = _layernorm(x, d_real, dv[0:1, :], dv[1:2, :])
    attn_out = jnp.zeros_like(x)
    for hh in range(heads):                       # unrolled; weights pre-split per head
        qh = _mm_rt(xn, wq_ref[0, hh])            # (M, dh); softmax scale folded into wq
        kh = _mm_rt(xn, wk_ref[0, hh])
        vh = _mm_rt(xn, wv_ref[0, hh])
        dots = _mm_rt(qh, kh) + attn_bias         # (M, M); cross-batch entries ~ -1e30
        dots = dots - jnp.max(dots, axis=-1, keepdims=True)
        e = jnp.exp(dots)
        p = e * pl.reciprocal(jnp.sum(e, axis=-1, keepdims=True), approx=True)
        oh = _mm(p, vh)                           # (M, dh)
        attn_out = attn_out + _mm(oh, wout_ref[0, hh])   # (M, Dp), accumulated per head
    x = x + attn_out + dv[2:3, :]

    # ------------------- PreNorm(ConvLayer) + residual -------------------
    # Conv-branch LayerNorm gamma/beta are folded into w1/b1 at pack time.  xn's padded
    # lanes are nonzero here, but w1's padded rows are zero so they never contaminate h.
    xn = _layernorm(x, d_real)
    cnt_h = n_seq * (h_real // groups)
    cnt_d = n_seq * (d_real // groups)

    # Conv1d(dim, hidden, k=1) -> matmul
    h = _mm(xn, w1_ref[0]) + hv[0:1, :]
    h = _groupnorm(h, bm, bmT, gmhT_ref[...], hv[1:2, :], hv[2:3, :], cnt_h)
    h = _gelu(h)

    # Conv1d(hidden, hidden, k=3, 'same'): three (Hp, Hp) tap matmuls; the +/-1 sequence
    # shifts are applied to the tap OUTPUTS (1-row sublane concat) and masked at each
    # batch element's boundary rows.
    # TODO(synk): for long sequences replace the concats with pltpu.roll(axis=0).
    y_prev = _mm(h, w2_ref[0, 0])
    y_mid = _mm(h, w2_ref[0, 1])
    y_next = _mm(h, w2_ref[0, 2])
    zrow = jnp.zeros((1, y_mid.shape[1]), jnp.float32)
    h2 = (y_mid
          + m_first * jnp.concatenate([zrow, y_prev[:m - 1, :]], axis=0)
          + m_last * jnp.concatenate([y_next[1:, :], zrow], axis=0)
          + hv[3:4, :])
    h2 = _groupnorm(h2, bm, bmT, gmhT_ref[...], hv[4:5, :], hv[5:6, :], cnt_h)
    h2 = _gelu(h2)

    # Conv1d(hidden, dim, k=1) -> matmul
    h3 = _mm(h2, w3_ref[0]) + dv[3:4, :]
    h3 = _groupnorm(h3, bm, bmT, gmdT_ref[...], dv[4:5, :], dv[5:6, :], cnt_d)

    x = x + h3
    x_acc[...] = x

    @pl.when(d_idx == pl.num_programs(0) - 1)
    def _():
        o_ref[...] = x


# ------------------------------- pallas_call glue ------------------------------

def _round_up(x, m):
    return ((x + m - 1) // m) * m


def _stream(shape):
    """BlockSpec for a per-layer array streamed (double-buffered) along the depth axis."""
    zeros = (0,) * (len(shape) - 1)
    return pl.BlockSpec(shape, lambda d: (d,) + zeros)


def conv_transformer_forward(x, packed, meta):
    B, N, D = x.shape
    Dp, Hp = meta["Dp"], meta["Hp"]
    depth, heads, dh = meta["depth"], meta["heads"], meta["dim_head"]
    G = meta["groups"]
    M = B * N

    # Lane-dense feature padding + batch folded into the matmul M dimension.
    xp = jnp.pad(x, ((0, 0), (0, 0), (0, Dp - D))).reshape(M, Dp)

    kern = functools.partial(layer_kernel, heads=heads, d_real=D,
                             h_real=meta["hidden"], groups=G, n_seq=N, batch=B)

    out = pl.pallas_call(
        kern,
        out_shape=jax.ShapeDtypeStruct((M, Dp), jnp.float32),
        grid=(depth,),
        in_specs=[
            pl.BlockSpec((M, Dp), lambda d: (0, 0)),     # x (loaded once, then resident)
            _stream((1, 6, Dp)),                         # dvec (dim-sized vectors)
            _stream((1, 6, Hp)),                         # hvec (hidden-sized vectors)
            _stream((1, heads, dh, Dp)),                 # wq (per-head, lane-dense)
            _stream((1, heads, dh, Dp)),                 # wk
            _stream((1, heads, dh, Dp)),                 # wv
            _stream((1, heads, dh, Dp)),                 # wout
            _stream((1, Dp, Hp)),                        # w1
            _stream((1, 3, Hp, Hp)),                     # w2 (three k=3 taps)
            _stream((1, Hp, Dp)),                        # w3
            pl.BlockSpec((G, Hp), lambda d: (0, 0)),     # group->channel map (hidden)
            pl.BlockSpec((G, Dp), lambda d: (0, 0)),     # group->channel map (dim)
        ],
        out_specs=pl.BlockSpec((M, Dp), lambda d: (0, 0)),
        scratch_shapes=[pltpu.VMEM((M, Dp), jnp.float32)],   # resident activation
        compiler_params=pltpu.CompilerParams(
            dimension_semantics=("arbitrary",)),
    )(xp, packed["dvec"], packed["hvec"], packed["wq"], packed["wk"], packed["wv"],
      packed["wout"], packed["w1"], packed["w2"], packed["w3"],
      packed["gmhT"], packed["gmdT"])
    return out.reshape(B, N, Dp)[..., :D]


# ------------------------------ parameter setup -------------------------------

def make_params(key, dim, depth, heads, dim_head, expansion=4, groups=10):
    """Real-size (unpadded) parameters, channels-last matmul layout.

    Conv1d k=1 weights are stored (C_in, C_out) == torch weight[:, :, 0].T; the k=3
    weight is (3*hidden, hidden) with rows [t*hidden:(t+1)*hidden] = torch W[:, :, t].T
    (tap t applied to x[n-1+t], i.e. 'same' cross-correlation).
    """
    hidden = dim * expansion
    inner = heads * dim_head

    def nrm(k, shape, scale=0.05):
        return scale * jax.random.normal(k, shape, jnp.float32)

    layers = []
    for lk in jax.random.split(key, depth):
        ks = jax.random.split(lk, 19)
        attn_p = dict(
            heads=heads, dim_head=dim_head,
            ln_g=1.0 + nrm(ks[0], (dim,), 0.1), ln_b=nrm(ks[1], (dim,), 0.05),
            wqkv=nrm(ks[2], (dim, 3 * inner)),
            wout=nrm(ks[3], (inner, dim)), bout=nrm(ks[4], (dim,), 0.01),
        )
        conv_p = dict(
            ln_g=1.0 + nrm(ks[5], (dim,), 0.1), ln_b=nrm(ks[6], (dim,), 0.05),
            w1=nrm(ks[7], (dim, hidden)), b1=nrm(ks[8], (hidden,), 0.01),
            g1=1.0 + nrm(ks[9], (hidden,), 0.1), bt1=nrm(ks[10], (hidden,), 0.05),
            w2=nrm(ks[11], (3 * hidden, hidden)), b2=nrm(ks[12], (hidden,), 0.01),
            g2=1.0 + nrm(ks[13], (hidden,), 0.1), bt2=nrm(ks[14], (hidden,), 0.05),
            w3=nrm(ks[15], (hidden, dim)), b3=nrm(ks[16], (dim,), 0.01),
            g3=1.0 + nrm(ks[17], (dim,), 0.1), bt3=nrm(ks[18], (dim,), 0.05),
        )
        layers.append((attn_p, conv_p))
    return layers


def group_matrix_t(c_real, c_pad, groups):
    cg = c_real // groups
    ch = jnp.arange(c_pad)
    gm = (jnp.arange(groups)[:, None] == (ch[None, :] // cg)) & (ch[None, :] < c_real)
    return gm.astype(jnp.float32)          # (G, c_pad), zero columns for padded channels


def pack_params(layers, dim, heads, dim_head, expansion=4, groups=10):
    """Pad to lane-dense feature dims, fold softmax scale into Wq and the conv-branch
    LayerNorm gamma/beta into W1/b1, pre-split attention weights per head (lane-dense
    (dh, Dp) layout), split w2 into its three k=3 taps, stack everything on a leading
    depth axis, and store the big weights in bf16 (HBM DMA bytes halved)."""
    hidden = dim * expansion
    inner = heads * dim_head
    dh = dim_head
    Dp, Hp = _round_up(dim, 128), _round_up(hidden, 128)
    scale = dim_head ** -0.5

    def pad2(a, r, c):
        return jnp.pad(a, ((0, r - a.shape[0]), (0, c - a.shape[1])))

    def pad1(a, c):
        return jnp.pad(a, (0, c - a.shape[0]))

    wq, wk, wv, wo, w1, w2, w3, dvec, hvec = [], [], [], [], [], [], [], [], []
    for ap, cp in layers:
        wqkv = ap["wqkv"]
        wq.append(jnp.stack([pad2((wqkv[:, h * dh:(h + 1) * dh] * scale).T, dh, Dp)
                             for h in range(heads)]))
        wk.append(jnp.stack([pad2(wqkv[:, inner + h * dh:inner + (h + 1) * dh].T, dh, Dp)
                             for h in range(heads)]))
        wv.append(jnp.stack([pad2(wqkv[:, 2 * inner + h * dh:2 * inner + (h + 1) * dh].T,
                                  dh, Dp) for h in range(heads)]))
        wo.append(jnp.stack([pad2(ap["wout"][h * dh:(h + 1) * dh, :], dh, Dp)
                             for h in range(heads)]))
        # conv-branch LN fold: W1' = diag(ln_g) @ W1,  b1' = ln_b @ W1 + b1
        w1f = cp["w1"] * cp["ln_g"][:, None]
        b1f = cp["ln_b"] @ cp["w1"] + cp["b1"]
        w1.append(pad2(w1f, Dp, Hp))
        w2.append(jnp.stack([pad2(cp["w2"][t * hidden:(t + 1) * hidden], Hp, Hp)
                             for t in range(3)]))
        w3.append(pad2(cp["w3"], Hp, Dp))
        dvec.append(jnp.stack([pad1(ap["ln_g"], Dp), pad1(ap["ln_b"], Dp),
                               pad1(ap["bout"], Dp), pad1(cp["b3"], Dp),
                               pad1(cp["g3"], Dp), pad1(cp["bt3"], Dp)]))
        hvec.append(jnp.stack([pad1(b1f, Hp), pad1(cp["g1"], Hp), pad1(cp["bt1"], Hp),
                               pad1(cp["b2"], Hp), pad1(cp["g2"], Hp), pad1(cp["bt2"], Hp)]))

    bf16 = jnp.bfloat16
    packed = dict(
        wq=jnp.stack(wq).astype(bf16), wk=jnp.stack(wk).astype(bf16),
        wv=jnp.stack(wv).astype(bf16), wout=jnp.stack(wo).astype(bf16),
        w1=jnp.stack(w1).astype(bf16), w2=jnp.stack(w2).astype(bf16),
        w3=jnp.stack(w3).astype(bf16),
        dvec=jnp.stack(dvec), hvec=jnp.stack(hvec),
        gmhT=group_matrix_t(hidden, Hp, groups),
        gmdT=group_matrix_t(dim, Dp, groups))
    meta = dict(depth=len(layers), heads=heads, dim_head=dim_head,
                hidden=hidden, Dp=Dp, Hp=Hp, groups=groups)
    return packed, meta


# ------------------------------ pure-JAX reference -----------------------------

def _ref_ln(x, g, b):
    mu = jnp.mean(x, axis=-1, keepdims=True)
    var = jnp.mean((x - mu) ** 2, axis=-1, keepdims=True)
    return (x - mu) / jnp.sqrt(var + LN_EPS) * g + b


def _ref_gn(h, groups, g, b):
    B, N, C = h.shape
    hg = h.reshape(B, N, groups, C // groups)
    mu = jnp.mean(hg, axis=(1, 3), keepdims=True)
    var = jnp.mean((hg - mu) ** 2, axis=(1, 3), keepdims=True)
    hn = ((hg - mu) / jnp.sqrt(var + GN_EPS)).reshape(B, N, C)
    return hn * g + b


def ref_forward(x, layers, groups=10):
    for ap, cp in layers:
        B, N, D = x.shape
        H, dh = ap["heads"], ap["dim_head"]
        inner = H * dh
        # PreNorm(Attention) + residual
        xn = _ref_ln(x, ap["ln_g"], ap["ln_b"])
        qkv = xn @ ap["wqkv"]
        q, k, v = qkv[..., :inner], qkv[..., inner:2 * inner], qkv[..., 2 * inner:]
        q = q.reshape(B, N, H, dh).transpose(0, 2, 1, 3)
        k = k.reshape(B, N, H, dh).transpose(0, 2, 1, 3)
        v = v.reshape(B, N, H, dh).transpose(0, 2, 1, 3)
        dots = jnp.einsum("bhnd,bhmd->bhnm", q, k) * (dh ** -0.5)
        attn = jax.nn.softmax(dots, axis=-1)
        out = jnp.einsum("bhnm,bhmd->bhnd", attn, v).transpose(0, 2, 1, 3).reshape(B, N, inner)
        x = out @ ap["wout"] + ap["bout"] + x
        # PreNorm(ConvLayer) + residual
        xn = _ref_ln(x, cp["ln_g"], cp["ln_b"])
        h = xn @ cp["w1"] + cp["b1"]
        h = _ref_gn(h, groups, cp["g1"], cp["bt1"])
        h = jax.nn.gelu(h, approximate=False)
        h_prev = jnp.pad(h, ((0, 0), (1, 0), (0, 0)))[:, :N, :]
        h_next = jnp.pad(h, ((0, 0), (0, 1), (0, 0)))[:, 1:, :]
        h2 = jnp.concatenate([h_prev, h, h_next], axis=-1) @ cp["w2"] + cp["b2"]
        h2 = _ref_gn(h2, groups, cp["g2"], cp["bt2"])
        h2 = jax.nn.gelu(h2, approximate=False)
        h3 = h2 @ cp["w3"] + cp["b3"]
        h3 = _ref_gn(h3, groups, cp["g3"], cp["bt3"])
        x = h3 + x
    return x


# ------------------------------------ main -------------------------------------

if __name__ == "__main__":
    # Small shapes consistent with the module: dim divisible by 10 (GroupNorm(10, ...)).
    B, N = 2, 8
    dim, depth, heads, dim_head = 40, 2, 4, 16     # mlp_dim is unused by ConvTransformer

    key = jax.random.PRNGKey(0)
    kx, kp = jax.random.split(key)
    x = jax.random.normal(kx, (B, N, dim), jnp.float32)

    layers = make_params(kp, dim, depth, heads, dim_head)
    packed, meta = pack_params(layers, dim, heads, dim_head)

    out = jax.block_until_ready(conv_transformer_forward(x, packed, meta))
    ref = jax.block_until_ready(ref_forward(x, layers))

    assert out.shape == (B, N, dim)
    assert bool(jnp.all(jnp.isfinite(out)))
    # bf16 weights (per perf review) leave a small deviation from the f32 reference.
    assert bool(jnp.allclose(out, ref, atol=3e-2, rtol=3e-2)), "mismatch vs reference"

    print("KERNEL_OK")
</pallas_src>

<mosaic_0001>
module attributes {stable_mosaic.version = 11 : i64} {
  func.func @layer_kernel(%arg0: i32, %arg1: memref<16x128xf32, #tpu.memory_space<vmem>>, %arg2: memref<1x6x128xf32, #tpu.memory_space<vmem>>, %arg3: memref<1x6x256xf32, #tpu.memory_space<vmem>>, %arg4: memref<1x4x16x128xbf16, #tpu.memory_space<vmem>>, %arg5: memref<1x4x16x128xbf16, #tpu.memory_space<vmem>>, %arg6: memref<1x4x16x128xbf16, #tpu.memory_space<vmem>>, %arg7: memref<1x4x16x128xbf16, #tpu.memory_space<vmem>>, %arg8: memref<1x128x256xbf16, #tpu.memory_space<vmem>>, %arg9: memref<1x3x256x256xbf16, #tpu.memory_space<vmem>>, %arg10: memref<1x256x128xbf16, #tpu.memory_space<vmem>>, %arg11: memref<10x256xf32, #tpu.memory_space<vmem>>, %arg12: memref<10x128xf32, #tpu.memory_space<vmem>>, %arg13: memref<16x128xf32, #tpu.memory_space<vmem>>, %arg14: memref<16x128xf32, #tpu.memory_space<vmem>>) attributes {dimension_semantics = [#tpu.dimension_semantics<arbitrary>], iteration_bounds = array<i64: 2>, scalar_prefetch = 0 : i64, scratch_operands = 1 : i64, tpu.core_type = #tpu.core_type<tc>, window_params = [{pipeline_mode = #tpu.pipeline_mode<synchronous>, transform_indices = @transform_0, window_bounds = array<i64: 16, 128>}, {transform_indices = @transform_1, window_bounds = array<i64: 1, 6, 128>}, {transform_indices = @transform_2, window_bounds = array<i64: 1, 6, 256>}, {transform_indices = @transform_3, window_bounds = array<i64: 1, 4, 16, 128>}, {transform_indices = @transform_4, window_bounds = array<i64: 1, 4, 16, 128>}, {transform_indices = @transform_5, window_bounds = array<i64: 1, 4, 16, 128>}, {transform_indices = @transform_6, window_bounds = array<i64: 1, 4, 16, 128>}, {transform_indices = @transform_7, window_bounds = array<i64: 1, 128, 256>}, {transform_indices = @transform_8, window_bounds = array<i64: 1, 3, 256, 256>}, {transform_indices = @transform_9, window_bounds = array<i64: 1, 256, 128>}, {pipeline_mode = #tpu.pipeline_mode<synchronous>, transform_indices = @transform_10, window_bounds = array<i64: 10, 256>}, {pipeline_mode = #tpu.pipeline_mode<synchronous>, transform_indices = @transform_11, window_bounds = array<i64: 10, 128>}, {pipeline_mode = #tpu.pipeline_mode<synchronous>, transform_indices = @transform_12, window_bounds = array<i64: 16, 128>}]} {
    %c0_i32 = arith.constant 0 : i32
    %0 = arith.cmpi eq, %arg0, %c0_i32 : i32
    %1 = arith.extui %0 : i1 to i32
    %c0_i32_0 = arith.constant 0 : i32
    %2 = arith.cmpi ne, %1, %c0_i32_0 : i32
    scf.if %2 {
      %c0_223 = arith.constant 0 : index
      %c0_224 = arith.constant 0 : index
      %450 = vector.load %arg1[%c0_223, %c0_224] : memref<16x128xf32, #tpu.memory_space<vmem>>, vector<16x128xf32>
      %c0_225 = arith.constant 0 : index
      %c0_226 = arith.constant 0 : index
      %451 = vector.load %arg14[%c0_225, %c0_226] : memref<16x128xf32, #tpu.memory_space<vmem>>, vector<16x128xf32>
      tpu.vector_store %arg14[%c0_225, %c0_226], %450 {strides = array<i32>} : memref<16x128xf32, #tpu.memory_space<vmem>>, vector<16x128xf32>,
    } else {
    }
    %c0 = arith.constant 0 : index
    %c0_1 = arith.constant 0 : index
    %3 = vector.load %arg14[%c0, %c0_1] : memref<16x128xf32, #tpu.memory_space<vmem>>, vector<16x128xf32>
    %4 = tpu.iota {dimensions = array<i32: 0>} : vector<16x2xi32>
    %5 = tpu.iota {dimensions = array<i32: 1>} : vector<16x2xi32>
    %c8_i32 = arith.constant 8 : i32
    %6 = vector.broadcast %c8_i32 : i32 to vector<16x2xi32>
    %7 = arith.muli %5, %6 : vector<16x2xi32>
    %8 = arith.cmpi sge, %4, %7 : vector<16x2xi32>
    %c1_i32 = arith.constant 1 : i32
    %9 = vector.broadcast %c1_i32 : i32 to vector<16x2xi32>
    %10 = arith.addi %5, %9 : vector<16x2xi32>
    %c8_i32_2 = arith.constant 8 : i32
    %11 = vector.broadcast %c8_i32_2 : i32 to vector<16x2xi32>
    %12 = arith.muli %10, %11 : vector<16x2xi32>
    %13 = arith.cmpi slt, %4, %12 : vector<16x2xi32>
    %14 = arith.andi %8, %13 : vector<16x2xi1>
    %15 = arith.extui %14 : vector<16x2xi1> to vector<16x2xi32>
    %16 = arith.sitofp %15 : vector<16x2xi32> to vector<16x2xf32>
    %17 = tpu.iota {dimensions = array<i32: 1>} : vector<2x16xi32>
    %18 = tpu.iota {dimensions = array<i32: 0>} : vector<2x16xi32>
    %c8_i32_3 = arith.constant 8 : i32
    %19 = vector.broadcast %c8_i32_3 : i32 to vector<2x16xi32>
    %20 = arith.muli %18, %19 : vector<2x16xi32>
    %21 = arith.cmpi sge, %17, %20 : vector<2x16xi32>
    %c1_i32_4 = arith.constant 1 : i32
    %22 = vector.broadcast %c1_i32_4 : i32 to vector<2x16xi32>
    %23 = arith.addi %18, %22 : vector<2x16xi32>
    %c8_i32_5 = arith.constant 8 : i32
    %24 = vector.broadcast %c8_i32_5 : i32 to vector<2x16xi32>
    %25 = arith.muli %23, %24 : vector<2x16xi32>
    %26 = arith.cmpi slt, %17, %25 : vector<2x16xi32>
    %27 = arith.andi %21, %26 : vector<2x16xi1>
    %28 = arith.extui %27 : vector<2x16xi1> to vector<2x16xi32>
    %29 = arith.sitofp %28 : vector<2x16xi32> to vector<2x16xf32>
    %cst = arith.constant dense<0.000000e+00> : vector<16x16xf32>
    %30 = tpu.matmul %16, %29, %cst {dimension_numbers = #tpu.dot_dimension_numbers<[1], [0], [0], [1], [0, 0, 1, 1], [], []>} : vector<16x2xf32>, vector<2x16xf32>, vector<16x16xf32> -> vector<16x16xf32>
    %cst_6 = arith.constant 1.000000e+00 : f32
    %31 = vector.broadcast %cst_6 : f32 to vector<16x16xf32>
    %32 = arith.subf %30, %31 : vector<16x16xf32>
    %cst_7 = arith.constant 1.000000e+30 : f32
    %33 = vector.broadcast %cst_7 : f32 to vector<16x16xf32>
    %34 = arith.mulf %32, %33 : vector<16x16xf32>
    %c8_i32_8 = arith.constant 8 : i32
    %35 = vector.broadcast %c8_i32_8 : i32 to vector<16x2xi32>
    %36 = arith.muli %5, %35 : vector<16x2xi32>
    %37 = arith.cmpi eq, %4, %36 : vector<16x2xi32>
    %38 = arith.extui %37 : vector<16x2xi1> to vector<16x2xi32>
    %39 = arith.sitofp %38 : vector<16x2xi32> to vector<16x2xf32>
    %cst_9 = arith.constant dense<0xFF800000> : vector<16xf32>
    %40 = vector.multi_reduction <maximumf>, %39, %cst_9 [1] : vector<16x2xf32> to vector<16xf32>
    %41 = vector.shape_cast %40 : vector<16xf32> to vector<16x1xf32>
    %cst_10 = arith.constant 1.000000e+00 : f32
    %42 = vector.broadcast %cst_10 : f32 to vector<16x1xf32>
    %43 = arith.subf %42, %41 : vector<16x1xf32>
    %c8_i32_11 = arith.constant 8 : i32
    %44 = vector.broadcast %c8_i32_11 : i32 to vector<16x2xi32>
    %45 = arith.muli %5, %44 : vector<16x2xi32>
    %c7_i32 = arith.constant 7 : i32
    %46 = vector.broadcast %c7_i32 : i32 to vector<16x2xi32>
    %47 = arith.addi %45, %46 : vector<16x2xi32>
    %48 = arith.cmpi eq, %4, %47 : vector<16x2xi32>
    %49 = arith.extui %48 : vector<16x2xi1> to vector<16x2xi32>
    %50 = arith.sitofp %49 : vector<16x2xi32> to vector<16x2xf32>
    %cst_12 = arith.constant dense<0xFF800000> : vector<16xf32>
    %51 = vector.multi_reduction <maximumf>, %50, %cst_12 [1] : vector<16x2xf32> to vector<16xf32>
    %52 = vector.shape_cast %51 : vector<16xf32> to vector<16x1xf32>
    %cst_13 = arith.constant 1.000000e+00 : f32
    %53 = vector.broadcast %cst_13 : f32 to vector<16x1xf32>
    %54 = arith.subf %53, %52 : vector<16x1xf32>
    %c0_14 = arith.constant 0 : index
    %c0_15 = arith.constant 0 : index
    %c0_16 = arith.constant 0 : index
    %55 = vector.load %arg2[%c0_14, %c0_15, %c0_16] : memref<1x6x128xf32, #tpu.memory_space<vmem>>, vector<1x6x128xf32>
    %56 = vector.shape_cast %55 : vector<1x6x128xf32> to vector<6x128xf32>
    %c0_17 = arith.constant 0 : index
    %c0_18 = arith.constant 0 : index
    %c0_19 = arith.constant 0 : index
    %57 = vector.load %arg3[%c0_17, %c0_18, %c0_19] : memref<1x6x256xf32, #tpu.memory_space<vmem>>, vector<1x6x256xf32>
    %58 = vector.shape_cast %57 : vector<1x6x256xf32> to vector<6x256xf32>
    %59 = vector.extract_strided_slice %56 {offsets = [0, 0], sizes = [1, 128], strides = [1, 1]} : vector<6x128xf32> to vector<1x128xf32>
    %60 = vector.extract_strided_slice %56 {offsets = [1, 0], sizes = [1, 128], strides = [1, 1]} : vector<6x128xf32> to vector<1x128xf32>
    %cst_20 = arith.constant dense<0.000000e+00> : vector<16xf32>
    %61 = vector.multi_reduction <add>, %3, %cst_20 [1] : vector<16x128xf32> to vector<16xf32>
    %62 = vector.shape_cast %61 : vector<16xf32> to vector<16x1xf32>
    %63 = arith.mulf %3, %3 : vector<16x128xf32>
    %cst_21 = arith.constant dense<0.000000e+00> : vector<16xf32>
    %64 = vector.multi_reduction <add>, %63, %cst_21 [1] : vector<16x128xf32> to vector<16xf32>
    %65 = vector.shape_cast %64 : vector<16xf32> to vector<16x1xf32>
    %cst_22 = arith.constant 4.000000e+01 : f32
    %66 = vector.broadcast %cst_22 : f32 to vector<16x1xf32>
    %67 = arith.divf %62, %66 : vector<16x1xf32>
    %cst_23 = arith.constant 4.000000e+01 : f32
    %68 = vector.broadcast %cst_23 : f32 to vector<16x1xf32>
    %69 = arith.divf %65, %68 : vector<16x1xf32>
    %70 = arith.mulf %67, %67 : vector<16x1xf32>
    %71 = arith.subf %69, %70 : vector<16x1xf32>
    %72 = vector.broadcast %67 : vector<16x1xf32> to vector<16x128xf32>
    %73 = arith.subf %3, %72 : vector<16x128xf32>
    %cst_24 = arith.constant 9.99999974E-6 : f32
    %74 = vector.broadcast %cst_24 : f32 to vector<16x1xf32>
    %75 = arith.addf %71, %74 : vector<16x1xf32>
    %76 = math.rsqrt %75 : vector<16x1xf32>
    %77 = vector.broadcast %76 : vector<16x1xf32> to vector<16x128xf32>
    %78 = arith.mulf %73, %77 : vector<16x128xf32>
    %79 = vector.broadcast %59 : vector<1x128xf32> to vector<16x128xf32>
    %80 = arith.mulf %78, %79 : vector<16x128xf32>
    %81 = vector.broadcast %60 : vector<1x128xf32> to vector<16x128xf32>
    %82 = arith.addf %80, %81 : vector<16x128xf32>
    %cst_25 = arith.constant 0.000000e+00 : f32
    %83 = vector.broadcast %cst_25 : f32 to vector<16x128xf32>
    %c0_26 = arith.constant 0 : index
    %c0_27 = arith.constant 0 : index
    %c0_28 = arith.constant 0 : index
    %c0_29 = arith.constant 0 : index
    %84 = vector.load %arg4[%c0_26, %c0_27, %c0_28, %c0_29] : memref<1x4x16x128xbf16, #tpu.memory_space<vmem>>, vector<1x1x16x128xbf16>
    %85 = vector.shape_cast %84 : vector<1x1x16x128xbf16> to vector<16x128xbf16>
    %86 = arith.truncf %82 : vector<16x128xf32> to vector<16x128xbf16>
    %cst_30 = arith.constant dense<0.000000e+00> : vector<16x16xf32>
    %87 = tpu.matmul %86, %85, %cst_30 {dimension_numbers = #tpu.dot_dimension_numbers<[1], [1], [0], [0], [0, 0, 1, 0], [], []>} : vector<16x128xbf16>, vector<16x128xbf16>, vector<16x16xf32> -> vector<16x16xf32>
    %c0_31 = arith.constant 0 : index
    %c0_32 = arith.constant 0 : index
    %c0_33 = arith.constant 0 : index
    %c0_34 = arith.constant 0 : index
    %88 = vector.load %arg5[%c0_31, %c0_32, %c0_33, %c0_34] : memref<1x4x16x128xbf16, #tpu.memory_space<vmem>>, vector<1x1x16x128xbf16>
    %89 = vector.shape_cast %88 : vector<1x1x16x128xbf16> to vector<16x128xbf16>
    %90 = arith.truncf %82 : vector<16x128xf32> to vector<16x128xbf16>
    %cst_35 = arith.constant dense<0.000000e+00> : vector<16x16xf32>
    %91 = tpu.matmul %90, %89, %cst_35 {dimension_numbers = #tpu.dot_dimension_numbers<[1], [1], [0], [0], [0, 0, 1, 0], [], []>} : vector<16x128xbf16>, vector<16x128xbf16>, vector<16x16xf32> -> vector<16x16xf32>
    %c0_36 = arith.constant 0 : index
    %c0_37 = arith.constant 0 : index
    %c0_38 = arith.constant 0 : index
    %c0_39 = arith.constant 0 : index
    %92 = vector.load %arg6[%c0_36, %c0_37, %c0_38, %c0_39] : memref<1x4x16x128xbf16, #tpu.memory_space<vmem>>, vector<1x1x16x128xbf16>
    %93 = vector.shape_cast %92 : vector<1x1x16x128xbf16> to vector<16x128xbf16>
    %94 = arith.truncf %82 : vector<16x128xf32> to vector<16x128xbf16>
    %cst_40 = arith.constant dense<0.000000e+00> : vector<16x16xf32>
    %95 = tpu.matmul %94, %93, %cst_40 {dimension_numbers = #tpu.dot_dimension_numbers<[1], [1], [0], [0], [0, 0, 1, 0], [], []>} : vector<16x128xbf16>, vector<16x128xbf16>, vector<16x16xf32> -> vector<16x16xf32>
    %96 = arith.truncf %87 : vector<16x16xf32> to vector<16x16xbf16>
    %97 = arith.truncf %91 : vector<16x16xf32> to vector<16x16xbf16>
    %cst_41 = arith.constant dense<0.000000e+00> : vector<16x16xf32>
    %98 = tpu.matmul %96, %97, %cst_41 {dimension_numbers = #tpu.dot_dimension_numbers<[1], [1], [0], [0], [0, 0, 1, 0], [], []>} : vector<16x16xbf16>, vector<16x16xbf16>, vector<16x16xf32> -> vector<16x16xf32>
    %99 = arith.addf %98, %34 : vector<16x16xf32>
    %cst_42 = arith.constant dense<0xFF800000> : vector<16xf32>
    %100 = vector.multi_reduction <maximumf>, %99, %cst_42 [1] : vector<16x16xf32> to vector<16xf32>
    %101 = vector.shape_cast %100 : vector<16xf32> to vector<16x1xf32>
    %102 = vector.broadcast %101 : vector<16x1xf32> to vector<16x16xf32>
    %103 = arith.subf %99, %102 : vector<16x16xf32>
    %104 = math.exp %103 : vector<16x16xf32>
    %cst_43 = arith.constant dense<0.000000e+00> : vector<16xf32>
    %105 = vector.multi_reduction <add>, %104, %cst_43 [1] : vector<16x16xf32> to vector<16xf32>
    %106 = vector.shape_cast %105 : vector<16xf32> to vector<16x1xf32>
    %107 = tpu.reciprocal %106 {approx = true} : vector<16x1xf32> -> vector<16x1xf32>
    %108 = vector.broadcast %107 : vector<16x1xf32> to vector<16x16xf32>
    %109 = arith.mulf %104, %108 : vector<16x16xf32>
    %110 = arith.truncf %109 : vector<16x16xf32> to vector<16x16xbf16>
    %111 = arith.truncf %95 : vector<16x16xf32> to vector<16x16xbf16>
    %cst_44 = arith.constant dense<0.000000e+00> : vector<16x16xf32>
    %112 = tpu.matmul %110, %111, %cst_44 {dimension_numbers = #tpu.dot_dimension_numbers<[1], [0], [0], [1], [0, 0, 1, 1], [], []>} : vector<16x16xbf16>, vector<16x16xbf16>, vector<16x16xf32> -> vector<16x16xf32>
    %c0_45 = arith.constant 0 : index
    %c0_46 = arith.constant 0 : index
    %c0_47 = arith.constant 0 : index
    %c0_48 = arith.constant 0 : index
    %113 = vector.load %arg7[%c0_45, %c0_46, %c0_47, %c0_48] : memref<1x4x16x128xbf16, #tpu.memory_space<vmem>>, vector<1x1x16x128xbf16>
    %114 = vector.shape_cast %113 : vector<1x1x16x128xbf16> to vector<16x128xbf16>
    %115 = arith.truncf %112 : vector<16x16xf32> to vector<16x16xbf16>
    %cst_49 = arith.constant dense<0.000000e+00> : vector<16x128xf32>
    %116 = tpu.matmul %115, %114, %cst_49 {dimension_numbers = #tpu.dot_dimension_numbers<[1], [0], [0], [1], [0, 0, 1, 1], [], []>} : vector<16x16xbf16>, vector<16x128xbf16>, vector<16x128xf32> -> vector<16x128xf32>
    %117 = arith.addf %83, %116 : vector<16x128xf32>
    %c0_50 = arith.constant 0 : index
    %c1 = arith.constant 1 : index
    %c0_51 = arith.constant 0 : index
    %c0_52 = arith.constant 0 : index
    %118 = vector.load %arg4[%c0_50, %c1, %c0_51, %c0_52] : memref<1x4x16x128xbf16, #tpu.memory_space<vmem>>, vector<1x1x16x128xbf16>
    %119 = vector.shape_cast %118 : vector<1x1x16x128xbf16> to vector<16x128xbf16>
    %120 = arith.truncf %82 : vector<16x128xf32> to vector<16x128xbf16>
    %cst_53 = arith.constant dense<0.000000e+00> : vector<16x16xf32>
    %121 = tpu.matmul %120, %119, %cst_53 {dimension_numbers = #tpu.dot_dimension_numbers<[1], [1], [0], [0], [0, 0, 1, 0], [], []>} : vector<16x128xbf16>, vector<16x128xbf16>, vector<16x16xf32> -> vector<16x16xf32>
    %c0_54 = arith.constant 0 : index
    %c1_55 = arith.constant 1 : index
    %c0_56 = arith.constant 0 : index
    %c0_57 = arith.constant 0 : index
    %122 = vector.load %arg5[%c0_54, %c1_55, %c0_56, %c0_57] : memref<1x4x16x128xbf16, #tpu.memory_space<vmem>>, vector<1x1x16x128xbf16>
    %123 = vector.shape_cast %122 : vector<1x1x16x128xbf16> to vector<16x128xbf16>
    %124 = arith.truncf %82 : vector<16x128xf32> to vector<16x128xbf16>
    %cst_58 = arith.constant dense<0.000000e+00> : vector<16x16xf32>
    %125 = tpu.matmul %124, %123, %cst_58 {dimension_numbers = #tpu.dot_dimension_numbers<[1], [1], [0], [0], [0, 0, 1, 0], [], []>} : vector<16x128xbf16>, vector<16x128xbf16>, vector<16x16xf32> -> vector<16x16xf32>
    %c0_59 = arith.constant 0 : index
    %c1_60 = arith.constant 1 : index
    %c0_61 = arith.constant 0 : index
    %c0_62 = arith.constant 0 : index
    %126 = vector.load %arg6[%c0_59, %c1_60, %c0_61, %c0_62] : memref<1x4x16x128xbf16, #tpu.memory_space<vmem>>, vector<1x1x16x128xbf16>
    %127 = vector.shape_cast %126 : vector<1x1x16x128xbf16> to vector<16x128xbf16>
    %128 = arith.truncf %82 : vector<16x128xf32> to vector<16x128xbf16>
    %cst_63 = arith.constant dense<0.000000e+00> : vector<16x16xf32>
    %129 = tpu.matmul %128, %127, %cst_63 {dimension_numbers = #tpu.dot_dimension_numbers<[1], [1], [0], [0], [0, 0, 1, 0], [], []>} : vector<16x128xbf16>, vector<16x128xbf16>, vector<16x16xf32> -> vector<16x16xf32>
    %130 = arith.truncf %121 : vector<16x16xf32> to vector<16x16xbf16>
    %131 = arith.truncf %125 : vector<16x16xf32> to vector<16x16xbf16>
    %cst_64 = arith.constant dense<0.000000e+00> : vector<16x16xf32>
    %132 = tpu.matmul %130, %131, %cst_64 {dimension_numbers = #tpu.dot_dimension_numbers<[1], [1], [0], [0], [0, 0, 1, 0], [], []>} : vector<16x16xbf16>, vector<16x16xbf16>, vector<16x16xf32> -> vector<16x16xf32>
    %133 = arith.addf %132, %34 : vector<16x16xf32>
    %cst_65 = arith.constant dense<0xFF800000> : vector<16xf32>
    %134 = vector.multi_reduction <maximumf>, %133, %cst_65 [1] : vector<16x16xf32> to vector<16xf32>
    %135 = vector.shape_cast %134 : vector<16xf32> to vector<16x1xf32>
    %136 = vector.broadcast %135 : vector<16x1xf32> to vector<16x16xf32>
    %137 = arith.subf %133, %136 : vector<16x16xf32>
    %138 = math.exp %137 : vector<16x16xf32>
    %cst_66 = arith.constant dense<0.000000e+00> : vector<16xf32>
    %139 = vector.multi_reduction <add>, %138, %cst_66 [1] : vector<16x16xf32> to vector<16xf32>
    %140 = vector.shape_cast %139 : vector<16xf32> to vector<16x1xf32>
    %141 = tpu.reciprocal %140 {approx = true} : vector<16x1xf32> -> vector<16x1xf32>
    %142 = vector.broadcast %141 : vector<16x1xf32> to vector<16x16xf32>
    %143 = arith.mulf %138, %142 : vector<16x16xf32>
    %144 = arith.truncf %143 : vector<16x16xf32> to vector<16x16xbf16>
    %145 = arith.truncf %129 : vector<16x16xf32> to vector<16x16xbf16>
    %cst_67 = arith.constant dense<0.000000e+00> : vector<16x16xf32>
    %146 = tpu.matmul %144, %145, %cst_67 {dimension_numbers = #tpu.dot_dimension_numbers<[1], [0], [0], [1], [0, 0, 1, 1], [], []>} : vector<16x16xbf16>, vector<16x16xbf16>, vector<16x16xf32> -> vector<16x16xf32>
    %c0_68 = arith.constant 0 : index
    %c1_69 = arith.constant 1 : index
    %c0_70 = arith.constant 0 : index
    %c0_71 = arith.constant 0 : index
    %147 = vector.load %arg7[%c0_68, %c1_69, %c0_70, %c0_71] : memref<1x4x16x128xbf16, #tpu.memory_space<vmem>>, vector<1x1x16x128xbf16>
    %148 = vector.shape_cast %147 : vector<1x1x16x128xbf16> to vector<16x128xbf16>
    %149 = arith.truncf %146 : vector<16x16xf32> to vector<16x16xbf16>
    %cst_72 = arith.constant dense<0.000000e+00> : vector<16x128xf32>
    %150 = tpu.matmul %149, %148, %cst_72 {dimension_numbers = #tpu.dot_dimension_numbers<[1], [0], [0], [1], [0, 0, 1, 1], [], []>} : vector<16x16xbf16>, vector<16x128xbf16>, vector<16x128xf32> -> vector<16x128xf32>
    %151 = arith.addf %117, %150 : vector<16x128xf32>
    %c0_73 = arith.constant 0 : index
    %c2 = arith.constant 2 : index
    %c0_74 = arith.constant 0 : index
    %c0_75 = arith.constant 0 : index
    %152 = vector.load %arg4[%c0_73, %c2, %c0_74, %c0_75] : memref<1x4x16x128xbf16, #tpu.memory_space<vmem>>, vector<1x1x16x128xbf16>
    %153 = vector.shape_cast %152 : vector<1x1x16x128xbf16> to vector<16x128xbf16>
    %154 = arith.truncf %82 : vector<16x128xf32> to vector<16x128xbf16>
    %cst_76 = arith.constant dense<0.000000e+00> : vector<16x16xf32>
    %155 = tpu.matmul %154, %153, %cst_76 {dimension_numbers = #tpu.dot_dimension_numbers<[1], [1], [0], [0], [0, 0, 1, 0], [], []>} : vector<16x128xbf16>, vector<16x128xbf16>, vector<16x16xf32> -> vector<16x16xf32>
    %c0_77 = arith.constant 0 : index
    %c2_78 = arith.constant 2 : index
    %c0_79 = arith.constant 0 : index
    %c0_80 = arith.constant 0 : index
    %156 = vector.load %arg5[%c0_77, %c2_78, %c0_79, %c0_80] : memref<1x4x16x128xbf16, #tpu.memory_space<vmem>>, vector<1x1x16x128xbf16>
    %157 = vector.shape_cast %156 : vector<1x1x16x128xbf16> to vector<16x128xbf16>
    %158 = arith.truncf %82 : vector<16x128xf32> to vector<16x128xbf16>
    %cst_81 = arith.constant dense<0.000000e+00> : vector<16x16xf32>
    %159 = tpu.matmul %158, %157, %cst_81 {dimension_numbers = #tpu.dot_dimension_numbers<[1], [1], [0], [0], [0, 0, 1, 0], [], []>} : vector<16x128xbf16>, vector<16x128xbf16>, vector<16x16xf32> -> vector<16x16xf32>
    %c0_82 = arith.constant 0 : index
    %c2_83 = arith.constant 2 : index
    %c0_84 = arith.constant 0 : index
    %c0_85 = arith.constant 0 : index
    %160 = vector.load %arg6[%c0_82, %c2_83, %c0_84, %c0_85] : memref<1x4x16x128xbf16, #tpu.memory_space<vmem>>, vector<1x1x16x128xbf16>
    %161 = vector.shape_cast %160 : vector<1x1x16x128xbf16> to vector<16x128xbf16>
    %162 = arith.truncf %82 : vector<16x128xf32> to vector<16x128xbf16>
    %cst_86 = arith.constant dense<0.000000e+00> : vector<16x16xf32>
    %163 = tpu.matmul %162, %161, %cst_86 {dimension_numbers = #tpu.dot_dimension_numbers<[1], [1], [0], [0], [0, 0, 1, 0], [], []>} : vector<16x128xbf16>, vector<16x128xbf16>, vector<16x16xf32> -> vector<16x16xf32>
    %164 = arith.truncf %155 : vector<16x16xf32> to vector<16x16xbf16>
    %165 = arith.truncf %159 : vector<16x16xf32> to vector<16x16xbf16>
    %cst_87 = arith.constant dense<0.000000e+00> : vector<16x16xf32>
    %166 = tpu.matmul %164, %165, %cst_87 {dimension_numbers = #tpu.dot_dimension_numbers<[1], [1], [0], [0], [0, 0, 1, 0], [], []>} : vector<16x16xbf16>, vector<16x16xbf16>, vector<16x16xf32> -> vector<16x16xf32>
    %167 = arith.addf %166, %34 : vector<16x16xf32>
    %cst_88 = arith.constant dense<0xFF800000> : vector<16xf32>
    %168 = vector.multi_reduction <maximumf>, %167, %cst_88 [1] : vector<16x16xf32> to vector<16xf32>
    %169 = vector.shape_cast %168 : vector<16xf32> to vector<16x1xf32>
    %170 = vector.broadcast %169 : vector<16x1xf32> to vector<16x16xf32>
    %171 = arith.subf %167, %170 : vector<16x16xf32>
    %172 = math.exp %171 : vector<16x16xf32>
    %cst_89 = arith.constant dense<0.000000e+00> : vector<16xf32>
    %173 = vector.multi_reduction <add>, %172, %cst_89 [1] : vector<16x16xf32> to vector<16xf32>
    %174 = vector.shape_cast %173 : vector<16xf32> to vector<16x1xf32>
    %175 = tpu.reciprocal %174 {approx = true} : vector<16x1xf32> -> vector<16x1xf32>
    %176 = vector.broadcast %175 : vector<16x1xf32> to vector<16x16xf32>
    %177 = arith.mulf %172, %176 : vector<16x16xf32>
    %178 = arith.truncf %177 : vector<16x16xf32> to vector<16x16xbf16>
    %179 = arith.truncf %163 : vector<16x16xf32> to vector<16x16xbf16>
    %cst_90 = arith.constant dense<0.000000e+00> : vector<16x16xf32>
    %180 = tpu.matmul %178, %179, %cst_90 {dimension_numbers = #tpu.dot_dimension_numbers<[1], [0], [0], [1], [0, 0, 1, 1], [], []>} : vector<16x16xbf16>, vector<16x16xbf16>, vector<16x16xf32> -> vector<16x16xf32>
    %c0_91 = arith.constant 0 : index
    %c2_92 = arith.constant 2 : index
    %c0_93 = arith.constant 0 : index
    %c0_94 = arith.constant 0 : index
    %181 = vector.load %arg7[%c0_91, %c2_92, %c0_93, %c0_94] : memref<1x4x16x128xbf16, #tpu.memory_space<vmem>>, vector<1x1x16x128xbf16>
    %182 = vector.shape_cast %181 : vector<1x1x16x128xbf16> to vector<16x128xbf16>
    %183 = arith.truncf %180 : vector<16x16xf32> to vector<16x16xbf16>
    %cst_95 = arith.constant dense<0.000000e+00> : vector<16x128xf32>
    %184 = tpu.matmul %183, %182, %cst_95 {dimension_numbers = #tpu.dot_dimension_numbers<[1], [0], [0], [1], [0, 0, 1, 1], [], []>} : vector<16x16xbf16>, vector<16x128xbf16>, vector<16x128xf32> -> vector<16x128xf32>
    %185 = arith.addf %151, %184 : vector<16x128xf32>
    %c0_96 = arith.constant 0 : index
    %c3 = arith.constant 3 : index
    %c0_97 = arith.constant 0 : index
    %c0_98 = arith.constant 0 : index
    %186 = vector.load %arg4[%c0_96, %c3, %c0_97, %c0_98] : memref<1x4x16x128xbf16, #tpu.memory_space<vmem>>, vector<1x1x16x128xbf16>
    %187 = vector.shape_cast %186 : vector<1x1x16x128xbf16> to vector<16x128xbf16>
    %188 = arith.truncf %82 : vector<16x128xf32> to vector<16x128xbf16>
    %cst_99 = arith.constant dense<0.000000e+00> : vector<16x16xf32>
    %189 = tpu.matmul %188, %187, %cst_99 {dimension_numbers = #tpu.dot_dimension_numbers<[1], [1], [0], [0], [0, 0, 1, 0], [], []>} : vector<16x128xbf16>, vector<16x128xbf16>, vector<16x16xf32> -> vector<16x16xf32>
    %c0_100 = arith.constant 0 : index
    %c3_101 = arith.constant 3 : index
    %c0_102 = arith.constant 0 : index
    %c0_103 = arith.constant 0 : index
    %190 = vector.load %arg5[%c0_100, %c3_101, %c0_102, %c0_103] : memref<1x4x16x128xbf16, #tpu.memory_space<vmem>>, vector<1x1x16x128xbf16>
    %191 = vector.shape_cast %190 : vector<1x1x16x128xbf16> to vector<16x128xbf16>
    %192 = arith.truncf %82 : vector<16x128xf32> to vector<16x128xbf16>
    %cst_104 = arith.constant dense<0.000000e+00> : vector<16x16xf32>
    %193 = tpu.matmul %192, %191, %cst_104 {dimension_numbers = #tpu.dot_dimension_numbers<[1], [1], [0], [0], [0, 0, 1, 0], [], []>} : vector<16x128xbf16>, vector<16x128xbf16>, vector<16x16xf32> -> vector<16x16xf32>
    %c0_105 = arith.constant 0 : index
    %c3_106 = arith.constant 3 : index
    %c0_107 = arith.constant 0 : index
    %c0_108 = arith.constant 0 : index
    %194 = vector.load %arg6[%c0_105, %c3_106, %c0_107, %c0_108] : memref<1x4x16x128xbf16, #tpu.memory_space<vmem>>, vector<1x1x16x128xbf16>
    %195 = vector.shape_cast %194 : vector<1x1x16x128xbf16> to vector<16x128xbf16>
    %196 = arith.truncf %82 : vector<16x128xf32> to vector<16x128xbf16>
    %cst_109 = arith.constant dense<0.000000e+00> : vector<16x16xf32>
    %197 = tpu.matmul %196, %195, %cst_109 {dimension_numbers = #tpu.dot_dimension_numbers<[1], [1], [0], [0], [0, 0, 1, 0], [], []>} : vector<16x128xbf16>, vector<16x128xbf16>, vector<16x16xf32> -> vector<16x16xf32>
    %198 = arith.truncf %189 : vector<16x16xf32> to vector<16x16xbf16>
    %199 = arith.truncf %193 : vector<16x16xf32> to vector<16x16xbf16>
    %cst_110 = arith.constant dense<0.000000e+00> : vector<16x16xf32>
    %200 = tpu.matmul %198, %199, %cst_110 {dimension_numbers = #tpu.dot_dimension_numbers<[1], [1], [0], [0], [0, 0, 1, 0], [], []>} : vector<16x16xbf16>, vector<16x16xbf16>, vector<16x16xf32> -> vector<16x16xf32>
    %201 = arith.addf %200, %34 : vector<16x16xf32>
    %cst_111 = arith.constant dense<0xFF800000> : vector<16xf32>
    %202 = vector.multi_reduction <maximumf>, %201, %cst_111 [1] : vector<16x16xf32> to vector<16xf32>
    %203 = vector.shape_cast %202 : vector<16xf32> to vector<16x1xf32>
    %204 = vector.broadcast %203 : vector<16x1xf32> to vector<16x16xf32>
    %205 = arith.subf %201, %204 : vector<16x16xf32>
    %206 = math.exp %205 : vector<16x16xf32>
    %cst_112 = arith.constant dense<0.000000e+00> : vector<16xf32>
    %207 = vector.multi_reduction <add>, %206, %cst_112 [1] : vector<16x16xf32> to vector<16xf32>
    %208 = vector.shape_cast %207 : vector<16xf32> to vector<16x1xf32>
    %209 = tpu.reciprocal %208 {approx = true} : vector<16x1xf32> -> vector<16x1xf32>
    %210 = vector.broadcast %209 : vector<16x1xf32> to vector<16x16xf32>
    %211 = arith.mulf %206, %210 : vector<16x16xf32>
    %212 = arith.truncf %211 : vector<16x16xf32> to vector<16x16xbf16>
    %213 = arith.truncf %197 : vector<16x16xf32> to vector<16x16xbf16>
    %cst_113 = arith.constant dense<0.000000e+00> : vector<16x16xf32>
    %214 = tpu.matmul %212, %213, %cst_113 {dimension_numbers = #tpu.dot_dimension_numbers<[1], [0], [0], [1], [0, 0, 1, 1], [], []>} : vector<16x16xbf16>, vector<16x16xbf16>, vector<16x16xf32> -> vector<16x16xf32>
    %c0_114 = arith.constant 0 : index
    %c3_115 = arith.constant 3 : index
    %c0_116 = arith.constant 0 : index
    %c0_117 = arith.constant 0 : index
    %215 = vector.load %arg7[%c0_114, %c3_115, %c0_116, %c0_117] : memref<1x4x16x128xbf16, #tpu.memory_space<vmem>>, vector<1x1x16x128xbf16>
    %216 = vector.shape_cast %215 : vector<1x1x16x128xbf16> to vector<16x128xbf16>
    %217 = arith.truncf %214 : vector<16x16xf32> to vector<16x16xbf16>
    %cst_118 = arith.constant dense<0.000000e+00> : vector<16x128xf32>
    %218 = tpu.matmul %217, %216, %cst_118 {dimension_numbers = #tpu.dot_dimension_numbers<[1], [0], [0], [1], [0, 0, 1, 1], [], []>} : vector<16x16xbf16>, vector<16x128xbf16>, vector<16x128xf32> -> vector<16x128xf32>
    %219 = arith.addf %185, %218 : vector<16x128xf32>
    %220 = arith.addf %3, %219 : vector<16x128xf32>
    %221 = vector.extract_strided_slice %56 {offsets = [2, 0], sizes = [1, 128], strides = [1, 1]} : vector<6x128xf32> to vector<1x128xf32>
    %222 = vector.broadcast %221 : vector<1x128xf32> to vector<16x128xf32>
    %223 = arith.addf %220, %222 : vector<16x128xf32>
    %cst_119 = arith.constant dense<0.000000e+00> : vector<16xf32>
    %224 = vector.multi_reduction <add>, %223, %cst_119 [1] : vector<16x128xf32> to vector<16xf32>
    %225 = vector.shape_cast %224 : vector<16xf32> to vector<16x1xf32>
    %226 = arith.mulf %223, %223 : vector<16x128xf32>
    %cst_120 = arith.constant dense<0.000000e+00> : vector<16xf32>
    %227 = vector.multi_reduction <add>, %226, %cst_120 [1] : vector<16x128xf32> to vector<16xf32>
    %228 = vector.shape_cast %227 : vector<16xf32> to vector<16x1xf32>
    %cst_121 = arith.constant 4.000000e+01 : f32
    %229 = vector.broadcast %cst_121 : f32 to vector<16x1xf32>
    %230 = arith.divf %225, %229 : vector<16x1xf32>
    %cst_122 = arith.constant 4.000000e+01 : f32
    %231 = vector.broadcast %cst_122 : f32 to vector<16x1xf32>
    %232 = arith.divf %228, %231 : vector<16x1xf32>
    %233 = arith.mulf %230, %230 : vector<16x1xf32>
    %234 = arith.subf %232, %233 : vector<16x1xf32>
    %235 = vector.broadcast %230 : vector<16x1xf32> to vector<16x128xf32>
    %236 = arith.subf %223, %235 : vector<16x128xf32>
    %cst_123 = arith.constant 9.99999974E-6 : f32
    %237 = vector.broadcast %cst_123 : f32 to vector<16x1xf32>
    %238 = arith.addf %234, %237 : vector<16x1xf32>
    %239 = math.rsqrt %238 : vector<16x1xf32>
    %240 = vector.broadcast %239 : vector<16x1xf32> to vector<16x128xf32>
    %241 = arith.mulf %236, %240 : vector<16x128xf32>
    %c0_124 = arith.constant 0 : index
    %c0_125 = arith.constant 0 : index
    %c0_126 = arith.constant 0 : index
    %242 = vector.load %arg8[%c0_124, %c0_125, %c0_126] : memref<1x128x256xbf16, #tpu.memory_space<vmem>>, vector<1x128x256xbf16>
    %243 = vector.shape_cast %242 : vector<1x128x256xbf16> to vector<128x256xbf16>
    %244 = arith.truncf %241 : vector<16x128xf32> to vector<16x128xbf16>
    %cst_127 = arith.constant dense<0.000000e+00> : vector<16x256xf32>
    %245 = tpu.matmul %244, %243, %cst_127 {dimension_numbers = #tpu.dot_dimension_numbers<[1], [0], [0], [1], [0, 0, 1, 1], [], []>} : vector<16x128xbf16>, vector<128x256xbf16>, vector<16x256xf32> -> vector<16x256xf32>
    %246 = vector.extract_strided_slice %58 {offsets = [0, 0], sizes = [1, 256], strides = [1, 1]} : vector<6x256xf32> to vector<1x256xf32>
    %247 = vector.broadcast %246 : vector<1x256xf32> to vector<16x256xf32>
    %248 = arith.addf %245, %247 : vector<16x256xf32>
    %c0_128 = arith.constant 0 : index
    %c0_129 = arith.constant 0 : index
    %249 = vector.load %arg11[%c0_128, %c0_129] : memref<10x256xf32, #tpu.memory_space<vmem>>, vector<10x256xf32>
    %250 = vector.extract_strided_slice %58 {offsets = [1, 0], sizes = [1, 256], strides = [1, 1]} : vector<6x256xf32> to vector<1x256xf32>
    %251 = vector.extract_strided_slice %58 {offsets = [2, 0], sizes = [1, 256], strides = [1, 1]} : vector<6x256xf32> to vector<1x256xf32>
    %cst_130 = arith.constant dense<0.000000e+00> : vector<2x256xf32>
    %252 = tpu.matmul %29, %248, %cst_130 {dimension_numbers = #tpu.dot_dimension_numbers<[1], [0], [0], [1], [0, 0, 1, 1], [], []>} : vector<2x16xf32>, vector<16x256xf32>, vector<2x256xf32> -> vector<2x256xf32>
    %253 = arith.mulf %248, %248 : vector<16x256xf32>
    %cst_131 = arith.constant dense<0.000000e+00> : vector<2x256xf32>
    %254 = tpu.matmul %29, %253, %cst_131 {dimension_numbers = #tpu.dot_dimension_numbers<[1], [0], [0], [1], [0, 0, 1, 1], [], []>} : vector<2x16xf32>, vector<16x256xf32>, vector<2x256xf32> -> vector<2x256xf32>
    "tpu.trace_start"() <{level = 10 : i32, message = "bc,gc->bg"}> : () -> ()
    %cst_132 = arith.constant dense<0.000000e+00> : vector<2x10xf32>
    %255 = tpu.matmul %252, %249, %cst_132 {dimension_numbers = #tpu.dot_dimension_numbers<[1], [1], [0], [0], [0, 0, 1, 0], [], []>} : vector<2x256xf32>, vector<10x256xf32>, vector<2x10xf32> -> vector<2x10xf32>
    %cst_133 = arith.constant dense<0.000000e+00> : vector<2x10xf32>
    %256 = tpu.matmul %254, %249, %cst_133 {dimension_numbers = #tpu.dot_dimension_numbers<[1], [1], [0], [0], [0, 0, 1, 0], [], []>} : vector<2x256xf32>, vector<10x256xf32>, vector<2x10xf32> -> vector<2x10xf32>
    "tpu.trace_stop"() : () -> ()
    %cst_134 = arith.constant 1.280000e+02 : f32
    %257 = vector.broadcast %cst_134 : f32 to vector<2x10xf32>
    %258 = arith.divf %255, %257 : vector<2x10xf32>
    %cst_135 = arith.constant 1.280000e+02 : f32
    %259 = vector.broadcast %cst_135 : f32 to vector<2x10xf32>
    %260 = arith.divf %256, %259 : vector<2x10xf32>
    %261 = arith.mulf %258, %258 : vector<2x10xf32>
    %262 = arith.subf %260, %261 : vector<2x10xf32>
    %cst_136 = arith.constant dense<0.000000e+00> : vector<2x256xf32>
    %263 = tpu.matmul %258, %249, %cst_136 {dimension_numbers = #tpu.dot_dimension_numbers<[1], [0], [0], [1], [0, 0, 1, 1], [], []>} : vector<2x10xf32>, vector<10x256xf32>, vector<2x256xf32> -> vector<2x256xf32>
    %cst_137 = arith.constant dense<0.000000e+00> : vector<16x256xf32>
    %264 = tpu.matmul %16, %263, %cst_137 {dimension_numbers = #tpu.dot_dimension_numbers<[1], [0], [0], [1], [0, 0, 1, 1], [], []>} : vector<16x2xf32>, vector<2x256xf32>, vector<16x256xf32> -> vector<16x256xf32>
    %cst_138 = arith.constant dense<0.000000e+00> : vector<2x256xf32>
    %265 = tpu.matmul %262, %249, %cst_138 {dimension_numbers = #tpu.dot_dimension_numbers<[1], [0], [0], [1], [0, 0, 1, 1], [], []>} : vector<2x10xf32>, vector<10x256xf32>, vector<2x256xf32> -> vector<2x256xf32>
    %cst_139 = arith.constant dense<0.000000e+00> : vector<16x256xf32>
    %266 = tpu.matmul %16, %265, %cst_139 {dimension_numbers = #tpu.dot_dimension_numbers<[1], [0], [0], [1], [0, 0, 1, 1], [], []>} : vector<16x2xf32>, vector<2x256xf32>, vector<16x256xf32> -> vector<16x256xf32>
    %267 = arith.subf %248, %264 : vector<16x256xf32>
    %cst_140 = arith.constant 9.99999974E-6 : f32
    %268 = vector.broadcast %cst_140 : f32 to vector<16x256xf32>
    %269 = arith.addf %266, %268 : vector<16x256xf32>
    %270 = math.rsqrt %269 : vector<16x256xf32>
    %271 = arith.mulf %267, %270 : vector<16x256xf32>
    %272 = vector.broadcast %250 : vector<1x256xf32> to vector<16x256xf32>
    %273 = arith.mulf %271, %272 : vector<16x256xf32>
    %274 = vector.broadcast %251 : vector<1x256xf32> to vector<16x256xf32>
    %275 = arith.addf %273, %274 : vector<16x256xf32>
    %cst_141 = arith.constant 5.000000e-01 : f32
    %276 = vector.broadcast %cst_141 : f32 to vector<16x256xf32>
    %277 = arith.mulf %276, %275 : vector<16x256xf32>
    %cst_142 = arith.constant 0.707106769 : f32
    %278 = vector.broadcast %cst_142 : f32 to vector<16x256xf32>
    %279 = arith.mulf %275, %278 : vector<16x256xf32>
    %cst_143 = arith.constant 0.000000e+00 : f32
    %280 = vector.broadcast %cst_143 : f32 to vector<16x256xf32>
    %281 = arith.cmpf oge, %279, %280 : vector<16x256xf32>
    %cst_144 = arith.constant 1.000000e+00 : f32
    %cst_145 = arith.constant -1.000000e+00 : f32
    %282 = vector.broadcast %cst_144 : f32 to vector<16x256xf32>
    %283 = vector.broadcast %cst_145 : f32 to vector<16x256xf32>
    %284 = arith.select %281, %282, %283 : vector<16x256xi1>, vector<16x256xf32>
    %285 = math.absf %279 : vector<16x256xf32>
    %cst_146 = arith.constant 0.327591091 : f32
    %286 = vector.broadcast %cst_146 : f32 to vector<16x256xf32>
    %287 = arith.mulf %286, %285 : vector<16x256xf32>
    %cst_147 = arith.constant 1.000000e+00 : f32
    %288 = vector.broadcast %cst_147 : f32 to vector<16x256xf32>
    %289 = arith.addf %288, %287 : vector<16x256xf32>
    %cst_148 = arith.constant 1.000000e+00 : f32
    %290 = vector.broadcast %cst_148 : f32 to vector<16x256xf32>
    %291 = arith.divf %290, %289 : vector<16x256xf32>
    %cst_149 = arith.constant 1.06140542 : f32
    %292 = vector.broadcast %cst_149 : f32 to vector<16x256xf32>
    %293 = arith.mulf %292, %291 : vector<16x256xf32>
    %cst_150 = arith.constant -1.45315206 : f32
    %294 = vector.broadcast %cst_150 : f32 to vector<16x256xf32>
    %295 = arith.addf %293, %294 : vector<16x256xf32>
    %296 = arith.mulf %295, %291 : vector<16x256xf32>
    %cst_151 = arith.constant 1.42141378 : f32
    %297 = vector.broadcast %cst_151 : f32 to vector<16x256xf32>
    %298 = arith.addf %296, %297 : vector<16x256xf32>
    %299 = arith.mulf %298, %291 : vector<16x256xf32>
    %cst_152 = arith.constant -0.284496725 : f32
    %300 = vector.broadcast %cst_152 : f32 to vector<16x256xf32>
    %301 = arith.addf %299, %300 : vector<16x256xf32>
    %302 = arith.mulf %301, %291 : vector<16x256xf32>
    %cst_153 = arith.constant 0.254829586 : f32
    %303 = vector.broadcast %cst_153 : f32 to vector<16x256xf32>
    %304 = arith.addf %302, %303 : vector<16x256xf32>
    %305 = arith.mulf %304, %291 : vector<16x256xf32>
    %cst_154 = arith.constant 0.000000e+00 : f32
    %306 = vector.broadcast %cst_154 : f32 to vector<16x256xf32>
    %307 = arith.subf %306, %285 : vector<16x256xf32>
    %308 = arith.mulf %307, %285 : vector<16x256xf32>
    %309 = math.exp %308 : vector<16x256xf32>
    %310 = arith.mulf %305, %309 : vector<16x256xf32>
    %cst_155 = arith.constant 1.000000e+00 : f32
    %311 = vector.broadcast %cst_155 : f32 to vector<16x256xf32>
    %312 = arith.subf %311, %310 : vector<16x256xf32>
    %313 = arith.mulf %284, %312 : vector<16x256xf32>
    %cst_156 = arith.constant 1.000000e+00 : f32
    %314 = vector.broadcast %cst_156 : f32 to vector<16x256xf32>
    %315 = arith.addf %314, %313 : vector<16x256xf32>
    %316 = arith.mulf %277, %315 : vector<16x256xf32>
    %c0_157 = arith.constant 0 : index
    %c0_158 = arith.constant 0 : index
    %c0_159 = arith.constant 0 : index
    %c0_160 = arith.constant 0 : index
    %317 = vector.load %arg9[%c0_157, %c0_158, %c0_159, %c0_160] : memref<1x3x256x256xbf16, #tpu.memory_space<vmem>>, vector<1x1x256x256xbf16>
    %318 = vector.shape_cast %317 : vector<1x1x256x256xbf16> to vector<256x256xbf16>
    %319 = arith.truncf %316 : vector<16x256xf32> to vector<16x256xbf16>
    %cst_161 = arith.constant dense<0.000000e+00> : vector<16x256xf32>
    %320 = tpu.matmul %319, %318, %cst_161 {dimension_numbers = #tpu.dot_dimension_numbers<[1], [0], [0], [1], [0, 0, 1, 1], [], []>} : vector<16x256xbf16>, vector<256x256xbf16>, vector<16x256xf32> -> vector<16x256xf32>
    %c0_162 = arith.constant 0 : index
    %c1_163 = arith.constant 1 : index
    %c0_164 = arith.constant 0 : index
    %c0_165 = arith.constant 0 : index
    %321 = vector.load %arg9[%c0_162, %c1_163, %c0_164, %c0_165] : memref<1x3x256x256xbf16, #tpu.memory_space<vmem>>, vector<1x1x256x256xbf16>
    %322 = vector.shape_cast %321 : vector<1x1x256x256xbf16> to vector<256x256xbf16>
    %323 = arith.truncf %316 : vector<16x256xf32> to vector<16x256xbf16>
    %cst_166 = arith.constant dense<0.000000e+00> : vector<16x256xf32>
    %324 = tpu.matmul %323, %322, %cst_166 {dimension_numbers = #tpu.dot_dimension_numbers<[1], [0], [0], [1], [0, 0, 1, 1], [], []>} : vector<16x256xbf16>, vector<256x256xbf16>, vector<16x256xf32> -> vector<16x256xf32>
    %c0_167 = arith.constant 0 : index
    %c2_168 = arith.constant 2 : index
    %c0_169 = arith.constant 0 : index
    %c0_170 = arith.constant 0 : index
    %325 = vector.load %arg9[%c0_167, %c2_168, %c0_169, %c0_170] : memref<1x3x256x256xbf16, #tpu.memory_space<vmem>>, vector<1x1x256x256xbf16>
    %326 = vector.shape_cast %325 : vector<1x1x256x256xbf16> to vector<256x256xbf16>
    %327 = arith.truncf %316 : vector<16x256xf32> to vector<16x256xbf16>
    %cst_171 = arith.constant dense<0.000000e+00> : vector<16x256xf32>
    %328 = tpu.matmul %327, %326, %cst_171 {dimension_numbers = #tpu.dot_dimension_numbers<[1], [0], [0], [1], [0, 0, 1, 1], [], []>} : vector<16x256xbf16>, vector<256x256xbf16>, vector<16x256xf32> -> vector<16x256xf32>
    %cst_172 = arith.constant 0.000000e+00 : f32
    %329 = vector.broadcast %cst_172 : f32 to vector<1x256xf32>
    %330 = vector.extract_strided_slice %320 {offsets = [0, 0], sizes = [15, 256], strides = [1, 1]} : vector<16x256xf32> to vector<15x256xf32>
    %331 = tpu.concatenate %329, %330 in 0 : vector<1x256xf32>, vector<15x256xf32> -> vector<16x256xf32>
    %332 = vector.broadcast %43 : vector<16x1xf32> to vector<16x256xf32>
    %333 = arith.mulf %332, %331 : vector<16x256xf32>
    %334 = arith.addf %324, %333 : vector<16x256xf32>
    %335 = vector.extract_strided_slice %328 {offsets = [1, 0], sizes = [15, 256], strides = [1, 1]} : vector<16x256xf32> to vector<15x256xf32>
    %336 = tpu.concatenate %335, %329 in 0 : vector<15x256xf32>, vector<1x256xf32> -> vector<16x256xf32>
    %337 = vector.broadcast %54 : vector<16x1xf32> to vector<16x256xf32>
    %338 = arith.mulf %337, %336 : vector<16x256xf32>
    %339 = arith.addf %334, %338 : vector<16x256xf32>
    %340 = vector.extract_strided_slice %58 {offsets = [3, 0], sizes = [1, 256], strides = [1, 1]} : vector<6x256xf32> to vector<1x256xf32>
    %341 = vector.broadcast %340 : vector<1x256xf32> to vector<16x256xf32>
    %342 = arith.addf %339, %341 : vector<16x256xf32>
    %c0_173 = arith.constant 0 : index
    %c0_174 = arith.constant 0 : index
    %343 = vector.load %arg11[%c0_173, %c0_174] : memref<10x256xf32, #tpu.memory_space<vmem>>, vector<10x256xf32>
    %344 = vector.extract_strided_slice %58 {offsets = [4, 0], sizes = [1, 256], strides = [1, 1]} : vector<6x256xf32> to vector<1x256xf32>
    %345 = vector.extract_strided_slice %58 {offsets = [5, 0], sizes = [1, 256], strides = [1, 1]} : vector<6x256xf32> to vector<1x256xf32>
    %cst_175 = arith.constant dense<0.000000e+00> : vector<2x256xf32>
    %346 = tpu.matmul %29, %342, %cst_175 {dimension_numbers = #tpu.dot_dimension_numbers<[1], [0], [0], [1], [0, 0, 1, 1], [], []>} : vector<2x16xf32>, vector<16x256xf32>, vector<2x256xf32> -> vector<2x256xf32>
    %347 = arith.mulf %342, %342 : vector<16x256xf32>
    %cst_176 = arith.constant dense<0.000000e+00> : vector<2x256xf32>
    %348 = tpu.matmul %29, %347, %cst_176 {dimension_numbers = #tpu.dot_dimension_numbers<[1], [0], [0], [1], [0, 0, 1, 1], [], []>} : vector<2x16xf32>, vector<16x256xf32>, vector<2x256xf32> -> vector<2x256xf32>
    "tpu.trace_start"() <{level = 10 : i32, message = "bc,gc->bg"}> : () -> ()
    %cst_177 = arith.constant dense<0.000000e+00> : vector<2x10xf32>
    %349 = tpu.matmul %346, %343, %cst_177 {dimension_numbers = #tpu.dot_dimension_numbers<[1], [1], [0], [0], [0, 0, 1, 0], [], []>} : vector<2x256xf32>, vector<10x256xf32>, vector<2x10xf32> -> vector<2x10xf32>
    %cst_178 = arith.constant dense<0.000000e+00> : vector<2x10xf32>
    %350 = tpu.matmul %348, %343, %cst_178 {dimension_numbers = #tpu.dot_dimension_numbers<[1], [1], [0], [0], [0, 0, 1, 0], [], []>} : vector<2x256xf32>, vector<10x256xf32>, vector<2x10xf32> -> vector<2x10xf32>
    "tpu.trace_stop"() : () -> ()
    %cst_179 = arith.constant 1.280000e+02 : f32
    %351 = vector.broadcast %cst_179 : f32 to vector<2x10xf32>
    %352 = arith.divf %349, %351 : vector<2x10xf32>
    %cst_180 = arith.constant 1.280000e+02 : f32
    %353 = vector.broadcast %cst_180 : f32 to vector<2x10xf32>
    %354 = arith.divf %350, %353 : vector<2x10xf32>
    %355 = arith.mulf %352, %352 : vector<2x10xf32>
    %356 = arith.subf %354, %355 : vector<2x10xf32>
    %cst_181 = arith.constant dense<0.000000e+00> : vector<2x256xf32>
    %357 = tpu.matmul %352, %343, %cst_181 {dimension_numbers = #tpu.dot_dimension_numbers<[1], [0], [0], [1], [0, 0, 1, 1], [], []>} : vector<2x10xf32>, vector<10x256xf32>, vector<2x256xf32> -> vector<2x256xf32>
    %cst_182 = arith.constant dense<0.000000e+00> : vector<16x256xf32>
    %358 = tpu.matmul %16, %357, %cst_182 {dimension_numbers = #tpu.dot_dimension_numbers<[1], [0], [0], [1], [0, 0, 1, 1], [], []>} : vector<16x2xf32>, vector<2x256xf32>, vector<16x256xf32> -> vector<16x256xf32>
    %cst_183 = arith.constant dense<0.000000e+00> : vector<2x256xf32>
    %359 = tpu.matmul %356, %343, %cst_183 {dimension_numbers = #tpu.dot_dimension_numbers<[1], [0], [0], [1], [0, 0, 1, 1], [], []>} : vector<2x10xf32>, vector<10x256xf32>, vector<2x256xf32> -> vector<2x256xf32>
    %cst_184 = arith.constant dense<0.000000e+00> : vector<16x256xf32>
    %360 = tpu.matmul %16, %359, %cst_184 {dimension_numbers = #tpu.dot_dimension_numbers<[1], [0], [0], [1], [0, 0, 1, 1], [], []>} : vector<16x2xf32>, vector<2x256xf32>, vector<16x256xf32> -> vector<16x256xf32>
    %361 = arith.subf %342, %358 : vector<16x256xf32>
    %cst_185 = arith.constant 9.99999974E-6 : f32
    %362 = vector.broadcast %cst_185 : f32 to vector<16x256xf32>
    %363 = arith.addf %360, %362 : vector<16x256xf32>
    %364 = math.rsqrt %363 : vector<16x256xf32>
    %365 = arith.mulf %361, %364 : vector<16x256xf32>
    %366 = vector.broadcast %344 : vector<1x256xf32> to vector<16x256xf32>
    %367 = arith.mulf %365, %366 : vector<16x256xf32>
    %368 = vector.broadcast %345 : vector<1x256xf32> to vector<16x256xf32>
    %369 = arith.addf %367, %368 : vector<16x256xf32>
    %cst_186 = arith.constant 5.000000e-01 : f32
    %370 = vector.broadcast %cst_186 : f32 to vector<16x256xf32>
    %371 = arith.mulf %370, %369 : vector<16x256xf32>
    %cst_187 = arith.constant 0.707106769 : f32
    %372 = vector.broadcast %cst_187 : f32 to vector<16x256xf32>
    %373 = arith.mulf %369, %372 : vector<16x256xf32>
    %cst_188 = arith.constant 0.000000e+00 : f32
    %374 = vector.broadcast %cst_188 : f32 to vector<16x256xf32>
    %375 = arith.cmpf oge, %373, %374 : vector<16x256xf32>
    %cst_189 = arith.constant 1.000000e+00 : f32
    %cst_190 = arith.constant -1.000000e+00 : f32
    %376 = vector.broadcast %cst_189 : f32 to vector<16x256xf32>
    %377 = vector.broadcast %cst_190 : f32 to vector<16x256xf32>
    %378 = arith.select %375, %376, %377 : vector<16x256xi1>, vector<16x256xf32>
    %379 = math.absf %373 : vector<16x256xf32>
    %cst_191 = arith.constant 0.327591091 : f32
    %380 = vector.broadcast %cst_191 : f32 to vector<16x256xf32>
    %381 = arith.mulf %380, %379 : vector<16x256xf32>
    %cst_192 = arith.constant 1.000000e+00 : f32
    %382 = vector.broadcast %cst_192 : f32 to vector<16x256xf32>
    %383 = arith.addf %382, %381 : vector<16x256xf32>
    %cst_193 = arith.constant 1.000000e+00 : f32
    %384 = vector.broadcast %cst_193 : f32 to vector<16x256xf32>
    %385 = arith.divf %384, %383 : vector<16x256xf32>
    %cst_194 = arith.constant 1.06140542 : f32
    %386 = vector.broadcast %cst_194 : f32 to vector<16x256xf32>
    %387 = arith.mulf %386, %385 : vector<16x256xf32>
    %cst_195 = arith.constant -1.45315206 : f32
    %388 = vector.broadcast %cst_195 : f32 to vector<16x256xf32>
    %389 = arith.addf %387, %388 : vector<16x256xf32>
    %390 = arith.mulf %389, %385 : vector<16x256xf32>
    %cst_196 = arith.constant 1.42141378 : f32
    %391 = vector.broadcast %cst_196 : f32 to vector<16x256xf32>
    %392 = arith.addf %390, %391 : vector<16x256xf32>
    %393 = arith.mulf %392, %385 : vector<16x256xf32>
    %cst_197 = arith.constant -0.284496725 : f32
    %394 = vector.broadcast %cst_197 : f32 to vector<16x256xf32>
    %395 = arith.addf %393, %394 : vector<16x256xf32>
    %396 = arith.mulf %395, %385 : vector<16x256xf32>
    %cst_198 = arith.constant 0.254829586 : f32
    %397 = vector.broadcast %cst_198 : f32 to vector<16x256xf32>
    %398 = arith.addf %396, %397 : vector<16x256xf32>
    %399 = arith.mulf %398, %385 : vector<16x256xf32>
    %cst_199 = arith.constant 0.000000e+00 : f32
    %400 = vector.broadcast %cst_199 : f32 to vector<16x256xf32>
    %401 = arith.subf %400, %379 : vector<16x256xf32>
    %402 = arith.mulf %401, %379 : vector<16x256xf32>
    %403 = math.exp %402 : vector<16x256xf32>
    %404 = arith.mulf %399, %403 : vector<16x256xf32>
    %cst_200 = arith.constant 1.000000e+00 : f32
    %405 = vector.broadcast %cst_200 : f32 to vector<16x256xf32>
    %406 = arith.subf %405, %404 : vector<16x256xf32>
    %407 = arith.mulf %378, %406 : vector<16x256xf32>
    %cst_201 = arith.constant 1.000000e+00 : f32
    %408 = vector.broadcast %cst_201 : f32 to vector<16x256xf32>
    %409 = arith.addf %408, %407 : vector<16x256xf32>
    %410 = arith.mulf %371, %409 : vector<16x256xf32>
    %c0_202 = arith.constant 0 : index
    %c0_203 = arith.constant 0 : index
    %c0_204 = arith.constant 0 : index
    %411 = vector.load %arg10[%c0_202, %c0_203, %c0_204] : memref<1x256x128xbf16, #tpu.memory_space<vmem>>, vector<1x256x128xbf16>
    %412 = vector.shape_cast %411 : vector<1x256x128xbf16> to vector<256x128xbf16>
    %413 = arith.truncf %410 : vector<16x256xf32> to vector<16x256xbf16>
    %cst_205 = arith.constant dense<0.000000e+00> : vector<16x128xf32>
    %414 = tpu.matmul %413, %412, %cst_205 {dimension_numbers = #tpu.dot_dimension_numbers<[1], [0], [0], [1], [0, 0, 1, 1], [], []>} : vector<16x256xbf16>, vector<256x128xbf16>, vector<16x128xf32> -> vector<16x128xf32>
    %415 = vector.extract_strided_slice %56 {offsets = [3, 0], sizes = [1, 128], strides = [1, 1]} : vector<6x128xf32> to vector<1x128xf32>
    %416 = vector.broadcast %415 : vector<1x128xf32> to vector<16x128xf32>
    %417 = arith.addf %414, %416 : vector<16x128xf32>
    %c0_206 = arith.constant 0 : index
    %c0_207 = arith.constant 0 : index
    %418 = vector.load %arg12[%c0_206, %c0_207] : memref<10x128xf32, #tpu.memory_space<vmem>>, vector<10x128xf32>
    %419 = vector.extract_strided_slice %56 {offsets = [4, 0], sizes = [1, 128], strides = [1, 1]} : vector<6x128xf32> to vector<1x128xf32>
    %420 = vector.extract_strided_slice %56 {offsets = [5, 0], sizes = [1, 128], strides = [1, 1]} : vector<6x128xf32> to vector<1x128xf32>
    %cst_208 = arith.constant dense<0.000000e+00> : vector<2x128xf32>
    %421 = tpu.matmul %29, %417, %cst_208 {dimension_numbers = #tpu.dot_dimension_numbers<[1], [0], [0], [1], [0, 0, 1, 1], [], []>} : vector<2x16xf32>, vector<16x128xf32>, vector<2x128xf32> -> vector<2x128xf32>
    %422 = arith.mulf %417, %417 : vector<16x128xf32>
    %cst_209 = arith.constant dense<0.000000e+00> : vector<2x128xf32>
    %423 = tpu.matmul %29, %422, %cst_209 {dimension_numbers = #tpu.dot_dimension_numbers<[1], [0], [0], [1], [0, 0, 1, 1], [], []>} : vector<2x16xf32>, vector<16x128xf32>, vector<2x128xf32> -> vector<2x128xf32>
    "tpu.trace_start"() <{level = 10 : i32, message = "bc,gc->bg"}> : () -> ()
    %cst_210 = arith.constant dense<0.000000e+00> : vector<2x10xf32>
    %424 = tpu.matmul %421, %418, %cst_210 {dimension_numbers = #tpu.dot_dimension_numbers<[1], [1], [0], [0], [0, 0, 1, 0], [], []>} : vector<2x128xf32>, vector<10x128xf32>, vector<2x10xf32> -> vector<2x10xf32>
    %cst_211 = arith.constant dense<0.000000e+00> : vector<2x10xf32>
    %425 = tpu.matmul %423, %418, %cst_211 {dimension_numbers = #tpu.dot_dimension_numbers<[1], [1], [0], [0], [0, 0, 1, 0], [], []>} : vector<2x128xf32>, vector<10x128xf32>, vector<2x10xf32> -> vector<2x10xf32>
    "tpu.trace_stop"() : () -> ()
    %cst_212 = arith.constant 3.200000e+01 : f32
    %426 = vector.broadcast %cst_212 : f32 to vector<2x10xf32>
    %427 = arith.divf %424, %426 : vector<2x10xf32>
    %cst_213 = arith.constant 3.200000e+01 : f32
    %428 = vector.broadcast %cst_213 : f32 to vector<2x10xf32>
    %429 = arith.divf %425, %428 : vector<2x10xf32>
    %430 = arith.mulf %427, %427 : vector<2x10xf32>
    %431 = arith.subf %429, %430 : vector<2x10xf32>
    %cst_214 = arith.constant dense<0.000000e+00> : vector<2x128xf32>
    %432 = tpu.matmul %427, %418, %cst_214 {dimension_numbers = #tpu.dot_dimension_numbers<[1], [0], [0], [1], [0, 0, 1, 1], [], []>} : vector<2x10xf32>, vector<10x128xf32>, vector<2x128xf32> -> vector<2x128xf32>
    %cst_215 = arith.constant dense<0.000000e+00> : vector<16x128xf32>
    %433 = tpu.matmul %16, %432, %cst_215 {dimension_numbers = #tpu.dot_dimension_numbers<[1], [0], [0], [1], [0, 0, 1, 1], [], []>} : vector<16x2xf32>, vector<2x128xf32>, vector<16x128xf32> -> vector<16x128xf32>
    %cst_216 = arith.constant dense<0.000000e+00> : vector<2x128xf32>
    %434 = tpu.matmul %431, %418, %cst_216 {dimension_numbers = #tpu.dot_dimension_numbers<[1], [0], [0], [1], [0, 0, 1, 1], [], []>} : vector<2x10xf32>, vector<10x128xf32>, vector<2x128xf32> -> vector<2x128xf32>
    %cst_217 = arith.constant dense<0.000000e+00> : vector<16x128xf32>
    %435 = tpu.matmul %16, %434, %cst_217 {dimension_numbers = #tpu.dot_dimension_numbers<[1], [0], [0], [1], [0, 0, 1, 1], [], []>} : vector<16x2xf32>, vector<2x128xf32>, vector<16x128xf32> -> vector<16x128xf32>
    %436 = arith.subf %417, %433 : vector<16x128xf32>
    %cst_218 = arith.constant 9.99999974E-6 : f32
    %437 = vector.broadcast %cst_218 : f32 to vector<16x128xf32>
    %438 = arith.addf %435, %437 : vector<16x128xf32>
    %439 = math.rsqrt %438 : vector<16x128xf32>
    %440 = arith.mulf %436, %439 : vector<16x128xf32>
    %441 = vector.broadcast %419 : vector<1x128xf32> to vector<16x128xf32>
    %442 = arith.mulf %440, %441 : vector<16x128xf32>
    %443 = vector.broadcast %420 : vector<1x128xf32> to vector<16x128xf32>
    %444 = arith.addf %442, %443 : vector<16x128xf32>
    %445 = arith.addf %223, %444 : vector<16x128xf32>
    %c0_219 = arith.constant 0 : index
    %c0_220 = arith.constant 0 : index
    %446 = vector.load %arg14[%c0_219, %c0_220] : memref<16x128xf32, #tpu.memory_space<vmem>>, vector<16x128xf32>
    tpu.vector_store %arg14[%c0_219, %c0_220], %445 {strides = array<i32>} : memref<16x128xf32, #tpu.memory_space<vmem>>, vector<16x128xf32>,
    %c1_i32_221 = arith.constant 1 : i32
    %447 = arith.cmpi eq, %arg0, %c1_i32_221 : i32
    %448 = arith.extui %447 : i1 to i32
    %c0_i32_222 = arith.constant 0 : i32
    %449 = arith.cmpi ne, %448, %c0_i32_222 : i32
    scf.if %449 {
      %c0_223 = arith.constant 0 : index
      %c0_224 = arith.constant 0 : index
      %450 = vector.load %arg13[%c0_223, %c0_224] : memref<16x128xf32, #tpu.memory_space<vmem>>, vector<16x128xf32>
      tpu.vector_store %arg13[%c0_223, %c0_224], %445 {strides = array<i32>} : memref<16x128xf32, #tpu.memory_space<vmem>>, vector<16x128xf32>,
    } else {
    }
    return
  }
  func.func @transform_0(%arg0: i32) -> (i32, i32) {
    %c0_i32 = arith.constant 0 : i32
    %c0_i32_0 = arith.constant 0 : i32
    %c0_i32_1 = arith.constant 0 : i32
    return %c0_i32, %c0_i32_0 : i32, i32
  }
  func.func @transform_1(%arg0: i32) -> (i32, i32, i32) {
    %c0_i32 = arith.constant 0 : i32
    %c0_i32_0 = arith.constant 0 : i32
    %c0_i32_1 = arith.constant 0 : i32
    return %arg0, %c0_i32, %c0_i32_0 : i32, i32, i32
  }
  func.func @transform_2(%arg0: i32) -> (i32, i32, i32) {
    %c0_i32 = arith.constant 0 : i32
    %c0_i32_0 = arith.constant 0 : i32
    %c0_i32_1 = arith.constant 0 : i32
    return %arg0, %c0_i32, %c0_i32_0 : i32, i32, i32
  }
  func.func @transform_3(%arg0: i32) -> (i32, i32, i32, i32) {
    %c0_i32 = arith.constant 0 : i32
    %c0_i32_0 = arith.constant 0 : i32
    %c0_i32_1 = arith.constant 0 : i32
    %c0_i32_2 = arith.constant 0 : i32
    return %arg0, %c0_i32, %c0_i32_0, %c0_i32_1 : i32, i32, i32, i32
  }
  func.func @transform_4(%arg0: i32) -> (i32, i32, i32, i32) {
    %c0_i32 = arith.constant 0 : i32
    %c0_i32_0 = arith.constant 0 : i32
    %c0_i32_1 = arith.constant 0 : i32
    %c0_i32_2 = arith.constant 0 : i32
    return %arg0, %c0_i32, %c0_i32_0, %c0_i32_1 : i32, i32, i32, i32
  }
  func.func @transform_5(%arg0: i32) -> (i32, i32, i32, i32) {
    %c0_i32 = arith.constant 0 : i32
    %c0_i32_0 = arith.constant 0 : i32
    %c0_i32_1 = arith.constant 0 : i32
    %c0_i32_2 = arith.constant 0 : i32
    return %arg0, %c0_i32, %c0_i32_0, %c0_i32_1 : i32, i32, i32, i32
  }
  func.func @transform_6(%arg0: i32) -> (i32, i32, i32, i32) {
    %c0_i32 = arith.constant 0 : i32
    %c0_i32_0 = arith.constant 0 : i32
    %c0_i32_1 = arith.constant 0 : i32
    %c0_i32_2 = arith.constant 0 : i32
    return %arg0, %c0_i32, %c0_i32_0, %c0_i32_1 : i32, i32, i32, i32
  }
  func.func @transform_7(%arg0: i32) -> (i32, i32, i32) {
    %c0_i32 = arith.constant 0 : i32
    %c0_i32_0 = arith.constant 0 : i32
    %c0_i32_1 = arith.constant 0 : i32
    return %arg0, %c0_i32, %c0_i32_0 : i32, i32, i32
  }
  func.func @transform_8(%arg0: i32) -> (i32, i32, i32, i32) {
    %c0_i32 = arith.constant 0 : i32
    %c0_i32_0 = arith.constant 0 : i32
    %c0_i32_1 = arith.constant 0 : i32
    %c0_i32_2 = arith.constant 0 : i32
    return %arg0, %c0_i32, %c0_i32_0, %c0_i32_1 : i32, i32, i32, i32
  }
  func.func @transform_9(%arg0: i32) -> (i32, i32, i32) {
    %c0_i32 = arith.constant 0 : i32
    %c0_i32_0 = arith.constant 0 : i32
    %c0_i32_1 = arith.constant 0 : i32
    return %arg0, %c0_i32, %c0_i32_0 : i32, i32, i32
  }
  func.func @transform_10(%arg0: i32) -> (i32, i32) {
    %c0_i32 = arith.constant 0 : i32
    %c0_i32_0 = arith.constant 0 : i32
    %c0_i32_1 = arith.constant 0 : i32
    return %c0_i32, %c0_i32_0 : i32, i32
  }
  func.func @transform_11(%arg0: i32) -> (i32, i32) {
    %c0_i32 = arith.constant 0 : i32
    %c0_i32_0 = arith.constant 0 : i32
    %c0_i32_1 = arith.constant 0 : i32
    return %c0_i32, %c0_i32_0 : i32, i32
  }
  func.func @transform_12(%arg0: i32) -> (i32, i32) {
    %c0_i32 = arith.constant 0 : i32
    %c0_i32_0 = arith.constant 0 : i32
    %c0_i32_1 = arith.constant 0 : i32
    return %c0_i32, %c0_i32_0 : i32, i32
  }
}

</mosaic_0001>

<bundles_post_ra>
// kernel: tpu_custom_call.1
= control target key start
LH: loop header
LB: loop body
LE: loop exit
PB: predicated region body
PF: predicated region fallthrough
CT: control target
= control target key end

     0   :  { %s7198_s0 = inlined_call_operand.vmem [shape: f32[16,128], index: 0, kind: input, shape index: {}]   ;;  %s7199_s1 = inlined_call_operand.vmem [shape: f32[2,6,128], index: 1, kind: input, shape index: {}]   ;;  %s7200_s2 = inlined_call_operand.vmem [shape: f32[2,6,256], index: 2, kind: input, shape index: {}]   ;;  %s7201_s3 = inlined_call_operand.hbm [shape: bf16[2,4,16,128], index: 3, kind: input, shape index: {}]   ;;  %s7202_s4 = inlined_call_operand.hbm [shape: bf16[2,4,16,128], index: 4, kind: input, shape index: {}]   ;;  %s7203_s5 = inlined_call_operand.hbm [shape: bf16[2,4,16,128], index: 5, kind: input, shape index: {}]   ;;  %s7204_s6 = inlined_call_operand.hbm [shape: bf16[2,4,16,128], index: 6, kind: input, shape index: {}]   ;;  %s7205_s7 = inlined_call_operand.hbm [shape: bf16[2,128,256], index: 7, kind: input, shape index: {}]   ;;  %s7206_s8 = inlined_call_operand.hbm [shape: bf16[2,3,256,256], index: 8, kind: input, shape index: {}]   ;;  %s7207_s9 = inlined_call_operand.hbm [shape: bf16[2,256,128], index: 9, kind: input, shape index: {}]   ;;  %s7208_s10 = inlined_call_operand.vmem [shape: f32[10,256], index: 10, kind: input, shape index: {}]   ;;  %s7209_s11 = inlined_call_operand.hbm [shape: f32[10,128], index: 11, kind: input, shape index: {}]   ;;  %s7210_s12 = inlined_call_operand.hbm [shape: f32[16,128], index: 12, kind: output, shape index: {}]  }
   0x1   :  { %7224 = sst [smem:[#allocation27_spill]] %s7198_s0 }
   0x2   :  { %7225 = sst [smem:[#allocation28_spill]] %s7199_s1 }
   0x3   :  { %7226 = sst [smem:[#allocation29_spill]] %s7200_s2 }
   0x4   :  { %7227 = sst [smem:[#allocation30_spill]] %s7201_s3 }
   0x5   :  { %7228 = sst [smem:[#allocation31_spill]] %s7202_s4 }
   0x6   :  { %7229 = sst [smem:[#allocation32_spill]] %s7204_s6 }
   0x7   :  { %7230 = sst [smem:[#allocation33_spill]] %s7207_s9 }
   0x8   :  { %7231 = sst [smem:[#allocation34_spill]] %s7208_s10 }
   0x9   :  { %7232 = sst [smem:[#allocation35_spill]] %s7210_s12 }
   0xa   :  { %17 = vsyncpa [#allocation4], 0 }
   0xb   :  { %19 = vsyncpa [#allocation4 + $0x1], 0 }
   0xc   :  { %20 = vsyncpa [#allocation7], 0 }
   0xd   :  { %22 = vsyncpa [#allocation7 + $0x1], 0 }
   0xe   :  { %23 = vsyncpa [#allocation10], 0 }
   0xf   :  { %25 = vsyncpa [#allocation10 + $0x1], 0 }
  0x10   :  { %26 = vsyncpa [#allocation13], 0 }
  0x11   :  { %28 = vsyncpa [#allocation13 + $0x1], 0 }
  0x12   :  { %29 = vsyncpa [#allocation16], 0 }
  0x13   :  { %30 = vsyncpa [#allocation5], 0  ;;  %s5845_s21 = smov 0   ;;  %s5847_s22 = smov 0  }
  0x14   :  { %s5849_s23 = smov 0   ;;  %s5851_s24 = smov 0  }
  0x15 LB: > { %7233 = sst [smem:[#allocation24_spill]] %s5761_s23  ;;  %s5866_s25 = sadd.s32 1, %s5765_s24   ;;  %s5765_s24 = sphi %s5851_s24, %s7275_s24   ;;  %s5761_s23 = sphi %s5849_s23, %s7277_s23   ;;  %s5757_s22 = sphi %s5847_s22, %s7279_s22   ;;  %s5753_s21 = sphi %s5845_s21, %s7278_s21  }
  0x16   : > { %7234 = sst [smem:[#allocation25_spill]] %s5866_s25  ;;  %s116_s26 = sadd.s32 1, %s5761_s23 }
  0x17   : > { %s113_s27 = ssub.s32 %s5765_s24, %s5866_s25  ;;  %p123_p0 = scmp.ne.s32.totalorder %s5761_s23, %s5757_s22 }
  0x18   : > { %p114_p1 = scmp.eq.s32.totalorder %s113_s27, 0  ;;  %p124_p2 = scmp.eq.s32.totalorder %s5765_s24, 0 }
  0x19   : > { %p5293_p3 = scmp.lt.s32.totalorder %s5765_s24, 2  ;;  %s5879_s29 = sand.u32 1, %s5761_s23  }
  0x1a   : > { %s5876_s28 = scalar_select %p114_p1, %s5761_s23, %s116_s26  }
  0x1b   : > { %p125_p4 = por %p124_p2, %p123_p0  ;;  %s5882_s30 = sshll.u32 %s5879_s29, 5 }
  0x1c   : > { %7235 = sst [smem:[#allocation26_spill]] %s5876_s28  ;;  %s5885_s13 = sshll.u32 %s5765_s24, 5 }
  0x1d   : > { %p5887_p5 = pnand %p5293_p3, %p125_p4  ;;  %s5892_s15 = sand.u32 1, %s5765_s24  }
  0x1e   : > { %s7237_s4 = sld [smem:[#allocation31_spill]]  ;;  %s433_s20 = scalar_lea.vmem [#allocation6], %s5882_s30 }
  0x1f   : > { %s441_s26 = sshll.u32 %s433_s20, 4  ;;  %p5902_p7 = pneg %p5887_p5  ;;  %s442_s26 = int_to_ptr.vmem [resolvable:$true] %s441_s26 }
  0x24   : > { %s438_s18 = scalar_lea.hbm %s7237_s4, %s5885_s13 }
  0x25   : > { %s439_s19 = sshll.u32 %s438_s18, 4  ;;  %s5450_s18 = scalar_lea.hbm %s7237_s4, 64  ;;  %s440_s19 = int_to_ptr.hbm [resolvable:$true] %s439_s19 }
  0x26   : > { %s5443_s28 = sshra.s32 %s440_s19, 4  ;;  %s5444_s28 = int_to_ptr.hbm [resolvable:$true] %s5443_s28 }
  0x27   : > { %s5445_s23 = scalar_lea.hbm %s5444_s28, 32  ;;  %p5451_p10 = scmp.lt.s32.totalorder %s5444_s28, %s7237_s4 }
  0x28   : > { %p5446_p6 = scmp.ne.s32.totalorder %s5444_s28, %s5445_s23  ;;  %p5452_p11 = scmp.lt.s32.totalorder %s5450_s18, %s5445_s23 }
  0x2a   : > { %p5448_p8 = pnand %p5902_p7, %p5446_p6  ;;  %p5453_p12 = por %p5452_p11, %p5451_p10 }
  0x2c   : > { %p5449_p9 = pneg %p5448_p8 }
  0x2e   : > { %p5454_p13 = pnand %p5453_p12, %p5449_p9 }
  0x30   : > { %5457 = shalt.err (!%p5454_p13)
}
  0x31   : > { %s7219_s27 = smov 64   ;;  %s7223_s10 = smov 4  }
  0x32   : > { %s7239_s16 = scalar_lea.sflag [#allocation7], %s5892_s15  ;;  %s7240_s6 = sld [smem:[#allocation32_spill]] }
  0x33   : > { %5276 = dma.hbm_to_vmem [thread:$0]  (!%p5887_p5), %s440_s19, 512, %s442_s26, %s7239_s16, %s7219_s27, %s7219_s27, %s7223_s10  }
  0x34   : > { %s477_s17 = scalar_lea.vmem [#allocation9], %s5882_s30  ;;  %s7217_s4 = scalar_lea.sflag [#allocation10], %s5892_s15 }
  0x35   : > { %s485_s18 = sshll.u32 %s477_s17, 4  ;;  %s486_s18 = int_to_ptr.vmem [resolvable:$true] %s485_s18 }
  0x38   : > { %s482_s23 = scalar_lea.hbm %s7240_s6, %s5885_s13  ;;  %s5480_s19 = scalar_lea.hbm %s7240_s6, 64 }
  0x39   : > { %s483_s20 = sshll.u32 %s482_s23, 4  ;;  %s484_s20 = int_to_ptr.hbm [resolvable:$true] %s483_s20 }
  0x3a   : > { %s5473_s0 = sshra.s32 %s484_s20, 4  ;;  %s5474_s0 = int_to_ptr.hbm [resolvable:$true] %s5473_s0 }
  0x3b   : > { %s5475_s2 = scalar_lea.hbm %s5474_s0, 32  ;;  %p5481_p3 = scmp.lt.s32.totalorder %s5474_s0, %s7240_s6 }
  0x3c   : > { %p5476_p0 = scmp.ne.s32.totalorder %s5474_s0, %s5475_s2  ;;  %p5482_p4 = scmp.lt.s32.totalorder %s5480_s19, %s5475_s2 }
  0x3e   : > { %p5478_p1 = pnand %p5476_p0, %p5902_p7  ;;  %p5483_p6 = por %p5482_p4, %p5481_p3 }
  0x40   : > { %p5479_p2 = pneg %p5478_p1 }
  0x42   : > { %p5484_p8 = pnand %p5483_p6, %p5479_p2 }
  0x44   : > { %5487 = shalt.err (!%p5484_p8)
}
  0x45   : > { %5282 = dma.hbm_to_vmem [thread:$0]  (!%p5887_p5), %s484_s20, 512, %s486_s18, %s7217_s4, %s7219_s27, %s7219_s27, %s7223_s10  }
  0x46   : > { %s5241_s0 = smul.u32 768, %s5879_s29  ;;  %s5945_s2 = sadd.s32 4294967295, %s5765_s24  }
  0x47   : > { %s5242_s1 = smul.u32 768, %s5765_s24  ;;  %p129_p9 = scmp.ne.s32.totalorder %s5757_s22, %s5753_s21 }
  0x48   : > { %s521_s23 = scalar_lea.vmem [#allocation12], %s5241_s0  ;;  %s7218_s26 = scalar_lea.sflag [#allocation13], %s5892_s15 }
  0x49   : > { %s526_s28 = scalar_lea.hbm %s7206_s8, %s5242_s1  ;;  %s529_s17 = sshll.u32 %s521_s23, 4  ;;  %s530_s17 = int_to_ptr.vmem [resolvable:$true] %s529_s17 }
  0x4a   : > { %s527_s19 = sshll.u32 %s526_s28, 4  ;;  %s5510_s4 = scalar_lea.hbm %s7206_s8, 1536  ;;  %s528_s19 = int_to_ptr.hbm [resolvable:$true] %s527_s19 }
  0x4b   : > { %s5503_s16 = sshra.s32 %s528_s19, 4  ;;  %s5504_s16 = int_to_ptr.hbm [resolvable:$true] %s5503_s16 }
  0x4c   : > { %s5505_s6 = scalar_lea.hbm %s5504_s16, 768  ;;  %p5511_p13 = scmp.lt.s32.totalorder %s5504_s16, %s7206_s8 }
  0x4d   : > { %p5506_p10 = scmp.ne.s32.totalorder %s5504_s16, %s5505_s6  ;;  %p5512_p0 = scmp.lt.s32.totalorder %s5510_s4, %s5505_s6 }
  0x4f   : > { %p5508_p11 = pnand %p5506_p10, %p5902_p7  ;;  %p5513_p1 = por %p5512_p0, %p5511_p13 }
  0x51   : > { %p5509_p12 = pneg %p5508_p11 }
  0x53   : > { %p5514_p2 = pnand %p5513_p1, %p5509_p12 }
  0x55   : > { %5517 = shalt.err (!%p5514_p2)
}
  0x56   : > { %s7221_s0 = smov 128   ;;  %s7222_s12 = smov 8  }
  0x57   : > { %5288 = dma.hbm_to_vmem [thread:$0]  (!%p5887_p5), %s528_s19, 12288, %s530_s17, %s7218_s26, %s7221_s0, %s7221_s0, %s7222_s12  }
  0x58   : > { %p130_p3 = scmp.eq.s32.totalorder %s5945_s2, 0  ;;  %p4303_p4 = scmp.ge.s32.totalorder %s5765_s24, 1 }
  0x59   : > { %p359_p6 = scmp.lt.s32.totalorder %s5765_s24, 3  ;;  %p4304_p8 = scmp.ne.s32.totalorder %s5945_s2, 0 }
  0x5a   : > { %p5977_p10 = por %p130_p3, %p129_p9  ;;  %s376_s23 = sshll.u32 %s7209_s11, 4  ;;  %s377_s23 = int_to_ptr.hbm [resolvable:$true] %s376_s23 }
  0x5b   : > { %p5984_p11 = pnand %p4303_p4, %p359_p6  ;;  %s5771_s17 = smov [#allocation15]  }
  0x5c   : > { %s378_s21 = sshll.u32 %s5771_s17, 4  ;;  %s7243_s3 = sld [smem:[#allocation30_spill]]  ;;  %s379_s21 = int_to_ptr.vmem [resolvable:$true] %s378_s21 }
  0x5d   : > { %p5266_p12 = pneg %p5984_p11  ;;  %s411_s1 = scalar_lea.vmem [#allocation3], %s5882_s30 }
  0x5e   : > { %s419_s6 = sshll.u32 %s411_s1, 4  ;;  %s408_s28 = scalar_lea.sflag [#allocation4], %s5879_s29  ;;  %s420_s6 = int_to_ptr.vmem [resolvable:$true] %s419_s6 }
  0x5f   : > { %p5267_p9 = pnand %p5266_p12, %p130_p3 }
  0x61   : > { %5269 = dma.hbm_to_vmem [thread:$0]  (!%p5267_p9), %s377_s23, 256, %s379_s21, [#allocation16], %s7221_s0, %s7221_s0, %s7222_s12  }
  0x62   : > { %s416_s20 = scalar_lea.hbm %s7243_s3, %s5885_s13  ;;  %s5570_s18 = scalar_lea.hbm %s7243_s3, 64 }
  0x63   : > { %s417_s9 = sshll.u32 %s416_s20, 4  ;;  %s418_s9 = int_to_ptr.hbm [resolvable:$true] %s417_s9 }
  0x64   : > { %s5563_s26 = sshra.s32 %s418_s9, 4  ;;  %s5564_s26 = int_to_ptr.hbm [resolvable:$true] %s5563_s26 }
  0x65   : > { %s5565_s17 = scalar_lea.hbm %s5564_s26, 32  ;;  %p5571_p2 = scmp.lt.s32.totalorder %s5564_s26, %s7243_s3 }
  0x66   : > { %p5566_p13 = scmp.ne.s32.totalorder %s5564_s26, %s5565_s17  ;;  %p5572_p4 = scmp.lt.s32.totalorder %s5570_s18, %s5565_s17 }
  0x68   : > { %p5568_p0 = pnand %p5566_p13, %p5902_p7  ;;  %p5573_p6 = por %p5572_p4, %p5571_p2 }
  0x6a   : > { %p5569_p1 = pneg %p5568_p0 }
  0x6c   : > { %p5574_p12 = pnand %p5573_p6, %p5569_p1 }
  0x6e   : > { %5577 = shalt.err (!%p5574_p12)
}
  0x6f   : > { %s7244_s23 = smov 64   ;;  %s460_s19 = scalar_lea.hbm %s7203_s5, %s5885_s13 }
  0x70   : > { %5273 = dma.hbm_to_vmem [thread:$0]  (!%p5887_p5), %s418_s9, 512, %s420_s6, %s408_s28, %s7244_s23, %s7244_s23, %s7223_s10  }
  0x71   : > { %s455_s20 = scalar_lea.vmem [#allocation8], %s5882_s30  ;;  %s461_s17 = sshll.u32 %s460_s19, 4  ;;  %s462_s17 = int_to_ptr.hbm [resolvable:$true] %s461_s17 }
  0x72   : > { %s463_s26 = sshll.u32 %s455_s20, 4  ;;  %s4318_s18 = sshll.u32 %s5879_s29, 7  ;;  %s464_s26 = int_to_ptr.vmem [resolvable:$true] %s463_s26 }
  0x73   : > { %s5593_s1 = sshra.s32 %s462_s17, 4  ;;  %s5600_s9 = scalar_lea.hbm %s7203_s5, 64  ;;  %s5594_s1 = int_to_ptr.hbm [resolvable:$true] %s5593_s1 }
  0x74   : > { %s5595_s0 = scalar_lea.hbm %s5594_s1, 32  ;;  %p5601_p1 = scmp.lt.s32.totalorder %s5594_s1, %s7203_s5 }
  0x75   : > { %p5596_p9 = scmp.ne.s32.totalorder %s5594_s1, %s5595_s0  ;;  %p5602_p2 = scmp.lt.s32.totalorder %s5600_s9, %s5595_s0 }
  0x77   : > { %p5598_p13 = pnand %p5596_p9, %p5902_p7  ;;  %p5603_p4 = por %p5602_p2, %p5601_p1 }
  0x79   : > { %p5599_p0 = pneg %p5598_p13 }
  0x7b   : > { %p5604_p6 = pnand %p5603_p4, %p5599_p0 }
  0x7d   : > { %5607 = shalt.err (!%p5604_p6)
}
  0x7e   : > { %s7245_s30 = scalar_lea.sflag [#allocation7], %s5892_s15  ;;  %s5094_s3 = sshll.u32 %s5765_s24, 7 }
  0x7f   : > { %5279 = dma.hbm_to_vmem [thread:$0]  (!%p5887_p5), %s462_s17, 512, %s464_s26, %s7245_s30, %s7244_s23, %s7244_s23, %s7223_s10  }
  0x80   : > { %s504_s27 = scalar_lea.hbm %s7205_s7, %s5094_s3  ;;  %s499_s0 = scalar_lea.vmem [#allocation11], %s4318_s18 }
  0x81   : > { %s507_s21 = sshll.u32 %s499_s0, 4  ;;  %s505_s19 = sshll.u32 %s504_s27, 4  ;;  %s508_s21 = int_to_ptr.vmem [resolvable:$true] %s507_s21  ;;  %s506_s19 = int_to_ptr.hbm [resolvable:$true] %s505_s19 }
  0x82   : > { %s5623_s20 = sshra.s32 %s506_s19, 4  ;;  %s5630_s24 = scalar_lea.hbm %s7205_s7, 256  ;;  %s5624_s20 = int_to_ptr.hbm [resolvable:$true] %s5623_s20 }
  0x83   : > { %s5625_s1 = scalar_lea.hbm %s5624_s20, 128  ;;  %p5631_p0 = scmp.lt.s32.totalorder %s5624_s20, %s7205_s7 }
  0x84   : > { %p5626_p12 = scmp.ne.s32.totalorder %s5624_s20, %s5625_s1  ;;  %p5632_p1 = scmp.lt.s32.totalorder %s5630_s24, %s5625_s1 }
  0x86   : > { %p5628_p9 = pnand %p5626_p12, %p5902_p7  ;;  %p5633_p2 = por %p5632_p1, %p5631_p0 }
  0x88   : > { %p5629_p13 = pneg %p5628_p9 }
  0x8a   : > { %p5634_p4 = pnand %p5633_p2, %p5629_p13 }
  0x8c   : > { %5637 = shalt.err (!%p5634_p4)
}
  0x8d   : > { %s7246_s28 = smov 8   ;;  %s7247_s30 = smov 128  }
  0x8e   : > { %s7248_s13 = scalar_lea.sflag [#allocation10], %s5892_s15  ;;  %s7249_s0 = sld [smem:[#allocation33_spill]] }
  0x8f   : > { %5285 = dma.hbm_to_vmem [thread:$0]  (!%p5887_p5), %s506_s19, 2048, %s508_s21, %s7248_s13, %s7247_s30, %s7247_s30, %s7246_s28  }
  0x90   : > { %s543_s20 = scalar_lea.vmem [#allocation14], %s4318_s18 }
  0x91   : > { %s551_s1 = sshll.u32 %s543_s20, 4  ;;  %s552_s1 = int_to_ptr.vmem [resolvable:$true] %s551_s1 }
  0x94   : > { %s548_s9 = scalar_lea.hbm %s7249_s0, %s5094_s3  ;;  %s5660_s21 = scalar_lea.hbm %s7249_s0, 256 }
  0x95   : > { %s549_s26 = sshll.u32 %s548_s9, 4  ;;  %s550_s26 = int_to_ptr.hbm [resolvable:$true] %s549_s26 }
  0x96   : > { %s5653_s24 = sshra.s32 %s550_s26, 4  ;;  %s5654_s24 = int_to_ptr.hbm [resolvable:$true] %s5653_s24 }
  0x97   : > { %s5655_s17 = scalar_lea.hbm %s5654_s24, 128  ;;  %p5661_p13 = scmp.lt.s32.totalorder %s5654_s24, %s7249_s0 }
  0x98   : > { %p5656_p6 = scmp.ne.s32.totalorder %s5654_s24, %s5655_s17  ;;  %p5662_p0 = scmp.lt.s32.totalorder %s5660_s21, %s5655_s17 }
  0x9a   : > { %p5658_p12 = pnand %p5656_p6, %p5902_p7  ;;  %p5663_p1 = por %p5662_p0, %p5661_p13 }
  0x9c   : > { %p5659_p9 = pneg %p5658_p12 }
  0x9e   : > { %p5664_p2 = pnand %p5663_p1, %p5659_p9 }
  0xa0   : > { %5667 = shalt.err (!%p5664_p2)
}
  0xa1   : > { %s7250_s29 = smov 4   ;;  %s7251_s25 = scalar_lea.sflag [#allocation13], %s5892_s15 }
  0xa2   : > { %5291 = dma.hbm_to_vmem [thread:$0]  (!%p5887_p5), %s550_s26, 2048, %s552_s1, %s7251_s25, %s7244_s23, %s7244_s23, %s7250_s29  }
  0xa3   : > { %563 = sbr.rel (%p5984_p11) target bundleno = 5148 (0x141c), region = 68  ;;  %s565_s10 = sand.u32 (!%p5984_p11), 1, %s5757_s22  }
  0xa4   : > { %s4326_s18 = sshll.u32 (!%p5984_p11), %s565_s10, 5  ;;  %s566_s3 = scalar_lea.sflag (!%p5984_p11), [#allocation4], %s565_s10 }
  0xa5   : > { %s6079_s30 = scalar_lea.vmem (!%p5984_p11), [#allocation3], %s4326_s18 }
  0xa8   : > { %5728 = dma.done.wait (%p5977_p10), %s566_s3, 512  }
  0xa9   : > { %5730 = vsyncadd (%p5977_p10), %s566_s3, 4294966784  ;;  %s575_s14 = sand.u32 1, %s5945_s2   ;;  %s6086_s23 = scalar_lea.vmem [#allocation6], %s4326_s18 }
  0xaa   : > { %s576_s15 = scalar_lea.sflag [#allocation7], %s575_s14 }
  0xab   : > { %5732 = dma.done.wait (%p5977_p10), %s576_s15, 1024  }
  0xac   : > { %5734 = vsyncadd (%p5977_p10), %s576_s15, 4294966272  ;;  %s6092_s16 = scalar_lea.vmem [#allocation8], %s4326_s18  ;;  %s596_s13 = scalar_lea.sflag [#allocation10], %s575_s14 }
  0xad   : > { %s6094_s12 = scalar_lea.vmem [#allocation9], %s4326_s18 }
  0xae   : > { %5736 = dma.done.wait (%p5977_p10), %s596_s13, 2560  }
  0xaf   : > { %5738 = vsyncadd (%p5977_p10), %s596_s13, 4294964736  ;;  %s4330_s27 = sshll.u32 %s565_s10, 7  ;;  %s5243_s9 = smul.u32 768, %s565_s10 }
  0xb0   : > { %s6100_s20 = scalar_lea.vmem [#allocation11], %s4330_s27  ;;  %s616_s1 = scalar_lea.sflag [#allocation13], %s575_s14 }
  0xb1   : > { %s6102_s26 = scalar_lea.vmem [#allocation12], %s5243_s9 }
  0xb2   : > { %5740 = dma.done.wait (%p5977_p10), %s616_s1, 14336  }
  0xb3   : > { %5742 = vsyncadd (%p5977_p10), %s616_s1, 4294952960  ;;  %s6108_s24 = scalar_lea.vmem [#allocation14], %s4330_s27 }
  0xb4   : > { %5744 = dma.done.wait (%p130_p3), [#allocation16], 256  }
  0xb5   : > { %5746 = vsyncadd (%p130_p3), [#allocation16], 4294967040  ;;  %p710_p5 = scmp.lt.s32.totalorder %s5945_s2, 1  ;;  %s7252_s29 = sld [smem:[#allocation28_spill]] }
  0xb6   : > { %s7253_s18 = sld [smem:[#allocation29_spill]] }
  0xb7   : > { %s711_s17 = scalar_select %p710_p5, %s5945_s2, 1 }
  0xb8   : > { %723 = sbr.rel (%p4304_p8) target bundleno = 193 (0xc1), region = 104  ;;  %s7254_s13 = sld [smem:[#allocation27_spill]] (!%p4304_p8) }
  0xb9   : > { %s4333_s6 = sshll.u32 %s711_s17, 3  ;;  %s5096_s21 = sshll.u32 %s711_s17, 4 }
  0xbb   : > { %s6119_s25 = scalar_lea.vmem %s7252_s29, %s4333_s6 }
  0xbc   : > { %s6124_s3 = scalar_lea.vmem %s7253_s18, %s5096_s21 }
  0xbe   : > { %v724_v0 = vld [vmem:[%s7254_s13] sm:$0xff]  ;;  %v725_v1 = vld [vmem:[%s7254_s13 + $0x8] sm:$0xff] }
  0xbf   : > { %726 = vst [vmem:[#allocation2] sm:$0xff] %v724_v0 }
  0xc0   : > { %727 = vst [vmem:[#allocation2 + $0x8] sm:$0xff] %v725_v1 }
  0xc1 PF: > { %v5772_v6 = vmov 40.0   ;;  %v5097_v16 = vld [vmem:[%s6079_s30] sm:$0xff]  ;;  %v5101_v28 = vld [vmem:[%s6079_s30 + $0x8] sm:$0xff]  ;;  %v6156_v41 = vld [vmem:[%s6119_s25] sm:$0x3f]  ;;  %v730_v58 = vlaneseq  ;;  %vm763_vm10 = vcmask 1041408  }
  0xc2   : > { %5342 = vrcp.f32 %v5772_v6  ;;  %v5098_v17 = vld [vmem:[%s6086_s23] sm:$0xff]  ;;  %899 = vmatpush.bf16.xpose.msra.mxu1 %v5097_v16  ;;  %v5102_v29 = vld [vmem:[%s6086_s23 + $0x8] sm:$0xff]  ;;  %v877_v46 = vperm.slane %v6156_v41, 0  ;;  %v880_v51 = vperm.slane %v6156_v41, 1  ;;  %vm756_vm14 = vcmask 15360   ;;  %p5085_p7 = scmp.ne.s32.totalorder %s5945_s2, 1 }
  0xc3   : > { %v5099_v18 = vld [vmem:[%s6092_s16] sm:$0xff]  ;;  %921 = vmatpush.bf16.xpose.msra.mxu2 %v5098_v17  ;;  %v6169_v59 = vshrl.u32 %v730_v58, 7  ;;  %v734_v60 = vand.u32 127, %v730_v58  ;;  %v5103_v17 = vld [vmem:[%s6092_s16 + $0x8] sm:$0xff] }
  0xc4   : > { %943 = vmatpush.bf16.xpose.msra.mxu3 %v5099_v18 }
  0xc5   : > { %v750_v61 = vadd.s32 1, %v6169_v59  ;;  %v738_v62 = vadd.s32 1, %v734_v60  ;;  %v748_v63 = vmul.u32 8, %v6169_v59  ;;  %v6173_v1 = vmul.u32 8, %v734_v60 }
  0xc6   : > { %v6134_v2 = vld [vmem:[#allocation2] sm:$0xff] }
  0xc7   : > { %826 = vadd.xlane.f32.xlu0 %v6134_v2  ;;  %v830_v3 = vmul.f32 %v6134_v2, %v6134_v2  ;;  %v6139_v4 = vld [vmem:[#allocation2 + $0x8] sm:$0xff]  ;;  %v751_v0 = vmul.u32 8, %v750_v61  ;;  %vm749_vm7 = vcmp.ge.s32.totalorder %v734_v60, %v748_v63  ;;  %vm736_vm11 = vcmp.ge.s32.totalorder %v6169_v59, %v6173_v1 }
  0xc8   : > { %v831_v5 = vmul.f32 %v6139_v4, %v6139_v4  ;;  %v5343_v7 = vpop.eup %5342 }
  0xc9   : > { %832 = vadd.xlane.f32.xlu1 %v830_v3  ;;  %v837_v8 = vmul.f32 40.0, %v5343_v7  ;;  %vm841_vm0 = vweird.f32 %v5343_v7  ;;  %v739_v3 = vmul.u32 8, %v738_v62  ;;  %vm752_vm8 = vcmp.lt.s32.totalorder %v734_v60, %v751_v0  ;;  %v5105_v60 = vld [vmem:[%s6079_s30 + $0x10] sm:$0xff] }
  0xca   : > { %vm753_vm9 = vmand %vm749_vm7, %vm752_vm8 }
  0xcb   : > { %v838_v9 = vsub.f32 1.0, %v837_v8  ;;  %1033 = vmatpush.bf16.xpose.msrb.mxu2 %v5101_v28  ;;  %vm740_vm12 = vcmp.lt.s32.totalorder %v6169_v59, %v739_v3  ;;  %v6189_v8 = vadd.s32 8, %v6169_v59 }
  0xcc   : > { %1056 = vmatpush.bf16.xpose.msrb.mxu3 %v5102_v29  ;;  %vm742_vm13 = vmand %vm736_vm11, %vm740_vm12  ;;  %vm1878_vm11 = vcmask 80896  }
  0xcd   : > { %v839_v10 = vmul.f32 %v5343_v7, %v838_v9  ;;  %vm737_vm15 = vcmp.ge.s32.totalorder %v6189_v8, %v6173_v1 }
  0xcf   : > { %828 = vadd.xlane.f32.xlu0 %v6139_v4  ;;  %v840_v11 = vadd.f32 %v5343_v7, %v839_v10 }
  0xd1   : > { %834 = vadd.xlane.f32.xlu1 %v831_v5  ;;  %v6144_v12 = vsel %vm841_vm0, %v5343_v7, %v840_v11  ;;  %v5773_v5 = vmov 0.0   ;;  %vm741_vm0 = vcmp.lt.s32.totalorder %v6189_v8, %v739_v3  ;;  %v5100_v3 = vld [vmem:[%s6094_s12] sm:$0xff] }
  0xd2   : > { %v6179_v6 = vsel %vm753_vm9, 1.0, %v5773_v5  ;;  %v6184_v7 = vsel %vm742_vm13, 1.0, %v5773_v5 }
  0xd3   : > { %4340 = vmatpush.msk.msra.mxu0 %vm763_vm10, %v6179_v6 }
  0xd4   : > { %4341 = vmatmul.msk.f32.vlgmr.msra.gmra.mxu0 %vm756_vm14, %v6184_v7 }
 0x13a   : > { %v827_v13 = vpop.xlane.xlu0 %826 }
 0x13b   : > { %v843_v14 = vmul.f32 %v6144_v12, %v827_v13 }
 0x13c   : > { %v833_v15 = vpop.xlane.xlu1 %832 }
 0x13d   : > { %v847_v19 = vmul.f32 %v843_v14, %v843_v14  ;;  %v845_v20 = vmul.f32 %v6144_v12, %v833_v15  ;;  %v851_v44 = vsub.f32 %v6134_v2, %v843_v14 }
 0x13f   : > { %v849_v21 = vsub.f32 %v845_v20, %v847_v19 }
 0x141   : > { %v853_v22 = vadd.f32 1e-05, %v849_v21 }
 0x142   : > { %v829_v23 = vpop.xlane.xlu0 %828 }
 0x143   : > { %5344 = vrsqrt.f32 %v853_v22  ;;  %v844_v24 = vmul.f32 %v6144_v12, %v829_v23  ;;  %vm861_vm2 = vweird.f32 %v853_v22 }
 0x144   : > { %v835_v25 = vpop.xlane.xlu1 %834 }
 0x145   : > { %v848_v26 = vmul.f32 %v844_v24, %v844_v24  ;;  %v846_v27 = vmul.f32 %v6144_v12, %v835_v25  ;;  %v852_v49 = vsub.f32 %v6139_v4, %v844_v24 }
 0x147   : > { %v850_v30 = vsub.f32 %v846_v27, %v848_v26 }
 0x149   : > { %v5345_v31 = vpop.eup %5344  ;;  %v854_v32 = vadd.f32 1e-05, %v850_v30 }
 0x14a   : > { %v856_v33 = vmul.f32 %v5345_v31, %v853_v22  ;;  %vm862_vm1 = vweird.f32 %v5345_v31 }
 0x14b   : > { %5346 = vrsqrt.f32 %v854_v32  ;;  %vm863_vm3 = vmor %vm861_vm2, %vm862_vm1  ;;  %vm871_vm5 = vweird.f32 %v854_v32  ;;  %vm952_vm2 = vcmask 130048  }
 0x14c   : > { %v857_v34 = vmul.f32 %v5345_v31, %v856_v33  ;;  %vm743_vm1 = vmand %vm737_vm15, %vm741_vm0 }
 0x14d   : > { %v6195_v9 = vsel %vm743_vm1, 1.0, %v5773_v5 }
 0x14e   : > { %v858_v35 = vmul.f32 0.5, %v857_v34  ;;  %4342 = vmatmul.msk.f32.gmra.mxu0 %vm756_vm14, %v6195_v9 }
 0x150   : > { %v859_v36 = vsub.f32 1.5, %v858_v35 }
 0x151   : > { %v5347_v37 = vpop.eup %5346  ;;  %v784_v26 = vpop.f32.mrf.mxu0 }
 0x152   : > { %v860_v38 = vmul.f32 %v5345_v31, %v859_v36  ;;  %v866_v39 = vmul.f32 %v5347_v37, %v854_v32  ;;  %vm872_vm4 = vweird.f32 %v5347_v37  ;;  %v4343_v28 = vadd.f32 -1.0, %v784_v26 }
 0x153   : > { %vm873_vm6 = vmor %vm871_vm5, %vm872_vm4 }
 0x154   : > { %v867_v40 = vmul.f32 %v5347_v37, %v866_v39  ;;  %v864_v42 = vsel %vm863_vm3, %v5345_v31, %v860_v38  ;;  %v6204_v29 = vmul.f32 1e+30, %v4343_v28 }
 0x155   : > { %v875_v47 = vmul.f32 %v864_v42, %v851_v44 }
 0x156   : > { %v868_v43 = vmul.f32 0.5, %v867_v40 }
 0x157   : > { %v878_v52 = vmul.f32 %v877_v46, %v875_v47 }
 0x158   : > { %v869_v45 = vsub.f32 1.5, %v868_v43 }
 0x159   : > { %v881_v55 = vadd.f32 %v880_v51, %v878_v52 }
 0x15a   : > { %v870_v48 = vmul.f32 %v5347_v37, %v869_v45 }
 0x15c   : > { %v874_v50 = vsel %vm873_vm6, %v5347_v37, %v870_v48 }
 0x15d   : > { %v876_v53 = vmul.f32 %v874_v50, %v852_v49 }
 0x15f   : > { %v879_v54 = vmul.f32 %v877_v46, %v876_v53 }
 0x161   : > { %v882_v56 = vadd.f32 %v880_v51, %v879_v54 }
 0x163   : > { %v6162_v57 = vpack.c.bf16 %v882_v56, %v881_v55 }
 0x165   : > { %900 = vmatmul.bf16.vlgmr.msra.gmra.mxu1 %v6162_v57  ;;  %922 = vmatmul.bf16.vlgmr.msra.gmra.mxu2 %v6162_v57 }
 0x166   : > { %944 = vmatmul.bf16.vlgmr.msra.gmra.mxu3 %v6162_v57 }
 0x175   : > { %1034 = vmatmul.bf16.vlgmr.msrb.gmra.mxu2 %v6162_v57 }
 0x176   : > { %1057 = vmatmul.bf16.vlgmr.msrb.gmra.mxu3 %v6162_v57 }
 0x1cb   : > { %v787_v27 = vpop.f32.mrf.mxu0 }
 0x1cc   : > { %v4344_v32 = vadd.f32 -1.0, %v787_v27 }
 0x1ce   : > { %v6208_v34 = vmul.f32 1e+30, %v4344_v32 }
 0x1e2   : > { %v901_v13 = vpop.f32.mrf.mxu1 }
 0x1e8   : > { %v923_v10 = vpop.f32.mrf.mxu2 }
 0x1e9   : > { %v945_v11 = vpop.f32.mrf.mxu3 }
 0x1ea   : > { %v903_v20 = vpop.f32.mrf.mxu1 }
 0x1eb   : > { %v950_v21 = vpack.c.bf16 %v903_v20, %v901_v13 }
 0x1f0   : > { %v925_v14 = vpop.f32.mrf.mxu2 }
 0x1f1   : > { %v951_v15 = vpack.c.bf16 %v925_v14, %v923_v10  ;;  %v947_v16 = vpop.f32.mrf.mxu3 }
 0x1f2   : > { %v996_v18 = vpack.c.bf16 %v947_v16, %v945_v11 }
 0x1f3   : > { %v957_v19 = vsel %vm952_vm2, %v951_v15, 0 }
 0x1f4   : > { %1007 = vmatpush.bf16.msrb.mxu1 %v996_v18  ;;  %966 = vmatpush.bf16.xpose.msrb.mxu0 %v957_v19 }
 0x1f8   : > { %v1035_v62 = vpop.f32.mrf.mxu2 }
 0x1f9   : > { %v1058_v22 = vpop.f32.mrf.mxu3 }
 0x1fb   : > { %4361 = vmatmul.msk.bf16.vlgmr.msrb.gmra.mxu0 %vm952_vm2, %v950_v21 }
 0x1fc   : > { %1079 = vmatpush.bf16.xpose.msra.mxu0 %v5103_v17 }
 0x200   : > { %v1037_v63 = vpop.f32.mrf.mxu2 }
 0x201   : > { %v1060_v23 = vpop.f32.mrf.mxu3  ;;  %v1086_v0 = vpack.c.bf16 %v1037_v63, %v1035_v62 }
 0x202   : > { %v1087_v24 = vpack.c.bf16 %v1060_v23, %v1058_v22 }
 0x204   : > { %v1092_v25 = vsel %vm952_vm2, %v1087_v24, 0  ;;  %1192 = vmatpush.bf16.msrb.mxu0 %v5100_v3 }
 0x205   : > { %1101 = vmatpush.bf16.xpose.msra.mxu1 %v1092_v25 }
 0x20b   : > { %1080 = vmatmul.bf16.vlgmr.msra.gmra.mxu0 %v6162_v57 }
 0x278   : > { %v968_v30 = vpop.f32.mrf.mxu0 }
 0x279   : > { %v969_v31 = vadd.f32 %v968_v30, %v6204_v29 }
 0x27b   : > { %v973_v33 = vsel %vm952_vm2, %v969_v31, -inf }
 0x27c   : > { %974 = vmax.xlane.f32.xlu2 %v973_v33 }
 0x280   : > { %v970_v35 = vpop.f32.mrf.mxu0 }
 0x281   : > { %v971_v36 = vadd.f32 %v970_v35, %v6208_v34 }
 0x283   : > { %v976_v37 = vsel %vm952_vm2, %v971_v36, -inf }
 0x284   : > { %977 = vmax.xlane.f32.xlu2 %v976_v37 }
 0x288   : > { %v1081_v38 = vpop.f32.mrf.mxu0 }
 0x290   : > { %v1083_v39 = vpop.f32.mrf.mxu0 }
 0x291   : > { %v1131_v40 = vpack.c.bf16 %v1083_v39, %v1081_v38 }
 0x293   : > { %1142 = vmatpush.bf16.msra.mxu2 %v1131_v40  ;;  %v5104_v40 = vld [vmem:[%s6094_s12 + $0x8] sm:$0xff] }
 0x294   : > { %1169 = vmatpush.bf16.msra.mxu3 %v5104_v40 }
 0x2ef   : > { %v975_v42 = vpop.xlane.xlu2 %974 }
 0x2f0   : > { %v979_v43 = vsub.f32 %v969_v31, %v975_v42  ;;  %v5106_v31 = vld [vmem:[%s6086_s23 + $0x10] sm:$0xff] }
 0x2f1   : > { %1238 = vmatpush.bf16.xpose.msrb.mxu2 %v5106_v31  ;;  %v5107_v42 = vld [vmem:[%s6092_s16 + $0x10] sm:$0xff]  ;;  %v5111_v31 = vld [vmem:[%s6092_s16 + $0x18] sm:$0xff]  ;;  %s7255_s16 = sld [smem:[#allocation34_spill]] }
 0x2f2   : > { %v981_v44 = vmul.f32 1.442695, %v979_v43  ;;  %1261 = vmatpush.bf16.xpose.msrb.mxu3 %v5107_v42 }
 0x2f4   : > { %5348 = vpow2.f32 %v981_v44 }
 0x2f7   : > { %v978_v45 = vpop.xlane.xlu2 %977 }
 0x2f8   : > { %v980_v46 = vsub.f32 %v971_v36, %v978_v45  ;;  %v5109_v45 = vld [vmem:[%s6079_s30 + $0x18] sm:$0xff] }
 0x2fa   : > { %v5349_v47 = vpop.eup %5348  ;;  %v983_v48 = vmul.f32 1.442695, %v980_v46 }
 0x2fb   : > { %v985_v49 = vsel %vm952_vm2, %v5349_v47, 0.0 }
 0x2fc   : > { %5350 = vpow2.f32 %v983_v48  ;;  %986 = vadd.xlane.f32.xlu0 %v985_v49 }
 0x302   : > { %v5351_v50 = vpop.eup %5350 }
 0x303   : > { %v988_v51 = vsel %vm952_vm2, %v5351_v50, 0.0 }
 0x304   : > { %989 = vadd.xlane.f32.xlu1 %v988_v51  ;;  %v5110_v51 = vld [vmem:[%s6086_s23 + $0x18] sm:$0xff] }
 0x36f   : > { %v987_v52 = vpop.xlane.xlu0 %986 }
 0x370   : > { %5352 = vrcp.f32 %v987_v52 }
 0x376   : > { %v5353_v54 = vpop.eup %5352 }
 0x377   : > { %v990_v53 = vpop.xlane.xlu1 %989  ;;  %v993_v56 = vmul.f32 %v5353_v54, %v5349_v47 }
 0x378   : > { %5354 = vrcp.f32 %v990_v53 }
 0x37e   : > { %v5355_v55 = vpop.eup %5354 }
 0x37f   : > { %v994_v58 = vmul.f32 %v5355_v55, %v5351_v50 }
 0x381   : > { %v995_v61 = vpack.c.bf16 %v994_v58, %v993_v56 }
 0x383   : > { %4362 = vmatmul.msk.bf16.vlgmr.msrb.gmra.mxu1 %vm952_vm2, %v995_v61  ;;  %v5108_v61 = vld [vmem:[%s6094_s12 + $0x10] sm:$0xff] }
 0x384   : > { %1215 = vmatpush.bf16.xpose.msrb.mxu1 %v5105_v60 }
 0x393   : > { %4381 = vmatmul.msk.bf16.vlgmr.msra.gmra.mxu1 %vm952_vm2, %v1086_v0 }
 0x3a3   : > { %1216 = vmatmul.bf16.vlgmr.msrb.gmra.mxu1 %v6162_v57 }
 0x400   : > { %v1009_v10 = vpop.f32.mrf.mxu1 }
 0x408   : > { %v1011_v11 = vpop.f32.mrf.mxu1 }
 0x409   : > { %v1016_v13 = vpack.c.bf16 %v1011_v11, %v1009_v10 }
 0x40b   : > { %4394 = vmatmul.msk.bf16.vlgmr.msrb.gmra.mxu0 %vm952_vm2, %v1016_v13 }
 0x410   : > { %v1103_v14 = vpop.f32.mrf.mxu1 }
 0x411   : > { %v1104_v15 = vadd.f32 %v1103_v14, %v6204_v29 }
 0x413   : > { %v1108_v16 = vsel %vm952_vm2, %v1104_v15, -inf }
 0x414   : > { %1109 = vmax.xlane.f32.xlu2 %v1108_v16 }
 0x418   : > { %v1105_v17 = vpop.f32.mrf.mxu1 }
 0x419   : > { %v1106_v18 = vadd.f32 %v1105_v17, %v6208_v34 }
 0x41b   : > { %v1111_v19 = vsel %vm952_vm2, %v1106_v18, -inf }
 0x41c   : > { %1112 = vmax.xlane.f32.xlu0 %v1111_v19 }
 0x420   : > { %v1217_v48 = vpop.f32.mrf.mxu1 }
 0x428   : > { %v1219_v53 = vpop.f32.mrf.mxu1 }
 0x429   : > { %v1268_v54 = vpack.c.bf16 %v1219_v53, %v1217_v48 }
 0x487   : > { %v1110_v20 = vpop.xlane.xlu2 %1109 }
 0x488   : > { %v1114_v21 = vsub.f32 %v1104_v15, %v1110_v20  ;;  %v6239_v55 = vpop.f32.mrf.mxu0 }
 0x48a   : > { %v1116_v22 = vmul.f32 1.442695, %v1114_v21 }
 0x48c   : > { %5356 = vpow2.f32 %v1116_v22 }
 0x48f   : > { %v1113_v23 = vpop.xlane.xlu0 %1112 }
 0x490   : > { %v1115_v24 = vsub.f32 %v1106_v18, %v1113_v23  ;;  %v6245_v60 = vpop.f32.mrf.mxu0 }
 0x492   : > { %v5357_v25 = vpop.eup %5356  ;;  %v1118_v26 = vmul.f32 1.442695, %v1115_v24 }
 0x493   : > { %v1120_v27 = vsel %vm952_vm2, %v5357_v25, 0.0 }
 0x494   : > { %5358 = vpow2.f32 %v1118_v26  ;;  %1121 = vadd.xlane.f32.xlu1 %v1120_v27 }
 0x49a   : > { %v5359_v28 = vpop.eup %5358 }
 0x49b   : > { %v1123_v30 = vsel %vm952_vm2, %v5359_v28, 0.0 }
 0x49c   : > { %1124 = vadd.xlane.f32.xlu2 %v1123_v30 }
 0x507   : > { %v1122_v32 = vpop.xlane.xlu1 %1121 }
 0x508   : > { %5360 = vrcp.f32 %v1122_v32 }
 0x50e   : > { %v5361_v35 = vpop.eup %5360 }
 0x50f   : > { %v1125_v33 = vpop.xlane.xlu2 %1124  ;;  %v1128_v37 = vmul.f32 %v5361_v35, %v5357_v25 }
 0x510   : > { %5362 = vrcp.f32 %v1125_v33 }
 0x516   : > { %v5363_v36 = vpop.eup %5362 }
 0x517   : > { %v1129_v38 = vmul.f32 %v5363_v36, %v5359_v28 }
 0x519   : > { %v1130_v39 = vpack.c.bf16 %v1129_v38, %v1128_v37 }
 0x51b   : > { %4382 = vmatmul.msk.bf16.vlgmr.msra.gmra.mxu2 %vm952_vm2, %v1130_v39 }
 0x51c   : > { %1351 = vmatpush.bf16.msra.mxu2 %v5108_v61 }
 0x52b   : > { %1239 = vmatmul.bf16.vlgmr.msrb.gmra.mxu2 %v6162_v57 }
 0x59e   : > { %v1144_v43 = vpop.f32.mrf.mxu2 }
 0x5a6   : > { %v1146_v44 = vpop.f32.mrf.mxu2 }
 0x5a7   : > { %v1152_v46 = vpack.c.bf16 %v1146_v44, %v1144_v43 }
 0x5a9   : > { %4389 = vmatmul.msk.bf16.vlgmr.msra.gmra.mxu3 %vm952_vm2, %v1152_v46 }
 0x5aa   : > { %1376 = vmatpush.bf16.xpose.msra.mxu3 %v5109_v45 }
 0x5ae   : > { %v1240_v47 = vpop.f32.mrf.mxu2 }
 0x5b6   : > { %v1242_v49 = vpop.f32.mrf.mxu2 }
 0x5b7   : > { %v1269_v50 = vpack.c.bf16 %v1242_v49, %v1240_v47 }
 0x5b9   : > { %1262 = vmatmul.bf16.vlgmr.msrb.gmra.mxu3 %v6162_v57  ;;  %v1274_v52 = vsel %vm952_vm2, %v1269_v50, 0 }
 0x5ba   : > { %1283 = vmatpush.bf16.xpose.msra.mxu0 %v1274_v52 }
 0x5c1   : > { %4413 = vmatmul.msk.bf16.vlgmr.msra.gmra.mxu0 %vm952_vm2, %v1268_v54 }
 0x5c2   : > { %1399 = vmatpush.bf16.xpose.msrb.mxu0 %v5110_v51 }
 0x5c9   : > { %1377 = vmatmul.bf16.vlgmr.msra.gmra.mxu3 %v6162_v57 }
 0x5d1   : > { %1400 = vmatmul.bf16.vlgmr.msrb.gmra.mxu0 %v6162_v57 }
 0x62c   : > { %v6241_v56 = vpop.f32.mrf.mxu3 }
 0x634   : > { %v6243_v58 = vpop.f32.mrf.mxu3 }
 0x63c   : > { %v1263_v62 = vpop.f32.mrf.mxu3 }
 0x63e   : > { %v1285_v63 = vpop.f32.mrf.mxu0 }
 0x63f   : > { %v1286_v0 = vadd.f32 %v1285_v63, %v6204_v29 }
 0x641   : > { %v1290_v3 = vsel %vm952_vm2, %v1286_v0, -inf }
 0x642   : > { %1291 = vmax.xlane.f32.xlu0 %v1290_v3 }
 0x644   : > { %v1265_v10 = vpop.f32.mrf.mxu3 }
 0x645   : > { %v1313_v11 = vpack.c.bf16 %v1265_v10, %v1263_v62 }
 0x646   : > { %v1287_v13 = vpop.f32.mrf.mxu0 }
 0x647   : > { %v1288_v14 = vadd.f32 %v1287_v13, %v6208_v34  ;;  %1324 = vmatpush.bf16.msra.mxu1 %v1313_v11 }
 0x649   : > { %v1293_v15 = vsel %vm952_vm2, %v1288_v14, -inf }
 0x64a   : > { %1294 = vmax.xlane.f32.xlu1 %v1293_v15 }
 0x64b   : > { %1422 = vmatpush.bf16.xpose.msrb.mxu1 %v5111_v31 }
 0x64c   : > { %v1378_v44 = vpop.f32.mrf.mxu3 }
 0x64e   : > { %v1401_v16 = vpop.f32.mrf.mxu0 }
 0x654   : > { %v1380_v46 = vpop.f32.mrf.mxu3 }
 0x655   : > { %v1429_v48 = vpack.c.bf16 %v1380_v46, %v1378_v44  ;;  %v5125_v46 = vld [vmem:[%s6100_s20 + $0x64] sm:$0xf] }
 0x656   : > { %v1403_v17 = vpop.f32.mrf.mxu0 }
 0x657   : > { %v1430_v18 = vpack.c.bf16 %v1403_v17, %v1401_v16 }
 0x659   : > { %v1435_v19 = vsel %vm952_vm2, %v1430_v18, 0 }
 0x65a   : > { %1444 = vmatpush.bf16.xpose.msrb.mxu2 %v1435_v19 }
 0x6b5   : > { %v1292_v20 = vpop.xlane.xlu0 %1291 }
 0x6b6   : > { %v1296_v21 = vsub.f32 %v1286_v0, %v1292_v20 }
 0x6b8   : > { %v1298_v22 = vmul.f32 1.442695, %v1296_v21 }
 0x6ba   : > { %5364 = vpow2.f32 %v1298_v22 }
 0x6bd   : > { %v1295_v23 = vpop.xlane.xlu1 %1294 }
 0x6be   : > { %v1297_v24 = vsub.f32 %v1288_v14, %v1295_v23  ;;  %v5112_v23 = vld [vmem:[%s6094_s12 + $0x18] sm:$0xff] }
 0x6bf   : > { %1512 = vmatpush.bf16.msra.mxu0 %v5112_v23  ;;  %v5116_v23 = vld [vmem:[%s6100_s20 + $0x14] sm:$0xf0] }
 0x6c0   : > { %v5365_v25 = vpop.eup %5364  ;;  %v1300_v26 = vmul.f32 1.442695, %v1297_v24 }
 0x6c1   : > { %v1302_v27 = vsel %vm952_vm2, %v5365_v25, 0.0 }
 0x6c2   : > { %5366 = vpow2.f32 %v1300_v26  ;;  %1303 = vadd.xlane.f32.xlu2 %v1302_v27  ;;  %v1195_v27 = vadd.f32 %v6239_v55, %v6241_v56 }
 0x6c8   : > { %v5367_v28 = vpop.eup %5366 }
 0x6c9   : > { %v1305_v30 = vsel %vm952_vm2, %v5367_v28, 0.0 }
 0x6ca   : > { %1306 = vadd.xlane.f32.xlu0 %v1305_v30 }
 0x735   : > { %v1304_v32 = vpop.xlane.xlu2 %1303 }
 0x736   : > { %5368 = vrcp.f32 %v1304_v32  ;;  %v1523_v32 = vperm.slane %v6156_v41, 2 }
 0x73c   : > { %v5369_v35 = vpop.eup %5368 }
 0x73d   : > { %v1307_v33 = vpop.xlane.xlu0 %1306  ;;  %v1310_v37 = vmul.f32 %v5369_v35, %v5365_v25  ;;  %v1197_v35 = vadd.f32 %v6245_v60, %v6243_v58  ;;  %v4507_v60 = vld [vmem:[%s6100_s20 + $0x70] sm:$0xf] }
 0x73e   : > { %5370 = vrcp.f32 %v1307_v33 }
 0x744   : > { %v5371_v36 = vpop.eup %5370 }
 0x745   : > { %v1311_v38 = vmul.f32 %v5371_v36, %v5367_v28 }
 0x747   : > { %v1312_v39 = vpack.c.bf16 %v1311_v38, %v1310_v37 }
 0x749   : > { %4414 = vmatmul.msk.bf16.vlgmr.msra.gmra.mxu1 %vm952_vm2, %v1312_v39  ;;  %v5128_v39 = vld [vmem:[%s6100_s20 + $0x74] sm:$0xf0] }
 0x759   : > { %1423 = vmatmul.bf16.vlgmr.msrb.gmra.mxu1 %v6162_v57 }
 0x7c6   : > { %v1326_v40 = vpop.f32.mrf.mxu1 }
 0x7ce   : > { %v1328_v42 = vpop.f32.mrf.mxu1 }
 0x7cf   : > { %v1334_v43 = vpack.c.bf16 %v1328_v42, %v1326_v40  ;;  %v5127_v40 = vld [vmem:[%s6100_s20 + $0x74] sm:$0xf]  ;;  %v4508_v42 = vor.u32 %v5128_v39, %v4507_v60 }
 0x7d1   : > { %4421 = vmatmul.msk.bf16.vlgmr.msra.gmra.mxu2 %vm952_vm2, %v1334_v43  ;;  %v4509_v43 = vld [vmem:[%s6100_s20 + $0x78] sm:$0xf0]  ;;  %1669 = vmatpush.bf16.msra.mxu1 %v4508_v42 }
 0x7d2   : > { %v4512_v44 = vor.u32 %v5127_v40, %v4509_v43 }
 0x7d4   : > { %1683 = vmatpush.bf16.msra.mxu2 %v4512_v44 }
 0x7d6   : > { %v1424_v45 = vpop.f32.mrf.mxu1 }
 0x7de   : > { %v1426_v47 = vpop.f32.mrf.mxu1 }
 0x7df   : > { %v1474_v49 = vpack.c.bf16 %v1426_v47, %v1424_v45  ;;  %v5126_v45 = vld [vmem:[%s6100_s20 + $0x64] sm:$0xf0] }
 0x7e1   : > { %4440 = vmatmul.msk.bf16.vlgmr.msrb.gmra.mxu2 %vm952_vm2, %v1429_v48  ;;  %1485 = vmatpush.bf16.msrb.mxu3 %v1474_v49  ;;  %v4501_v48 = vld [vmem:[%s6100_s20 + $0x68] sm:$0xf0] }
 0x7e2   : > { %v4504_v49 = vor.u32 %v5125_v46, %v4501_v48 }
 0x7e4   : > { %1684 = vmatpush.bf16.msra.mxu2 %v4504_v49 }
 0x854   : > { %v1353_v50 = vpop.f32.mrf.mxu2 }
 0x855   : > { %v1358_v28 = vadd.f32 %v1353_v50, %v1195_v27  ;;  %v4491_v50 = vld [vmem:[%s6100_s20 + $0x50] sm:$0xf] }
 0x85c   : > { %v1355_v51 = vpop.f32.mrf.mxu2 }
 0x85d   : > { %v1359_v37 = vadd.f32 %v1355_v51, %v1197_v35  ;;  %v5124_v51 = vld [vmem:[%s6100_s20 + $0x54] sm:$0xf0] }
 0x864   : > { %v1446_v52 = vpop.f32.mrf.mxu2 }
 0x865   : > { %v1447_v53 = vadd.f32 %v1446_v52, %v6204_v29  ;;  %v5123_v52 = vld [vmem:[%s6100_s20 + $0x54] sm:$0xf] }
 0x867   : > { %v1451_v57 = vsel %vm952_vm2, %v1447_v53, -inf }
 0x868   : > { %1452 = vmax.xlane.f32.xlu1 %v1451_v57  ;;  %v4493_v57 = vld [vmem:[%s6100_s20 + $0x58] sm:$0xf0] }
 0x86c   : > { %v1448_v54 = vpop.f32.mrf.mxu2 }
 0x86d   : > { %v1449_v61 = vadd.f32 %v1448_v54, %v6208_v34  ;;  %v4496_v54 = vor.u32 %v5123_v52, %v4493_v57 }
 0x86f   : > { %v1454_v62 = vsel %vm952_vm2, %v1449_v61, -inf  ;;  %1685 = vmatpush.bf16.msra.mxu2 %v4496_v54 }
 0x870   : > { %1455 = vmax.xlane.f32.xlu2 %v1454_v62  ;;  %v5122_v62 = vld [vmem:[%s6100_s20 + $0x44] sm:$0xf0] }
 0x8db   : > { %v1453_v63 = vpop.xlane.xlu1 %1452 }
 0x8dc   : > { %v1457_v0 = vsub.f32 %v1447_v53, %v1453_v63  ;;  %v4492_v53 = vor.u32 %v5124_v51, %v4491_v50  ;;  %v5121_v63 = vld [vmem:[%s6100_s20 + $0x44] sm:$0xf] }
 0x8de   : > { %v1459_v3 = vmul.f32 1.442695, %v1457_v0 }
 0x8e0   : > { %5372 = vpow2.f32 %v1459_v3  ;;  %v4485_v3 = vld [vmem:[%s6100_s20 + $0x48] sm:$0xf0] }
 0x8e3   : > { %v1456_v10 = vpop.xlane.xlu2 %1455 }
 0x8e4   : > { %v1458_v11 = vsub.f32 %v1449_v61, %v1456_v10  ;;  %v4483_v61 = vld [vmem:[%s6100_s20 + $0x40] sm:$0xf]  ;;  %v4488_v10 = vor.u32 %v5121_v63, %v4485_v3 }
 0x8e5   : > { %v4484_v0 = vor.u32 %v5122_v62, %v4483_v61 }
 0x8e6   : > { %v5373_v13 = vpop.eup %5372  ;;  %v1461_v14 = vmul.f32 1.442695, %v1458_v11  ;;  %1686 = vmatpush.bf16.msra.mxu2 %v4488_v10  ;;  %v4475_v11 = vld [vmem:[%s6100_s20 + $0x30] sm:$0xf] }
 0x8e7   : > { %v1463_v15 = vsel %vm952_vm2, %v5373_v13, 0.0 }
 0x8e8   : > { %5374 = vpow2.f32 %v1461_v14  ;;  %1464 = vadd.xlane.f32.xlu0 %v1463_v15  ;;  %v5119_v14 = vld [vmem:[%s6100_s20 + $0x34] sm:$0xf] }
 0x8ee   : > { %v5375_v29 = vpop.eup %5374 }
 0x8ef   : > { %v1466_v16 = vsel %vm952_vm2, %v5375_v29, 0.0 }
 0x8f0   : > { %1467 = vadd.xlane.f32.xlu1 %v1466_v16 }
 0x95b   : > { %v1465_v34 = vpop.xlane.xlu0 %1464 }
 0x95c   : > { %5376 = vrcp.f32 %v1465_v34  ;;  %v4467_v34 = vld [vmem:[%s6100_s20 + $0x20] sm:$0xf] }
 0x962   : > { %v5377_v18 = vpop.eup %5376 }
 0x963   : > { %v1468_v17 = vpop.xlane.xlu1 %1467  ;;  %v1471_v20 = vmul.f32 %v5377_v18, %v5373_v13  ;;  %v5120_v13 = vld [vmem:[%s6100_s20 + $0x34] sm:$0xf0]  ;;  %v5117_v18 = vld [vmem:[%s6100_s20 + $0x24] sm:$0xf] }
 0x964   : > { %5378 = vrcp.f32 %v1468_v17  ;;  %v4476_v15 = vor.u32 %v5120_v13, %v4475_v11  ;;  %v5118_v17 = vld [vmem:[%s6100_s20 + $0x24] sm:$0xf0] }
 0x96a   : > { %v5379_v19 = vpop.eup %5378 }
 0x96b   : > { %v1472_v21 = vmul.f32 %v5379_v19, %v5375_v29  ;;  %v4477_v29 = vld [vmem:[%s6100_s20 + $0x38] sm:$0xf0]  ;;  %v4468_v19 = vor.u32 %v5118_v17, %v4467_v34 }
 0x96c   : > { %v4480_v16 = vor.u32 %v5119_v14, %v4477_v29 }
 0x96d   : > { %v1473_v22 = vpack.c.bf16 %v1472_v21, %v1471_v20  ;;  %v4469_v20 = vld [vmem:[%s6100_s20 + $0x28] sm:$0xf0] }
 0x96e   : > { %1687 = vmatpush.bf16.msra.mxu2 %v4480_v16  ;;  %v4472_v21 = vor.u32 %v5117_v18, %v4469_v20 }
 0x96f   : > { %4441 = vmatmul.msk.bf16.vlgmr.msrb.gmra.mxu3 %vm952_vm2, %v1473_v22  ;;  %v4459_v22 = vld [vmem:[%s6100_s20 + $0x10] sm:$0xf] }
 0x972   : > { %1688 = vmatpush.bf16.msra.mxu2 %v4472_v21 }
 0x9f2   : > { %v1487_v24 = vpop.f32.mrf.mxu3 }
 0x9fa   : > { %v1489_v25 = vpop.f32.mrf.mxu3 }
 0x9fb   : > { %v1495_v26 = vpack.c.bf16 %v1489_v25, %v1487_v24  ;;  %v5115_v24 = vld [vmem:[%s6100_s20 + $0x14] sm:$0xf]  ;;  %v4460_v25 = vor.u32 %v5116_v23, %v4459_v22 }
 0x9fd   : > { %4448 = vmatmul.msk.bf16.vlgmr.msra.gmra.mxu0 %vm952_vm2, %v1495_v26  ;;  %v4461_v26 = vld [vmem:[%s6100_s20 + $0x18] sm:$0xf0] }
 0xa7a   : > { %v1514_v30 = vpop.f32.mrf.mxu0 }
 0xa7b   : > { %v1519_v31 = vadd.f32 %v1514_v30, %v1358_v28  ;;  %v4464_v28 = vor.u32 %v5115_v24, %v4461_v26  ;;  %v4451_v30 = vld [vmem:[%s6100_s20] sm:$0xf] }
 0xa7c   : > { %v1699_v24 = vld [vmem:[%s7255_s16 + $0x10] sm:$0x3] }
 0xa7d   : > { %v1521_v33 = vadd.f32 %v1519_v31, %v6134_v2  ;;  %v5114_v31 = vld [vmem:[%s6100_s20 + $0x4] sm:$0xf0]  ;;  %1689 = vmatpush.bf16.msra.mxu2 %v4464_v28  ;;  %v1697_v28 = vld [vmem:[%s7255_s16] sm:$0xff] }
 0xa7e   : > { %v4452_v35 = vor.u32 %v5114_v31, %v4451_v30  ;;  %v1700_v31 = vld [vmem:[%s7255_s16 + $0x18] sm:$0x3] }
 0xa7f   : > { %v6275_v36 = vadd.f32 %v1523_v32, %v1521_v33 }
 0xa81   : > { %1526 = vadd.xlane.f32.xlu2 %v6275_v36  ;;  %v1530_v55 = vmul.f32 %v6275_v36, %v6275_v36 }
 0xa82   : > { %v1516_v56 = vpop.f32.mrf.mxu0 }
 0xa83   : > { %v1520_v38 = vadd.f32 %v1516_v56, %v1359_v37  ;;  %1532 = vadd.xlane.f32.xlu1 %v1530_v55  ;;  %v4453_v37 = vld [vmem:[%s6100_s20 + $0x8] sm:$0xf0] }
 0xa85   : > { %v1522_v2 = vadd.f32 %v1520_v38, %v6139_v4  ;;  %v4499_v4 = vld [vmem:[%s6100_s20 + $0x60] sm:$0xf] }
 0xa86   : > { %v4500_v47 = vor.u32 %v5126_v45, %v4499_v4 }
 0xa87   : > { %v6281_v41 = vadd.f32 %v1523_v32, %v1522_v2  ;;  %v5113_v32 = vld [vmem:[%s6100_s20 + $0x4] sm:$0xf] }
 0xa88   : > { %1670 = vmatpush.bf16.msra.mxu1 %v4500_v47  ;;  %v4456_v56 = vor.u32 %v5113_v32, %v4453_v37  ;;  %v1698_v32 = vld [vmem:[%s7255_s16 + $0x8] sm:$0xff] }
 0xa89   : > { %1528 = vadd.xlane.f32.xlu0 %v6281_v41  ;;  %v1531_v58 = vmul.f32 %v6281_v41, %v6281_v41 }
 0xa8a   : > { %1690 = vmatpush.bf16.msra.mxu2 %v4456_v56  ;;  %v5774_v56 = vmov 128.0  }
 0xa8b   : > { %1534 = vadd.xlane.f32.xlu2 %v1531_v58 }
 0xa8c   : > { %1671 = vmatpush.bf16.msra.mxu1 %v4492_v53 }
 0xa8e   : > { %1861 = vmatpush.xpose.msrb.mxu2 %v1700_v31 }
 0xa90   : > { %1672 = vmatpush.bf16.msra.mxu1 %v4484_v0 }
 0xa92   : > { %1862 = vmatpush.xpose.msrb.mxu2 %v1698_v32 }
 0xa94   : > { %1673 = vmatpush.bf16.msra.mxu1 %v4476_v15  ;;  %v6325_v15 = vld [vmem:[%s6124_s3] sm:$0x3f] }
 0xa95   : > { %v1587_v29 = vperm.slane %v6325_v15, 0 }
 0xa98   : > { %1674 = vmatpush.bf16.msra.mxu1 %v4468_v19  ;;  %v6333_v19 = vld [vmem:[%s6124_s3 + $0x8] sm:$0x3f] }
 0xa99   : > { %v1588_v21 = vperm.slane %v6333_v19, 0 }
 0xa9c   : > { %1675 = vmatpush.bf16.msra.mxu1 %v4460_v25 }
 0xaa0   : > { %1676 = vmatpush.bf16.msra.mxu1 %v4452_v35 }
 0xaf4   : > { %v1527_v27 = vpop.xlane.xlu2 %1526 }
 0xaf5   : > { %v1536_v33 = vmul.f32 %v1527_v27, %v6144_v12 }
 0xaf6   : > { %v1533_v55 = vpop.xlane.xlu1 %1532 }
 0xaf7   : > { %v1540_v38 = vmul.f32 %v1536_v33, %v1536_v33  ;;  %v1538_v2 = vmul.f32 %v1533_v55, %v6144_v12  ;;  %v1544_v63 = vsub.f32 %v6275_v36, %v1536_v33 }
 0xaf9   : > { %v1542_v58 = vsub.f32 %v1538_v2, %v1540_v38 }
 0xafb   : > { %v1546_v60 = vadd.f32 1e-05, %v1542_v58 }
 0xafc   : > { %v1529_v39 = vpop.xlane.xlu0 %1528 }
 0xafd   : > { %5380 = vrsqrt.f32 %v1546_v60  ;;  %v1537_v40 = vmul.f32 %v1529_v39, %v6144_v12  ;;  %vm1554_vm4 = vweird.f32 %v1546_v60 }
 0xafe   : > { %v1535_v42 = vpop.xlane.xlu2 %1534 }
 0xaff   : > { %v1541_v43 = vmul.f32 %v1537_v40, %v1537_v40  ;;  %v1539_v44 = vmul.f32 %v1535_v42, %v6144_v12  ;;  %v1545_v0 = vsub.f32 %v6281_v41, %v1537_v40 }
 0xb01   : > { %v1543_v4 = vsub.f32 %v1539_v44, %v1541_v43 }
 0xb03   : > { %v5381_v45 = vpop.eup %5380  ;;  %v1547_v46 = vadd.f32 1e-05, %v1543_v4 }
 0xb04   : > { %v1549_v47 = vmul.f32 %v5381_v45, %v1546_v60  ;;  %vm1555_vm3 = vweird.f32 %v5381_v45 }
 0xb05   : > { %5382 = vrsqrt.f32 %v1547_v46  ;;  %vm1556_vm6 = vmor %vm1554_vm4, %vm1555_vm3  ;;  %vm1564_vm7 = vweird.f32 %v1547_v46 }
 0xb06   : > { %v1550_v48 = vmul.f32 %v5381_v45, %v1549_v47  ;;  %5384 = vrcp.f32 %v5774_v56 }
 0xb08   : > { %v1551_v49 = vmul.f32 0.5, %v1550_v48 }
 0xb0a   : > { %v1552_v51 = vsub.f32 1.5, %v1551_v49 }
 0xb0b   : > { %v5383_v50 = vpop.eup %5382 }
 0xb0c   : > { %v1559_v52 = vmul.f32 %v5383_v50, %v1547_v46  ;;  %v1553_v57 = vmul.f32 %v5381_v45, %v1552_v51  ;;  %vm1565_vm5 = vweird.f32 %v5383_v50  ;;  %v5385_v38 = vpop.eup %5384 }
 0xb0d   : > { %vm1566_vm8 = vmor %vm1564_vm7, %vm1565_vm5  ;;  %v1868_v2 = vmul.f32 128.0, %v5385_v38  ;;  %vm1872_vm9 = vweird.f32 %v5385_v38 }
 0xb0e   : > { %v1560_v53 = vmul.f32 %v5383_v50, %v1559_v52  ;;  %v1557_v62 = vsel %vm1556_vm6, %v5381_v45, %v1553_v57 }
 0xb0f   : > { %v1568_v10 = vmul.f32 %v1557_v62, %v1544_v63  ;;  %v1869_v58 = vsub.f32 1.0, %v1868_v2  ;;  %v4595_v63 = vld [vmem:[%s6102_s26 + $0x70] sm:$0xf]  ;;  %v5158_v2 = vld [vmem:[%s6102_s26 + $0xe4] sm:$0xf0] }
 0xb10   : > { %v1561_v54 = vmul.f32 0.5, %v1560_v53 }
 0xb11   : > { %v1870_v60 = vmul.f32 %v5385_v38, %v1869_v58 }
 0xb12   : > { %v1562_v61 = vsub.f32 1.5, %v1561_v54 }
 0xb13   : > { %v1871_v39 = vadd.f32 %v5385_v38, %v1870_v60 }
 0xb14   : > { %v1563_v12 = vmul.f32 %v5383_v50, %v1562_v61 }
 0xb15   : > { %v6376_v43 = vsel %vm1872_vm9, %v5385_v38, %v1871_v39  ;;  %v4651_v38 = vld [vmem:[%s6102_s26 + $0xe0] sm:$0xf] }
 0xb16   : > { %v1567_v3 = vsel %vm1566_vm8, %v5383_v50, %v1563_v12  ;;  %v4652_v39 = vor.u32 %v5158_v2, %v4651_v38  ;;  %v5154_v38 = vld [vmem:[%s6102_s26 + $0xc4] sm:$0xf0] }
 0xb17   : > { %v1569_v11 = vmul.f32 %v1567_v3, %v1545_v0  ;;  %v5144_v0 = vld [vmem:[%s6102_s26 + $0x74] sm:$0xf0]  ;;  %v4659_v3 = vld [vmem:[%s6102_s26 + $0xf0] sm:$0xf] }
 0xb19   : > { %v1586_v13 = vpack.c.bf16 %v1569_v11, %v1568_v10 }
 0xb1b   : > { %1677 = vmatmul.bf16.vlgmr.msra.gmra.mxu1 %v1586_v13  ;;  %1691 = vmatmul.bf16.vlgmr.msra.gmra.mxu2 %v1586_v13  ;;  %v4596_v13 = vor.u32 %v5144_v0, %v4595_v63  ;;  %v2124_v0 = vperm.slane %v6333_v19, 1 }
 0xb1c   : > { %4517 = vmatpush.msk.msra.mxu2 %vm763_vm10, %v1699_v24 }
 0xb1e   : > { %1903 = vmatpush.msra.mxu2 %v1697_v28 }
 0xb98   : > { %v1678_v14 = vpop.f32.mrf.mxu1 }
 0xb99   : > { %v6328_v17 = vadd.f32 %v1678_v14, %v1587_v29  ;;  %v5160_v14 = vld [vmem:[%s6102_s26 + $0xf4] sm:$0xf0] }
 0xb9b   : > { %v1743_v22 = vmul.f32 %v6328_v17, %v6328_v17 }
 0xb9e   : > { %v1692_v16 = vpop.f32.mrf.mxu2 }
 0xb9f   : > { %v6351_v26 = vadd.f32 %v1692_v16, %v1588_v21  ;;  %v4597_v16 = vld [vmem:[%s6102_s26 + $0x78] sm:$0xf0] }
 0xba0   : > { %v1680_v34 = vpop.f32.mrf.mxu1 }
 0xba1   : > { %v6330_v18 = vadd.f32 %v1680_v34, %v1587_v29  ;;  %v1744_v30 = vmul.f32 %v6351_v26, %v6351_v26  ;;  %v5143_v29 = vld [vmem:[%s6102_s26 + $0x74] sm:$0xf] }
 0xba3   : > { %v1745_v20 = vmul.f32 %v6330_v18, %v6330_v18  ;;  %1717 = vmatpush.msra.mxu3 %v6330_v18 }
 0xba5   : > { %1718 = vmatpush.msra.mxu3 %v6328_v17  ;;  %1761 = vmatpush.msrb.mxu0 %v1745_v20 }
 0xba6   : > { %v1694_v23 = vpop.f32.mrf.mxu2  ;;  %4513 = vmatmul.msk.f32.vlgmr.msra.gmra.mxu3 %vm952_vm2, %v6179_v6 }
 0xba7   : > { %v6347_v25 = vadd.f32 %v1694_v23, %v1588_v21  ;;  %1762 = vmatpush.msrb.mxu0 %v1743_v22  ;;  %v4660_v22 = vor.u32 %v5160_v14, %v4659_v3  ;;  %v4600_v23 = vor.u32 %v5143_v29, %v4597_v16 }
 0xba8   : > { %4515 = vmatmul.msk.f32.vlgmr.msrb.gmra.mxu0 %vm952_vm2, %v6179_v6 }
 0xba9   : > { %v1746_v27 = vmul.f32 %v6347_v25, %v6347_v25  ;;  %1737 = vmatpush.msrb.mxu3 %v6347_v25  ;;  %1801 = vmatpush.xpose.msra.mxu0 %v1699_v24 }
 0xbab   : > { %1738 = vmatpush.msrb.mxu3 %v6351_v26 }
 0xbad   : > { %1781 = vmatpush.msra.mxu3 %v1746_v27  ;;  %1802 = vmatpush.xpose.msra.mxu0 %v1697_v28 }
 0xbae   : > { %4514 = vmatmul.msk.f32.vlgmr.msrb.gmra.mxu3 %vm952_vm2, %v6179_v6 }
 0xbaf   : > { %1782 = vmatpush.msra.mxu3 %v1744_v30 }
 0xbb1   : > { %1841 = vmatpush.xpose.msrb.mxu0 %v1699_v24  ;;  %1821 = vmatpush.xpose.msrb.mxu3 %v1700_v31 }
 0xbb5   : > { %1842 = vmatpush.xpose.msrb.mxu0 %v1697_v28  ;;  %1822 = vmatpush.xpose.msrb.mxu3 %v1698_v32 }
 0xbb6   : > { %4516 = vmatmul.msk.f32.vlgmr.msra.gmra.mxu3 %vm952_vm2, %v6179_v6 }
 0xbb9   : > { %4519 = vmatpush.msk.msra.mxu3 %vm763_vm10, %v1700_v31 }
 0xbbb   : > { %1923 = vmatpush.msra.mxu3 %v1698_v32 }
 0xc25   : > { %v1764_v35 = vpop.f32.mrf.mxu0 }
 0xc29   : > { %v1720_v33 = vpop.f32.mrf.mxu3 }
 0xc2a   : > { %1803 = vmatmul.f32.vlgmr.msra.gmra.mxu0 %v1720_v33  ;;  %v4587_v33 = vld [vmem:[%s6102_s26 + $0x60] sm:$0xf] }
 0xc31   : > { %v1740_v37 = vpop.f32.mrf.mxu3 }
 0xc32   : > { %1823 = vmatmul.f32.vlgmr.msrb.gmra.mxu3 %v1740_v37  ;;  %1843 = vmatmul.f32.vlgmr.msrb.gmra.mxu0 %v1764_v35  ;;  %v5142_v35 = vld [vmem:[%s6102_s26 + $0x64] sm:$0xf0] }
 0xc33   : > { %4529 = vmatpush.msk.msrb.mxu3 %vm763_vm10, %v1700_v31  ;;  %v4661_v31 = vld [vmem:[%s6102_s26 + $0xf8] sm:$0xf0]  ;;  %v4588_v60 = vor.u32 %v5142_v35, %v4587_v33 }
 0xc35   : > { %2018 = vmatpush.msrb.mxu3 %v1698_v32 }
 0xc39   : > { %v1784_v55 = vpop.f32.mrf.mxu3 }
 0xc3a   : > { %1863 = vmatmul.f32.vlgmr.msrb.gmra.mxu2 %v1784_v55 }
 0xc3b   : > { %4527 = vmatpush.msk.msrb.mxu2 %vm763_vm10, %v1699_v24  ;;  %v5159_v24 = vld [vmem:[%s6102_s26 + $0xf4] sm:$0xf] }
 0xc3c   : > { %v4664_v56 = vor.u32 %v5159_v24, %v4661_v31  ;;  %v4571_v31 = vld [vmem:[%s6102_s26 + $0x40] sm:$0xf]  ;;  %v5151_v24 = vld [vmem:[%s6102_s26 + $0xb4] sm:$0xf] }
 0xc3d   : > { %1998 = vmatpush.msrb.mxu2 %v1697_v28 }
 0xca7   : > { %v1804_v40 = vpop.f32.mrf.mxu0 }
 0xcaf   : > { %v1844_v45 = vpop.f32.mrf.mxu0 }
 0xcb5   : > { %v1824_v42 = vpop.f32.mrf.mxu3 }
 0xcb6   : > { %v1825_v44 = vadd.f32 %v1824_v42, %v1804_v40  ;;  %v5141_v40 = vld [vmem:[%s6102_s26 + $0x64] sm:$0xf]  ;;  %v4589_v42 = vld [vmem:[%s6102_s26 + $0x68] sm:$0xf0] }
 0xcb8   : > { %v1874_v4 = vmul.f32 %v6376_v43, %v1825_v44  ;;  %v5157_v44 = vld [vmem:[%s6102_s26 + $0xe4] sm:$0xf] }
 0xcba   : > { %4518 = vmatmul.msk.f32.vlgmr.msra.gmra.mxu2 %vm1878_vm11, %v1874_v4  ;;  %4520 = vmatmul.msk.f32.vlgmr.msra.gmra.mxu3 %vm1878_vm11, %v1874_v4  ;;  %v1876_v49 = vmul.f32 %v1874_v4, %v1874_v4 }
 0xcbd   : > { %v1864_v46 = vpop.f32.mrf.mxu2 }
 0xcbe   : > { %v1865_v47 = vadd.f32 %v1864_v46, %v1844_v45  ;;  %v4592_v45 = vor.u32 %v5141_v40, %v4589_v42  ;;  %v4653_v46 = vld [vmem:[%s6102_s26 + $0xe8] sm:$0xf0]  ;;  %v5153_v42 = vld [vmem:[%s6102_s26 + $0xc4] sm:$0xf] }
 0xcbf   : > { %v4573_v40 = vld [vmem:[%s6102_s26 + $0x48] sm:$0xf0] }
 0xcc0   : > { %v1875_v48 = vmul.f32 %v6376_v43, %v1865_v47 }
 0xcc2   : > { %v1877_v50 = vsub.f32 %v1875_v48, %v1876_v49 }
 0xcc4   : > { %4528 = vmatmul.msk.f32.vlgmr.msrb.gmra.mxu2 %vm1878_vm11, %v1877_v50  ;;  %4530 = vmatmul.msk.f32.vlgmr.msrb.gmra.mxu3 %vm1878_vm11, %v1877_v50  ;;  %v4656_v50 = vor.u32 %v5157_v44, %v4653_v46 }
 0xd3d   : > { %v1905_v51 = vpop.f32.mrf.mxu2  ;;  %v1925_v52 = vpop.f32.mrf.mxu3 }
 0xd3e   : > { %4521 = vmatpush.msk.msra.mxu0 %vm763_vm10, %v1905_v51  ;;  %4524 = vmatpush.msk.msrb.mxu1 %vm763_vm10, %v1925_v52  ;;  %v4579_v51 = vld [vmem:[%s6102_s26 + $0x50] sm:$0xf]  ;;  %v5140_v52 = vld [vmem:[%s6102_s26 + $0x54] sm:$0xf0] }
 0xd3f   : > { %4522 = vmatmul.msk.f32.vlgmr.msra.gmra.mxu0 %vm756_vm14, %v6184_v7  ;;  %4525 = vmatmul.msk.f32.vlgmr.msrb.gmra.mxu1 %vm756_vm14, %v6184_v7 }
 0xd40   : > { %2489 = vmatpush.bf16.msrb.mxu0 %v4596_v13  ;;  %2503 = vmatpush.bf16.msra.mxu1 %v4660_v22  ;;  %v5155_v22 = vld [vmem:[%s6102_s26 + $0xd4] sm:$0xf] }
 0xd44   : > { %2490 = vmatpush.bf16.msrb.mxu0 %v4588_v60  ;;  %2504 = vmatpush.bf16.msra.mxu1 %v4652_v39 }
 0xd47   : > { %4523 = vmatmul.msk.f32.gmra.mxu0 %vm756_vm14, %v6195_v9  ;;  %4526 = vmatmul.msk.f32.gmra.mxu1 %vm756_vm14, %v6195_v9  ;;  %v2000_v53 = vpop.f32.mrf.mxu2  ;;  %v2020_v57 = vpop.f32.mrf.mxu3 }
 0xd48   : > { %4531 = vmatpush.msk.msra.mxu2 %vm763_vm10, %v2000_v53  ;;  %4534 = vmatpush.msk.msra.mxu3 %vm763_vm10, %v2020_v57  ;;  %v2123_v57 = vperm.slane %v6325_v15, 1 }
 0xd49   : > { %4532 = vmatmul.msk.f32.vlgmr.msra.gmra.mxu2 %vm756_vm14, %v6184_v7  ;;  %4535 = vmatmul.msk.f32.vlgmr.msra.gmra.mxu3 %vm756_vm14, %v6184_v7 }
 0xd4a   : > { %2517 = vmatpush.bf16.msrb.mxu2 %v4600_v23  ;;  %2531 = vmatpush.bf16.msrb.mxu3 %v4664_v56  ;;  %v4645_v23 = vld [vmem:[%s6102_s26 + $0xd8] sm:$0xf0]  ;;  %v4635_v56 = vld [vmem:[%s6102_s26 + $0xc0] sm:$0xf] }
 0xd4b   : > { %v4636_v39 = vor.u32 %v5154_v38, %v4635_v56  ;;  %v5134_v56 = vld [vmem:[%s6102_s26 + $0x24] sm:$0xf0] }
 0xd4e   : > { %2518 = vmatpush.bf16.msrb.mxu2 %v4592_v45  ;;  %2532 = vmatpush.bf16.msrb.mxu3 %v4656_v50 }
 0xd51   : > { %4533 = vmatmul.msk.f32.gmra.mxu2 %vm756_vm14, %v6195_v9  ;;  %4536 = vmatmul.msk.f32.gmra.mxu3 %vm756_vm14, %v6195_v9 }
 0xdbc   : > { %v6425_v28 = vpop.f32.mrf.mxu0  ;;  %v6435_v37 = vpop.f32.mrf.mxu1 }
 0xdbd   : > { %v2023_v47 = vsub.f32 %v6328_v17, %v6425_v28  ;;  %v2024_v48 = vsub.f32 %v6351_v26, %v6435_v37  ;;  %v4643_v17 = vld [vmem:[%s6102_s26 + $0xd0] sm:$0xf]  ;;  %v2129_v37 = vperm.slane %v6325_v15, 2 }
 0xdbe   : > { %v4547_v15 = vld [vmem:[%s6102_s26 + $0x10] sm:$0xf] }
 0xdc4   : > { %v6482_v33 = vpop.f32.mrf.mxu0 }
 0xdcc   : > { %v2050_v54 = vpop.f32.mrf.mxu2  ;;  %v2073_v61 = vpop.f32.mrf.mxu3 }
 0xdcd   : > { %v6404_v12 = vadd.f32 1e-05, %v2050_v54  ;;  %v6406_v62 = vadd.f32 1e-05, %v2073_v61  ;;  %v4580_v54 = vor.u32 %v5140_v52, %v4579_v51  ;;  %v5156_v61 = vld [vmem:[%s6102_s26 + $0xd4] sm:$0xf0] }
 0xdce   : > { %v4644_v3 = vor.u32 %v5156_v61, %v4643_v17  ;;  %v5136_v52 = vld [vmem:[%s6102_s26 + $0x34] sm:$0xf0]  ;;  %v4627_v17 = vld [vmem:[%s6102_s26 + $0xb0] sm:$0xf] }
 0xdcf   : > { %5386 = vrsqrt.f32 %v6404_v12  ;;  %vm2085_vm15 = vweird.f32 %v6404_v12  ;;  %vm2095_vm1 = vweird.f32 %v6406_v62  ;;  %2491 = vmatpush.bf16.msrb.mxu0 %v4580_v54  ;;  %v5152_v61 = vld [vmem:[%s6102_s26 + $0xb4] sm:$0xf0] }
 0xdd0   : > { %5388 = vrsqrt.f32 %v6406_v62  ;;  %2505 = vmatpush.bf16.msra.mxu1 %v4644_v3 }
 0xdd4   : > { %v2053_v10 = vpop.f32.mrf.mxu2  ;;  %v2076_v11 = vpop.f32.mrf.mxu3  ;;  %2506 = vmatpush.bf16.msra.mxu1 %v4636_v39 }
 0xdd5   : > { %v6416_v34 = vpop.eup %5386  ;;  %v6418_v20 = vadd.f32 1e-05, %v2053_v10  ;;  %v6420_v21 = vadd.f32 1e-05, %v2076_v11  ;;  %v5139_v10 = vld [vmem:[%s6102_s26 + $0x54] sm:$0xf] }
 0xdd6   : > { %v6423_v27 = vpop.eup %5388  ;;  %v2080_v30 = vmul.f32 %v6416_v34, %v6404_v12  ;;  %vm2086_vm12 = vweird.f32 %v6416_v34  ;;  %v4581_v11 = vld [vmem:[%s6102_s26 + $0x58] sm:$0xf0] }
 0xdd7   : > { %v2090_v32 = vmul.f32 %v6423_v27, %v6406_v62  ;;  %5390 = vrsqrt.f32 %v6418_v20  ;;  %vm2096_vm13 = vweird.f32 %v6423_v27  ;;  %v4584_v16 = vor.u32 %v5139_v10, %v4581_v11  ;;  %vm6472_vm0 = vmor %vm2085_vm15, %vm2086_vm12 }
 0xdd8   : > { %v2081_v55 = vmul.f32 %v6416_v34, %v2080_v30  ;;  %5392 = vrsqrt.f32 %v6420_v21  ;;  %v4648_v30 = vor.u32 %v5155_v22, %v4645_v23  ;;  %vm2097_vm3 = vmor %vm2095_vm1, %vm2096_vm13  ;;  %v4628_v11 = vor.u32 %v5152_v61, %v4627_v17 }
 0xdd9   : > { %v2091_v58 = vmul.f32 %v6423_v27, %v2090_v32  ;;  %v5138_v32 = vld [vmem:[%s6102_s26 + $0x44] sm:$0xf0]  ;;  %2519 = vmatpush.bf16.msrb.mxu2 %v4584_v16  ;;  %vm2105_vm6 = vweird.f32 %v6418_v20  ;;  %vm2115_vm8 = vweird.f32 %v6420_v21 }
 0xdda   : > { %v2082_v4 = vmul.f32 0.5, %v2081_v55  ;;  %v4572_v55 = vor.u32 %v5138_v32, %v4571_v31  ;;  %2533 = vmatpush.bf16.msrb.mxu3 %v4648_v30  ;;  %2507 = vmatpush.bf16.msra.mxu1 %v4628_v11 }
 0xddb   : > { %v2092_v49 = vmul.f32 0.5, %v2091_v58 }
 0xddc   : > { %v2083_v53 = vsub.f32 1.5, %v2082_v4  ;;  %v2130_v4 = vperm.slane %v6333_v19, 2  ;;  %2492 = vmatpush.bf16.msrb.mxu0 %v4572_v55  ;;  %v4555_v55 = vld [vmem:[%s6102_s26 + $0x20] sm:$0xf] }
 0xddd   : > { %v6456_v26 = vpop.eup %5390  ;;  %v2093_v63 = vsub.f32 1.5, %v2092_v49  ;;  %v4637_v49 = vld [vmem:[%s6102_s26 + $0xc8] sm:$0xf0] }
 0xdde   : > { %v6462_v13 = vpop.eup %5392  ;;  %v2084_v14 = vmul.f32 %v6416_v34, %v2083_v53  ;;  %v2100_v29 = vmul.f32 %v6456_v26, %v6418_v20  ;;  %v4640_v51 = vor.u32 %v5153_v42, %v4637_v49  ;;  %vm2106_vm4 = vweird.f32 %v6456_v26 }
 0xddf   : > { %v2094_v28 = vmul.f32 %v6423_v27, %v2093_v63  ;;  %v2110_v12 = vmul.f32 %v6462_v13, %v6420_v21  ;;  %v1977_v63 = vpop.f32.mrf.mxu1  ;;  %vm2116_vm5 = vweird.f32 %v6462_v13  ;;  %vm2107_vm7 = vmor %vm2105_vm6, %vm2106_vm4 }
 0xde0   : > { %v2088_v35 = vsel %vm6472_vm0, %v6416_v34, %v2084_v14  ;;  %v2101_v62 = vmul.f32 %v6456_v26, %v2100_v29  ;;  %v5137_v34 = vld [vmem:[%s6102_s26 + $0x44] sm:$0xf]  ;;  %v5135_v14 = vld [vmem:[%s6102_s26 + $0x34] sm:$0xf]  ;;  %v4565_v29 = vld [vmem:[%s6102_s26 + $0x38] sm:$0xf0]  ;;  %2534 = vmatpush.bf16.msrb.mxu3 %v4640_v51  ;;  %v2026_v31 = vsub.f32 %v6347_v25, %v1977_v63 }
 0xde1   : > { %v2119_v2 = vmul.f32 %v2088_v35, %v2023_v47  ;;  %v2098_v58 = vsel %vm2097_vm3, %v6423_v27, %v2094_v28  ;;  %v2111_v60 = vmul.f32 %v6462_v13, %v2110_v12  ;;  %v4576_v46 = vor.u32 %v5137_v34, %v4573_v40  ;;  %v4629_v28 = vld [vmem:[%s6102_s26 + $0xb8] sm:$0xf0]  ;;  %vm2117_vm9 = vmor %vm2115_vm8, %vm2116_vm5  ;;  %v5133_v34 = vld [vmem:[%s6102_s26 + $0x24] sm:$0xf] }
 0xde2   : > { %v2120_v44 = vmul.f32 %v2098_v58, %v2024_v48  ;;  %v2102_v45 = vmul.f32 0.5, %v2101_v62  ;;  %v2025_v27 = vsub.f32 %v6330_v18, %v6482_v33  ;;  %v4563_v48 = vld [vmem:[%s6102_s26 + $0x30] sm:$0xf]  ;;  %v4568_v23 = vor.u32 %v5135_v14, %v4565_v29  ;;  %v5150_v58 = vld [vmem:[%s6102_s26 + $0xa4] sm:$0xf0] }
 0xde3   : > { %v2125_v47 = vmul.f32 %v2123_v57, %v2119_v2  ;;  %v2112_v50 = vmul.f32 0.5, %v2111_v60  ;;  %2520 = vmatpush.bf16.msrb.mxu2 %v4576_v46  ;;  %v4564_v18 = vor.u32 %v5136_v52, %v4563_v48  ;;  %v4632_v20 = vor.u32 %v5151_v24, %v4629_v28  ;;  %v4619_v2 = vld [vmem:[%s6102_s26 + $0xa0] sm:$0xf]  ;;  %v5149_v51 = vld [vmem:[%s6102_s26 + $0xa4] sm:$0xf] }
 0xde4   : > { %v2126_v53 = vmul.f32 %v2124_v0, %v2120_v44  ;;  %v2103_v54 = vsub.f32 1.5, %v2102_v45  ;;  %v4556_v44 = vor.u32 %v5134_v56, %v4555_v55  ;;  %v4557_v45 = vld [vmem:[%s6102_s26 + $0x28] sm:$0xf0]  ;;  %v4620_v49 = vor.u32 %v5150_v58, %v4619_v2  ;;  %v5217_v2 = vld [vmem:[%s6102_s26 + $0x2c4] sm:$0xf] }
 0xde5   : > { %v6513_v3 = vadd.f32 %v2129_v37, %v2125_v47  ;;  %v2113_v10 = vsub.f32 1.5, %v2112_v50  ;;  %2493 = vmatpush.bf16.msrb.mxu0 %v4564_v18  ;;  %2535 = vmatpush.bf16.msrb.mxu3 %v4632_v20  ;;  %v4560_v50 = vor.u32 %v5133_v34, %v4557_v45  ;;  %v4621_v52 = vld [vmem:[%s6102_s26 + $0xa8] sm:$0xf0]  ;;  %v4611_v18 = vld [vmem:[%s6102_s26 + $0x90] sm:$0xf] }
 0xde6   : > { %v6520_v16 = vadd.f32 %v2130_v4, %v2126_v53  ;;  %v2104_v22 = vmul.f32 %v6456_v26, %v2103_v54  ;;  %2508 = vmatpush.bf16.msra.mxu1 %v4620_v49  ;;  %v4624_v29 = vor.u32 %v5149_v51, %v4621_v52  ;;  %v4549_v20 = vld [vmem:[%s6102_s26 + $0x18] sm:$0xf0]  ;;  %v4539_v45 = vld [vmem:[%s6102_s26] sm:$0xf]  ;;  %v5130_v49 = vld [vmem:[%s6102_s26 + $0x4] sm:$0xf0] }
 0xde7   : > { %v6527_v12 = vmul.f32 0.70710677, %v6513_v3  ;;  %v2114_v30 = vmul.f32 %v6462_v13, %v2113_v10  ;;  %2521 = vmatpush.bf16.msrb.mxu2 %v4568_v23  ;;  %v5131_v23 = vld [vmem:[%s6102_s26 + $0x14] sm:$0xf]  ;;  %v4603_v51 = vld [vmem:[%s6102_s26 + $0x80] sm:$0xf] }
 0xde8   : > { %v6535_v32 = vmul.f32 0.70710677, %v6520_v16  ;;  %v2108_v33 = vsel %vm2107_vm7, %v6456_v26, %v2104_v22 }
 0xde9   : > { %v2151_v35 = vand.u32 2147483647, %v6527_v12  ;;  %v2121_v21 = vmul.f32 %v2108_v33, %v2025_v27  ;;  %v2118_v62 = vsel %vm2117_vm9, %v6462_v13, %v2114_v30  ;;  %2494 = vmatpush.bf16.msrb.mxu0 %v4556_v44  ;;  %2536 = vmatpush.bf16.msrb.mxu3 %v4624_v29  ;;  %v5205_v29 = vld [vmem:[%s6102_s26 + $0x264] sm:$0xf] }
 0xdea   : > { %v2152_v25 = vand.u32 2147483647, %v6535_v32  ;;  %v2122_v38 = vmul.f32 %v2118_v62, %v2026_v31  ;;  %v5147_v31 = vld [vmem:[%s6102_s26 + $0x94] sm:$0xf] }
 0xdeb   : > { %v2155_v26 = vmul.f32 0.3275911, %v2151_v35  ;;  %v2259_v60 = vsub.f32 0.0, %v2151_v35  ;;  %v2127_v39 = vmul.f32 %v2123_v57, %v2121_v21  ;;  %2522 = vmatpush.bf16.msrb.mxu2 %v4560_v50 }
 0xdec   : > { %v2156_v40 = vmul.f32 0.3275911, %v2152_v25  ;;  %v2260_v42 = vsub.f32 0.0, %v2152_v25  ;;  %v2128_v13 = vmul.f32 %v2124_v0, %v2122_v38 }
 0xded   : > { %v6553_v46 = vadd.f32 1.0, %v2155_v26  ;;  %v2263_v27 = vmul.f32 %v2259_v60, %v2151_v35  ;;  %v6559_v57 = vadd.f32 %v2129_v37, %v2127_v39  ;;  %v5132_v37 = vld [vmem:[%s6102_s26 + $0x14] sm:$0xf0] }
 0xdee   : > { %v6555_v47 = vadd.f32 1.0, %v2156_v40  ;;  %v6564_v0 = vadd.f32 %v2130_v4, %v2128_v13  ;;  %v2264_v48 = vmul.f32 %v2260_v42, %v2152_v25  ;;  %v5148_v4 = vld [vmem:[%s6102_s26 + $0x94] sm:$0xf0]  ;;  %v4548_v22 = vor.u32 %v5132_v37, %v4547_v15  ;;  %v4613_v25 = vld [vmem:[%s6102_s26 + $0x98] sm:$0xf0] }
 0xdef   : > { %5394 = vrcp.f32 %v6553_v46  ;;  %v2172_v53 = vand.u32 2147483647, %v6553_v46  ;;  %v2174_v54 = vand.u32 2147483648, %v6553_v46  ;;  %v6574_v17 = vmul.f32 1.442695, %v2263_v27 }
 0xdf0   : > { %5396 = vrcp.f32 %v6555_v47  ;;  %v6577_v19 = vmul.f32 0.70710677, %v6559_v57  ;;  %v2187_v61 = vand.u32 2147483647, %v6555_v47  ;;  %v2189_v63 = vand.u32 2147483648, %v6555_v47  ;;  %2495 = vmatpush.bf16.msrb.mxu0 %v4548_v22 }
 0xdf1   : > { %v6583_v10 = vmul.f32 0.70710677, %v6564_v0  ;;  %v6585_v11 = vmul.f32 1.442695, %v2264_v48  ;;  %vm2168_vm12 = vweird.f32 %v6553_v46  ;;  %v4612_v30 = vor.u32 %v5148_v4, %v4611_v18  ;;  %v5146_v48 = vld [vmem:[%s6102_s26 + $0x84] sm:$0xf0] }
 0xdf2   : > { %v2153_v14 = vand.u32 2147483647, %v6577_v19  ;;  %vm6599_vm13 = vcmp.eq.f32.partialorder %v2172_v53, 8.507059e+37  ;;  %v2175_v62 = vor.u32 1.1754944e-38, %v2174_v54  ;;  %vm6606_vm15 = vcmp.eq.f32.partialorder %v2187_v61, 8.507059e+37 }
 0xdf3   : > { %v2154_v28 = vand.u32 2147483647, %v6583_v10  ;;  %v2190_v58 = vor.u32 1.1754944e-38, %v2189_v63  ;;  %2509 = vmatpush.bf16.msra.mxu1 %v4612_v30  ;;  %v4552_v13 = vor.u32 %v5131_v23, %v4549_v20  ;;  %v4616_v44 = vor.u32 %v5147_v31, %v4613_v25  ;;  %v5129_v53 = vld [vmem:[%s6102_s26 + $0x4] sm:$0xf] }
 0xdf4   : > { %v2157_v55 = vmul.f32 0.3275911, %v2153_v14  ;;  %v2261_v56 = vsub.f32 0.0, %v2153_v14  ;;  %vm2183_vm4 = vweird.f32 %v6555_v47  ;;  %v4541_v61 = vld [vmem:[%s6102_s26 + $0x8] sm:$0xf0]  ;;  %v4540_v31 = vor.u32 %v5130_v49, %v4539_v45 }
 0xdf5   : > { %v6589_v24 = vpop.eup %5394  ;;  %v2158_v26 = vmul.f32 0.3275911, %v2154_v28  ;;  %v2262_v50 = vsub.f32 0.0, %v2154_v28  ;;  %2523 = vmatpush.bf16.msrb.mxu2 %v4552_v13  ;;  %2537 = vmatpush.bf16.msrb.mxu3 %v4616_v44  ;;  %v5145_v63 = vld [vmem:[%s6102_s26 + $0x84] sm:$0xf] }
 0xdf6   : > { %v6595_v33 = vpop.eup %5396  ;;  %v2164_v35 = vmul.f32 %v6589_v24, %v6553_v46  ;;  %vm2169_vm0 = vweird.f32 %v6589_v24  ;;  %v6611_v39 = vadd.f32 1.0, %v2157_v55  ;;  %v2265_v34 = vmul.f32 %v2261_v56, %v2153_v14  ;;  %v4605_v23 = vld [vmem:[%s6102_s26 + $0x88] sm:$0xf0]  ;;  %v5208_v55 = vld [vmem:[%s6102_s26 + $0x274] sm:$0xf0]  ;;  %2496 = vmatpush.bf16.msrb.mxu0 %v4540_v31 }
 0xdf7   : > { %v2179_v38 = vmul.f32 %v6595_v33, %v6555_v47  ;;  %v6613_v42 = vadd.f32 1.0, %v2158_v26  ;;  %vm2184_vm1 = vweird.f32 %v6595_v33  ;;  %vm6632_vm3 = vmor %vm2168_vm12, %vm2169_vm0  ;;  %v2266_v20 = vmul.f32 %v2262_v50, %v2154_v28  ;;  %v4851_v56 = vld [vmem:[%s6102_s26 + $0x2f0] sm:$0xf]  ;;  %v5224_v25 = vld [vmem:[%s6102_s26 + $0x2f4] sm:$0xf0] }
 0xdf8   : > { %v2165_v60 = vsub.f32 1.0, %v2164_v35  ;;  %5398 = vrcp.f32 %v6611_v39  ;;  %v2202_v15 = vand.u32 2147483647, %v6611_v39  ;;  %v2204_v37 = vand.u32 2147483648, %v6611_v39  ;;  %vm6644_vm5 = vmor %vm2183_vm4, %vm2184_vm1  ;;  %v4787_v35 = vld [vmem:[%s6102_s26 + $0x270] sm:$0xf] }
 0xdf9   : > { %v2180_v40 = vsub.f32 1.0, %v2179_v38  ;;  %5400 = vrcp.f32 %v6613_v42  ;;  %v6637_v4 = vmul.f32 1.442695, %v2265_v34  ;;  %v2217_v22 = vand.u32 2147483647, %v6613_v42 }
 0xdfa   : > { %v2166_v27 = vmul.f32 %v6589_v24, %v2165_v60  ;;  %v6648_v46 = vor.u32 1.1754944e-38, %v2204_v37  ;;  %v2219_v47 = vand.u32 2147483648, %v6613_v42  ;;  %v4604_v34 = vor.u32 %v5146_v48, %v4603_v51  ;;  %v5223_v28 = vld [vmem:[%s6102_s26 + $0x2f4] sm:$0xf]  ;;  %v4853_v45 = vld [vmem:[%s6102_s26 + $0x2f8] sm:$0xf0] }
 0xdfb   : > { %v2181_v52 = vmul.f32 %v6595_v33, %v2180_v40  ;;  %v5207_v40 = vld [vmem:[%s6102_s26 + $0x274] sm:$0xf]  ;;  %vm2198_vm6 = vweird.f32 %v6611_v39  ;;  %vm6688_vm7 = vcmp.eq.f32.partialorder %v2202_v15, 8.507059e+37  ;;  %v4779_v51 = vld [vmem:[%s6102_s26 + $0x260] sm:$0xf]  ;;  %vm6698_vm12 = vcmp.eq.f32.partialorder %v2217_v22, 8.507059e+37 }
 0xdfc   : > { %v2167_v54 = vadd.f32 %v6589_v24, %v2166_v27  ;;  %v6667_v60 = vor.u32 1.1754944e-38, %v2219_v47  ;;  %2510 = vmatpush.bf16.msra.mxu1 %v4604_v34  ;;  %v5206_v48 = vld [vmem:[%s6102_s26 + $0x264] sm:$0xf0]  ;;  %v4856_v22 = vor.u32 %v5223_v28, %v4853_v45  ;;  %v5221_v31 = vld [vmem:[%s6102_s26 + $0x2e4] sm:$0xf]  ;;  %5402 = vpow2.f32 %v6574_v17 }
 0xdfd   : > { %v2182_v14 = vadd.f32 %v6595_v33, %v2181_v52  ;;  %v4835_v45 = vld [vmem:[%s6102_s26 + $0x2d0] sm:$0xf]  ;;  %5404 = vpow2.f32 %v6585_v11  ;;  %vm2143_vm1 = vcmp.ge.f32.partialorder %v6527_v12, 0.0  ;;  %v5194_v12 = vld [vmem:[%s6102_s26 + $0x204] sm:$0xf0]  ;;  %vm794_vm4 = vcmp.eq.s32.totalorder %v6169_v59, %v6173_v1 }
 0xdfe   : > { %v2171_v30 = vsel %vm6632_vm3, %v6589_v24, %v2167_v54  ;;  %v4789_v24 = vld [vmem:[%s6102_s26 + $0x278] sm:$0xf0]  ;;  %v6672_v13 = vpop.eup %5398  ;;  %v5222_v54 = vld [vmem:[%s6102_s26 + $0x2e4] sm:$0xf0]  ;;  %v4819_v11 = vld [vmem:[%s6102_s26 + $0x2b0] sm:$0xf]  ;;  %5406 = vpow2.f32 %v6637_v4 }
 0xdff   : > { %v6662_v38 = vsel %vm6599_vm13, %v2175_v62, %v2171_v30  ;;  %v2186_v26 = vsel %vm6644_vm5, %v6595_v33, %v2182_v14  ;;  %v6679_v62 = vmul.f32 1.442695, %v2266_v20  ;;  %v4544_v33 = vor.u32 %v5129_v53, %v4541_v61  ;;  %v6682_v49 = vpop.eup %5400  ;;  %v4843_v53 = vld [vmem:[%s6102_s26 + $0x2e0] sm:$0xf]  ;;  %v4781_v20 = vld [vmem:[%s6102_s26 + $0x268] sm:$0xf0] }
 0xe00   : > { %v2223_v44 = vmul.f32 1.0614054, %v6662_v38  ;;  %v6677_v21 = vsel %vm6606_vm15, %v2190_v58, %v2186_v26  ;;  %v2194_v50 = vmul.f32 %v6672_v13, %v6611_v39  ;;  %v4608_v58 = vor.u32 %v5145_v63, %v4605_v23 }
 0xe01   : > { %v2224_v27 = vmul.f32 1.0614054, %v6677_v21  ;;  %vm2199_vm8 = vweird.f32 %v6672_v13  ;;  %v2209_v37 = vmul.f32 %v6682_v49, %v6613_v42  ;;  %vm2214_vm9 = vweird.f32 %v6682_v49  ;;  %2524 = vmatpush.bf16.msrb.mxu2 %v4544_v33 }
 0xe02   : > { %v2227_v52 = vadd.f32 -1.4531521, %v2223_v44  ;;  %v2195_v61 = vsub.f32 1.0, %v2194_v50  ;;  %2538 = vmatpush.bf16.msrb.mxu3 %v4608_v58  ;;  %v4788_v63 = vor.u32 %v5208_v55, %v4787_v35  ;;  %v4852_v14 = vor.u32 %v5224_v25, %v4851_v56  ;;  %v4845_v55 = vld [vmem:[%s6102_s26 + $0x2e8] sm:$0xf0]  ;;  %vm6718_vm15 = vmor %vm2198_vm6, %vm2199_vm8 }
 0xe03   : > { %v2228_v18 = vadd.f32 -1.4531521, %v2224_v27  ;;  %v2210_v23 = vsub.f32 1.0, %v2209_v37  ;;  %v4792_v30 = vor.u32 %v5207_v40, %v4789_v24  ;;  %vm2213_vm13 = vweird.f32 %v6613_v42  ;;  %v4771_v56 = vld [vmem:[%s6102_s26 + $0x250] sm:$0xf] }
 0xe04   : > { %v2231_v47 = vmul.f32 %v2227_v52, %v6662_v38  ;;  %v2196_v34 = vmul.f32 %v6672_v13, %v2195_v61  ;;  %2771 = vmatpush.bf16.msra.mxu0 %v4788_v63  ;;  %2785 = vmatpush.bf16.msrb.mxu1 %v4852_v14  ;;  %v4780_v35 = vor.u32 %v5206_v48, %v4779_v51  ;;  %v5204_v25 = vld [vmem:[%s6102_s26 + $0x254] sm:$0xf0]  ;;  %vm6730_vm0 = vmor %vm2213_vm13, %vm2214_vm9  ;;  %v5203_v48 = vld [vmem:[%s6102_s26 + $0x254] sm:$0xf]  ;;  %vm2144_vm3 = vcmp.ge.f32.partialorder %v6535_v32, 0.0 }
 0xe05   : > { %v2232_v26 = vmul.f32 %v2228_v18, %v6677_v21  ;;  %v2211_v28 = vmul.f32 %v6682_v49, %v2210_v23  ;;  %2799 = vmatpush.bf16.msra.mxu2 %v4792_v30  ;;  %v4844_v44 = vor.u32 %v5222_v54, %v4843_v53  ;;  %v4784_v33 = vor.u32 %v5205_v29, %v4781_v20  ;;  %v5220_v27 = vld [vmem:[%s6102_s26 + $0x2d4] sm:$0xf0]  ;;  %v4773_v52 = vld [vmem:[%s6102_s26 + $0x258] sm:$0xf0]  ;;  %v5219_v61 = vld [vmem:[%s6102_s26 + $0x2d4] sm:$0xf] }
 0xe06   : > { %v2235_v40 = vadd.f32 1.4214138, %v2231_v47  ;;  %2813 = vmatpush.bf16.msra.mxu3 %v4856_v22  ;;  %v2197_v58 = vadd.f32 %v6672_v13, %v2196_v34  ;;  %v4848_v51 = vor.u32 %v5221_v31, %v4845_v55  ;;  %v4772_v54 = vor.u32 %v5204_v25, %v4771_v56  ;;  %v4837_v63 = vld [vmem:[%s6102_s26 + $0x2d8] sm:$0xf0]  ;;  %v4763_v42 = vld [vmem:[%s6102_s26 + $0x240] sm:$0xf] }
 0xe07   : > { %v2236_v50 = vadd.f32 1.4214138, %v2232_v26  ;;  %v2212_v53 = vadd.f32 %v6682_v49, %v2211_v28  ;;  %v4836_v18 = vor.u32 %v5220_v27, %v4835_v45  ;;  %v4776_v47 = vor.u32 %v5203_v48, %v4773_v52  ;;  %v5202_v23 = vld [vmem:[%s6102_s26 + $0x244] sm:$0xf0]  ;;  %v4827_v30 = vld [vmem:[%s6102_s26 + $0x2c0] sm:$0xf] }
 0xe08   : > { %v2239_v37 = vmul.f32 %v2235_v40, %v6662_v38  ;;  %v2201_v29 = vsel %vm6718_vm15, %v6672_v13, %v2197_v58  ;;  %2772 = vmatpush.bf16.msra.mxu0 %v4780_v35  ;;  %2786 = vmatpush.bf16.msrb.mxu1 %v4844_v44  ;;  %v5218_v22 = vld [vmem:[%s6102_s26 + $0x2c4] sm:$0xf0]  ;;  %v4840_v13 = vor.u32 %v5219_v61, %v4837_v63  ;;  %v5201_v34 = vld [vmem:[%s6102_s26 + $0x244] sm:$0xf]  ;;  %v4765_v35 = vld [vmem:[%s6102_s26 + $0x248] sm:$0xf0]  ;;  %v5403_v63 = vpop.eup %5402  ;;  %5408 = vpow2.f32 %v6679_v62 }
 0xe09   : > { %v2240_v14 = vmul.f32 %v2236_v50, %v6677_v21  ;;  %v6751_v31 = vsel %vm6688_vm7, %v6648_v46, %v2201_v29  ;;  %v2216_v26 = vsel %vm6730_vm0, %v6682_v49, %v2212_v53  ;;  %2800 = vmatpush.bf16.msra.mxu2 %v4784_v33  ;;  %v4829_v40 = vld [vmem:[%s6102_s26 + $0x2c8] sm:$0xf0]  ;;  %v4755_v24 = vld [vmem:[%s6102_s26 + $0x230] sm:$0xf]  ;;  %v4828_v15 = vor.u32 %v5218_v22, %v4827_v30  ;;  %v5200_v44 = vld [vmem:[%s6102_s26 + $0x234] sm:$0xf0]  ;;  %v5405_v30 = vpop.eup %5404 }
 0xe0a   : > { %v2243_v20 = vadd.f32 -0.28449672, %v2239_v37  ;;  %2814 = vmatpush.bf16.msra.mxu3 %v4848_v51  ;;  %v2225_v56 = vmul.f32 1.0614054, %v6751_v31  ;;  %v6763_v46 = vsel %vm6698_vm12, %v6667_v60, %v2216_v26  ;;  %v4764_v60 = vor.u32 %v5202_v23, %v4763_v42  ;;  %v5216_v58 = vld [vmem:[%s6102_s26 + $0x2b4] sm:$0xf0] }
 0xe0b   : > { %v2244_v55 = vadd.f32 -0.28449672, %v2240_v14  ;;  %v2226_v25 = vmul.f32 1.0614054, %v6763_v46  ;;  %v4768_v27 = vor.u32 %v5201_v34, %v4765_v35  ;;  %v4832_v50 = vor.u32 %v5217_v2, %v4829_v40  ;;  %v5199_v48 = vld [vmem:[%s6102_s26 + $0x234] sm:$0xf] }
 0xe0c   : > { %v2247_v49 = vmul.f32 %v2243_v20, %v6662_v38  ;;  %v2229_v28 = vadd.f32 -1.4531521, %v2225_v56  ;;  %2773 = vmatpush.bf16.msra.mxu0 %v4772_v54  ;;  %2787 = vmatpush.bf16.msrb.mxu1 %v4836_v18  ;;  %v4757_v52 = vld [vmem:[%s6102_s26 + $0x238] sm:$0xf0]  ;;  %v5215_v54 = vld [vmem:[%s6102_s26 + $0x2b4] sm:$0xf]  ;;  %v4756_v29 = vor.u32 %v5200_v44, %v4755_v24  ;;  %vm795_vm6 = vcmp.eq.s32.totalorder %v6189_v8, %v6173_v1 }
 0xe0d   : > { %v2248_v17 = vmul.f32 %v2244_v55, %v6677_v21  ;;  %v2230_v45 = vadd.f32 -1.4531521, %v2226_v25  ;;  %2801 = vmatpush.bf16.msra.mxu2 %v4776_v47  ;;  %v4821_v18 = vld [vmem:[%s6102_s26 + $0x2b8] sm:$0xf0]  ;;  %v4747_v61 = vld [vmem:[%s6102_s26 + $0x220] sm:$0xf]  ;;  %v4820_v47 = vor.u32 %v5216_v58, %v4819_v11  ;;  %v4760_v26 = vor.u32 %v5199_v48, %v4757_v52 }
 0xe0e   : > { %v2251_v33 = vadd.f32 0.2548296, %v2247_v49  ;;  %2815 = vmatpush.bf16.msra.mxu3 %v4840_v13  ;;  %v2233_v51 = vmul.f32 %v2229_v28, %v6751_v31  ;;  %v5198_v23 = vld [vmem:[%s6102_s26 + $0x224] sm:$0xf0]  ;;  %v4824_v13 = vor.u32 %v5215_v54, %v4821_v18  ;;  %v5197_v34 = vld [vmem:[%s6102_s26 + $0x224] sm:$0xf] }
 0xe0f   : > { %v2252_v39 = vadd.f32 0.2548296, %v2248_v17  ;;  %v2234_v53 = vmul.f32 %v2230_v45, %v6763_v46  ;;  %v4749_v55 = vld [vmem:[%s6102_s26 + $0x228] sm:$0xf0]  ;;  %v5213_v56 = vld [vmem:[%s6102_s26 + $0x2a4] sm:$0xf]  ;;  %v4748_v28 = vor.u32 %v5198_v23, %v4747_v61 }
 0xe10   : > { %v2255_v37 = vmul.f32 %v2251_v33, %v6662_v38  ;;  %v2237_v14 = vadd.f32 1.4214138, %v2233_v51  ;;  %2774 = vmatpush.bf16.msra.mxu0 %v4764_v60  ;;  %2788 = vmatpush.bf16.msrb.mxu1 %v4828_v15  ;;  %v4811_v38 = vld [vmem:[%s6102_s26 + $0x2a0] sm:$0xf]  ;;  %v4813_v2 = vld [vmem:[%s6102_s26 + $0x2a8] sm:$0xf0]  ;;  %v4752_v33 = vor.u32 %v5197_v34, %v4749_v55 }
 0xe11   : > { %v2256_v42 = vmul.f32 %v2252_v39, %v6677_v21  ;;  %v2238_v20 = vadd.f32 1.4214138, %v2234_v53  ;;  %2802 = vmatpush.bf16.msra.mxu2 %v4768_v27  ;;  %v5214_v21 = vld [vmem:[%s6102_s26 + $0x2a4] sm:$0xf0]  ;;  %v4739_v24 = vld [vmem:[%s6102_s26 + $0x210] sm:$0xf]  ;;  %v4816_v45 = vor.u32 %v5213_v56, %v4813_v2 }
 0xe12   : > { %v2275_v22 = vmul.f32 %v5403_v63, %v2255_v37  ;;  %2816 = vmatpush.bf16.msra.mxu3 %v4832_v50  ;;  %v2241_v35 = vmul.f32 %v2237_v14, %v6751_v31  ;;  %v4812_v60 = vor.u32 %v5214_v21, %v4811_v38  ;;  %v5196_v15 = vld [vmem:[%s6102_s26 + $0x214] sm:$0xf0]  ;;  %v4803_v44 = vld [vmem:[%s6102_s26 + $0x290] sm:$0xf]  ;;  %v5195_v50 = vld [vmem:[%s6102_s26 + $0x214] sm:$0xf] }
 0xe13   : > { %v2276_v25 = vmul.f32 %v5405_v30, %v2256_v42  ;;  %v2242_v40 = vmul.f32 %v2238_v20, %v6763_v46  ;;  %v5212_v27 = vld [vmem:[%s6102_s26 + $0x294] sm:$0xf0]  ;;  %v4741_v39 = vld [vmem:[%s6102_s26 + $0x218] sm:$0xf0]  ;;  %v5211_v51 = vld [vmem:[%s6102_s26 + $0x294] sm:$0xf]  ;;  %v4740_v61 = vor.u32 %v5196_v15, %v4739_v24 }
 0xe14   : > { %v2279_v49 = vsub.f32 1.0, %v2275_v22  ;;  %v2245_v17 = vadd.f32 -0.28449672, %v2241_v35  ;;  %2775 = vmatpush.bf16.msra.mxu0 %v4756_v29  ;;  %2789 = vmatpush.bf16.msrb.mxu1 %v4820_v47  ;;  %v4805_v48 = vld [vmem:[%s6102_s26 + $0x298] sm:$0xf0]  ;;  %v5775_v52 = vmov -1.0   ;;  %v4804_v63 = vor.u32 %v5212_v27, %v4803_v44 }
 0xe15   : > { %v2246_v11 = vadd.f32 -0.28449672, %v2242_v40  ;;  %2803 = vmatpush.bf16.msra.mxu2 %v4760_v26  ;;  %v2147_v4 = vsel %vm2143_vm1, 1.0, %v5775_v52  ;;  %v2148_v37 = vsel %vm2144_vm3, 1.0, %v5775_v52  ;;  %v2280_v53 = vsub.f32 1.0, %v2276_v25 }
 0xe16   : > { %2817 = vmatpush.bf16.msra.mxu3 %v4824_v13  ;;  %v2249_v58 = vmul.f32 %v2245_v17, %v6751_v31  ;;  %v4731_v18 = vld [vmem:[%s6102_s26 + $0x200] sm:$0xf]  ;;  %v4744_v14 = vor.u32 %v5195_v50, %v4741_v39  ;;  %v4808_v29 = vor.u32 %v5211_v51, %v4805_v48  ;;  %v5210_v47 = vld [vmem:[%s6102_s26 + $0x284] sm:$0xf0]  ;;  %v5193_v23 = vld [vmem:[%s6102_s26 + $0x204] sm:$0xf]  ;;  %v2283_v38 = vmul.f32 %v2279_v49, %v2147_v4  ;;  %v5407_v13 = vpop.eup %5406 }
 0xe17   : > { %v2250_v54 = vmul.f32 %v2246_v11, %v6763_v46  ;;  %v4795_v42 = vld [vmem:[%s6102_s26 + $0x280] sm:$0xf]  ;;  %v4733_v22 = vld [vmem:[%s6102_s26 + $0x208] sm:$0xf0]  ;;  %v5209_v20 = vld [vmem:[%s6102_s26 + $0x284] sm:$0xf]  ;;  %v2284_v21 = vmul.f32 %v2280_v53, %v2148_v37  ;;  %v4732_v35 = vor.u32 %v5194_v12, %v4731_v18  ;;  %v5409_v56 = vpop.eup %5408 }
 0xe18   : > { %v2253_v62 = vadd.f32 0.2548296, %v2249_v58  ;;  %2776 = vmatpush.bf16.msra.mxu0 %v4748_v28  ;;  %2790 = vmatpush.bf16.msrb.mxu1 %v4812_v60  ;;  %v4797_v26 = vld [vmem:[%s6102_s26 + $0x288] sm:$0xf0]  ;;  %v4345_v55 = vsel %vm794_vm4, 1.0, %v5773_v5  ;;  %vm2145_vm5 = vcmp.ge.f32.partialorder %v6577_v19, 0.0 }
 0xe19   : > { %v2254_v32 = vadd.f32 0.2548296, %v2250_v54  ;;  %2804 = vmatpush.bf16.msra.mxu2 %v4752_v33  ;;  %vm2146_vm7 = vcmp.ge.f32.partialorder %v6583_v10, 0.0  ;;  %v4800_v25 = vor.u32 %v5209_v20, %v4797_v26  ;;  %v800_v24 = vsel %vm756_vm14, %v4345_v55, -inf  ;;  %v5176_v58 = vld [vmem:[%s6102_s26 + $0x174] sm:$0xf0] }
 0xe1a   : > { %2818 = vmatpush.bf16.msra.mxu3 %v4816_v45  ;;  %v2257_v30 = vmul.f32 %v2253_v62, %v6751_v31  ;;  %v4796_v31 = vor.u32 %v5210_v47, %v4795_v42  ;;  %v2149_v17 = vsel %vm2145_vm5, 1.0, %v5775_v52  ;;  %801 = vmax.xlane.f32.xlu1 %v800_v24  ;;  %v4346_v28 = vsel %vm795_vm6, 1.0, %v5773_v5  ;;  %v4979_v39 = vld [vmem:[%s6102_s26 + $0x1f0] sm:$0xf]  ;;  %v5192_v4 = vld [vmem:[%s6102_s26 + $0x1f4] sm:$0xf0] }
 0xe1b   : > { %v2258_v34 = vmul.f32 %v2254_v32, %v6763_v46  ;;  %v4736_v46 = vor.u32 %v5193_v23, %v4733_v22  ;;  %v2135_v60 = vmul.f32 0.5, %v6513_v3  ;;  %v2287_v10 = vadd.f32 1.0, %v2283_v38  ;;  %v4915_v3 = vld [vmem:[%s6102_s26 + $0x170] sm:$0xf]  ;;  %v5175_v37 = vld [vmem:[%s6102_s26 + $0x174] sm:$0xf] }
 0xe1c   : > { %v2277_v2 = vmul.f32 %v5407_v13, %v2257_v30  ;;  %2777 = vmatpush.bf16.msra.mxu0 %v4740_v61  ;;  %2791 = vmatpush.bf16.msrb.mxu1 %v4804_v63  ;;  %v2150_v44 = vsel %vm2146_vm7, 1.0, %v5775_v52  ;;  %v2136_v11 = vmul.f32 0.5, %v6520_v16  ;;  %v2288_v33 = vadd.f32 1.0, %v2284_v21  ;;  %v4917_v54 = vld [vmem:[%s6102_s26 + $0x178] sm:$0xf0] }
 0xe1d   : > { %v2278_v49 = vmul.f32 %v5409_v56, %v2258_v34  ;;  %2805 = vmatpush.bf16.msra.mxu2 %v4744_v14  ;;  %v2137_v45 = vmul.f32 0.5, %v6559_v57  ;;  %v803_v51 = vsel %vm756_vm14, %v4346_v28, -inf  ;;  %v2138_v48 = vmul.f32 0.5, %v6564_v0  ;;  %v5191_v18 = vld [vmem:[%s6102_s26 + $0x1f4] sm:$0xf] }
 0xe1e   : > { %2819 = vmatpush.bf16.msra.mxu3 %v4808_v29  ;;  %v2281_v40 = vsub.f32 1.0, %v2277_v2  ;;  %804 = vmax.xlane.f32.xlu0 %v803_v51  ;;  %v2291_v57 = vmul.f32 %v2287_v10, %v2135_v60  ;;  %v4981_v62 = vld [vmem:[%s6102_s26 + $0x1f8] sm:$0xf0]  ;;  %v2292_v61 = vmul.f32 %v2288_v33, %v2136_v11  ;;  %v4916_v0 = vor.u32 %v5176_v58, %v4915_v3  ;;  %v4907_v32 = vld [vmem:[%s6102_s26 + $0x160] sm:$0xf] }
 0xe1f   : > { %v2282_v19 = vsub.f32 1.0, %v2278_v49  ;;  %v4980_v42 = vor.u32 %v5192_v4, %v4979_v39  ;;  %v5174_v14 = vld [vmem:[%s6102_s26 + $0x164] sm:$0xf0]  ;;  %v4920_v47 = vor.u32 %v5175_v37, %v4917_v54  ;;  %v4984_v23 = vor.u32 %v5191_v18, %v4981_v62  ;;  %v4971_v38 = vld [vmem:[%s6102_s26 + $0x1e0] sm:$0xf] }
 0xe20   : > { %v2285_v15 = vmul.f32 %v2281_v40, %v2149_v17  ;;  %2778 = vmatpush.bf16.msra.mxu0 %v4732_v35  ;;  %2792 = vmatpush.bf16.msrb.mxu1 %v4796_v31  ;;  %v5190_v30 = vld [vmem:[%s6102_s26 + $0x1e4] sm:$0xf0]  ;;  %v5173_v22 = vld [vmem:[%s6102_s26 + $0x164] sm:$0xf]  ;;  %v4909_v20 = vld [vmem:[%s6102_s26 + $0x168] sm:$0xf0]  ;;  %v4908_v21 = vor.u32 %v5174_v14, %v4907_v32 }
 0xe21   : > { %v2286_v27 = vmul.f32 %v2282_v19, %v2150_v44  ;;  %2806 = vmatpush.bf16.msra.mxu2 %v4736_v46  ;;  %v5189_v26 = vld [vmem:[%s6102_s26 + $0x1e4] sm:$0xf]  ;;  %v4973_v13 = vld [vmem:[%s6102_s26 + $0x1e8] sm:$0xf0]  ;;  %v4972_v34 = vor.u32 %v5190_v30, %v4971_v38  ;;  %v4899_v35 = vld [vmem:[%s6102_s26 + $0x150] sm:$0xf]  ;;  %v4912_v56 = vor.u32 %v5173_v22, %v4909_v20 }
 0xe22   : > { %2820 = vmatpush.bf16.msra.mxu3 %v4800_v25  ;;  %v2289_v50 = vadd.f32 1.0, %v2285_v15  ;;  %v5172_v55 = vld [vmem:[%s6102_s26 + $0x154] sm:$0xf0]  ;;  %v4976_v2 = vor.u32 %v5189_v26, %v4973_v13  ;;  %v4963_v31 = vld [vmem:[%s6102_s26 + $0x1d0] sm:$0xf]  ;;  %vm2831_vm12 = vcmask 1040384  }
 0xe23   : > { %v2290_v16 = vadd.f32 1.0, %v2286_v27  ;;  %v5188_v49 = vld [vmem:[%s6102_s26 + $0x1d4] sm:$0xf0]  ;;  %v5171_v46 = vld [vmem:[%s6102_s26 + $0x154] sm:$0xf]  ;;  %v4900_v17 = vor.u32 %v5172_v55, %v4899_v35  ;;  %vm3068_vm13 = vcmask 1046528  }
 0xe24   : > { %v2293_v53 = vmul.f32 %v2289_v50, %v2137_v45  ;;  %v4901_v25 = vld [vmem:[%s6102_s26 + $0x158] sm:$0xf0]  ;;  %v5187_v40 = vld [vmem:[%s6102_s26 + $0x1d4] sm:$0xf]  ;;  %v4964_v19 = vor.u32 %v5188_v49, %v4963_v31  ;;  %v4891_v28 = vld [vmem:[%s6102_s26 + $0x140] sm:$0xf] }
 0xe25   : > { %v2294_v63 = vmul.f32 %v2290_v16, %v2138_v48  ;;  %v4965_v24 = vld [vmem:[%s6102_s26 + $0x1d8] sm:$0xf0]  ;;  %v5170_v60 = vld [vmem:[%s6102_s26 + $0x144] sm:$0xf0]  ;;  %v4955_v10 = vld [vmem:[%s6102_s26 + $0x1c0] sm:$0xf]  ;;  %v4904_v15 = vor.u32 %v5171_v46, %v4901_v25 }
 0xe26   : > { %v6850_v12 = vpack.c.bf16 %v2293_v53, %v2291_v57  ;;  %v4968_v44 = vor.u32 %v5187_v40, %v4965_v24  ;;  %v5186_v11 = vld [vmem:[%s6102_s26 + $0x1c4] sm:$0xf0]  ;;  %v5169_v33 = vld [vmem:[%s6102_s26 + $0x144] sm:$0xf]  ;;  %v4893_v45 = vld [vmem:[%s6102_s26 + $0x148] sm:$0xf0]  ;;  %v4892_v58 = vor.u32 %v5170_v60, %v4891_v28 }
 0xe27   : > { %v6854_v29 = vpack.c.bf16 %v2294_v63, %v2292_v61  ;;  %v5185_v27 = vld [vmem:[%s6102_s26 + $0x1c4] sm:$0xf]  ;;  %v4957_v3 = vld [vmem:[%s6102_s26 + $0x1c8] sm:$0xf0]  ;;  %v808_v50 = vadd.s32 7, %v6173_v1  ;;  %v4956_v39 = vor.u32 %v5186_v11, %v4955_v10  ;;  %v4896_v51 = vor.u32 %v5169_v33, %v4893_v45 }
 0xe28   : > { %2497 = vmatmul.bf16.vlgmr.msrb.gmra.mxu0 %v6850_v12  ;;  %2525 = vmatmul.bf16.vlgmr.msrb.gmra.mxu2 %v6850_v12  ;;  %v4883_v48 = vld [vmem:[%s6102_s26 + $0x130] sm:$0xf]  ;;  %v5168_v16 = vld [vmem:[%s6102_s26 + $0x134] sm:$0xf0]  ;;  %v4960_v4 = vor.u32 %v5185_v27, %v4957_v3  ;;  %v5167_v53 = vld [vmem:[%s6102_s26 + $0x134] sm:$0xf] }
 0xe29   : > { %2511 = vmatmul.bf16.vlgmr.msra.gmra.mxu1 %v6854_v29  ;;  %2539 = vmatmul.bf16.vlgmr.msrb.gmra.mxu3 %v6854_v29  ;;  %v4947_v37 = vld [vmem:[%s6102_s26 + $0x1b0] sm:$0xf]  ;;  %v5184_v57 = vld [vmem:[%s6102_s26 + $0x1b4] sm:$0xf0]  ;;  %vm809_vm8 = vcmp.eq.s32.totalorder %v6169_v59, %v808_v50  ;;  %vm810_vm9 = vcmp.eq.s32.totalorder %v6189_v8, %v808_v50  ;;  %v4885_v1 = vld [vmem:[%s6102_s26 + $0x138] sm:$0xf0]  ;;  %v4884_v62 = vor.u32 %v5168_v16, %v4883_v48 }
 0xe2a   : > { %3008 = vmatpush.bf16.msrb.mxu0 %v4916_v0  ;;  %3022 = vmatpush.bf16.msra.mxu1 %v4980_v42  ;;  %v5183_v54 = vld [vmem:[%s6102_s26 + $0x1b4] sm:$0xf]  ;;  %v4949_v18 = vld [vmem:[%s6102_s26 + $0x1b8] sm:$0xf0]  ;;  %v4948_v61 = vor.u32 %v5184_v57, %v4947_v37  ;;  %v4875_v63 = vld [vmem:[%s6102_s26 + $0x120] sm:$0xf]  ;;  %v4888_v8 = vor.u32 %v5167_v53, %v4885_v1 }
 0xe2b   : > { %3036 = vmatpush.bf16.msrb.mxu2 %v4920_v47  ;;  %3050 = vmatpush.bf16.msrb.mxu3 %v4984_v23  ;;  %v5166_v0 = vld [vmem:[%s6102_s26 + $0x124] sm:$0xf0]  ;;  %v4347_v42 = vsel %vm809_vm8, 1.0, %v5773_v5  ;;  %v4348_v59 = vsel %vm810_vm9, 1.0, %v5773_v5  ;;  %v4952_v32 = vor.u32 %v5183_v54, %v4949_v18  ;;  %v4939_v14 = vld [vmem:[%s6102_s26 + $0x1a0] sm:$0xf] }
 0xe2c   : > { %v5182_v47 = vld [vmem:[%s6102_s26 + $0x1a4] sm:$0xf0]  ;;  %v5165_v23 = vld [vmem:[%s6102_s26 + $0x124] sm:$0xf]  ;;  %v4877_v38 = vld [vmem:[%s6102_s26 + $0x128] sm:$0xf0]  ;;  %v4876_v26 = vor.u32 %v5166_v0, %v4875_v63 }
 0xe2d   : > { %v5181_v30 = vld [vmem:[%s6102_s26 + $0x1a4] sm:$0xf]  ;;  %v4941_v22 = vld [vmem:[%s6102_s26 + $0x1a8] sm:$0xf0]  ;;  %v815_v5 = vsel %vm756_vm14, %v4347_v42, -inf  ;;  %v818_v20 = vsel %vm756_vm14, %v4348_v59, -inf  ;;  %v4940_v13 = vor.u32 %v5182_v47, %v4939_v14  ;;  %v4880_v35 = vor.u32 %v5165_v23, %v4877_v38 }
 0xe2e   : > { %3009 = vmatpush.bf16.msrb.mxu0 %v4908_v21  ;;  %3023 = vmatpush.bf16.msra.mxu1 %v4972_v34  ;;  %v4867_v21 = vld [vmem:[%s6102_s26 + $0x110] sm:$0xf]  ;;  %v5164_v34 = vld [vmem:[%s6102_s26 + $0x114] sm:$0xf0]  ;;  %v4944_v55 = vor.u32 %v5181_v30, %v4941_v22  ;;  %v5163_v31 = vld [vmem:[%s6102_s26 + $0x114] sm:$0xf] }
 0xe2f   : > { %3037 = vmatpush.bf16.msrb.mxu2 %v4912_v56  ;;  %3051 = vmatpush.bf16.msrb.mxu3 %v4976_v2  ;;  %v4931_v56 = vld [vmem:[%s6102_s26 + $0x190] sm:$0xf]  ;;  %v5180_v2 = vld [vmem:[%s6102_s26 + $0x194] sm:$0xf0]  ;;  %v4869_v49 = vld [vmem:[%s6102_s26 + $0x118] sm:$0xf0]  ;;  %v4868_v40 = vor.u32 %v5164_v34, %v4867_v21 }
 0xe30   : > { %v5179_v46 = vld [vmem:[%s6102_s26 + $0x194] sm:$0xf]  ;;  %v4933_v25 = vld [vmem:[%s6102_s26 + $0x198] sm:$0xf0]  ;;  %816 = vmax.xlane.f32.xlu0 %v815_v5  ;;  %819 = vmax.xlane.f32.xlu2 %v818_v20  ;;  %v4932_v24 = vor.u32 %v5180_v2, %v4931_v56  ;;  %v4872_v28 = vor.u32 %v5163_v31, %v4869_v49  ;;  %v4923_v10 = vld [vmem:[%s6102_s26 + $0x180] sm:$0xf] }
 0xe31   : > { %v4936_v60 = vor.u32 %v5179_v46, %v4933_v25  ;;  %v4861_v11 = vld [vmem:[%s6102_s26 + $0x108] sm:$0xf0]  ;;  %v5177_v33 = vld [vmem:[%s6102_s26 + $0x184] sm:$0xf]  ;;  %v6936_v2 = vld [vmem:[%s7255_s16 + $0x10] sm:$0x3] }
 0xe32   : > { %3010 = vmatpush.bf16.msrb.mxu0 %v4900_v17  ;;  %3024 = vmatpush.bf16.msra.mxu1 %v4964_v19  ;;  %v4859_v17 = vld [vmem:[%s6102_s26 + $0x100] sm:$0xf]  ;;  %v5162_v19 = vld [vmem:[%s6102_s26 + $0x104] sm:$0xf0]  ;;  %v4925_v45 = vld [vmem:[%s6102_s26 + $0x188] sm:$0xf0] }
 0xe33   : > { %3038 = vmatpush.bf16.msrb.mxu2 %v4904_v15  ;;  %3052 = vmatpush.bf16.msrb.mxu3 %v4968_v44  ;;  %v5178_v15 = vld [vmem:[%s6102_s26 + $0x184] sm:$0xf0]  ;;  %v5161_v44 = vld [vmem:[%s6102_s26 + $0x104] sm:$0xf]  ;;  %v4860_v27 = vor.u32 %v5162_v19, %v4859_v17 }
 0xe34   : > { %v4924_v3 = vor.u32 %v5178_v15, %v4923_v10  ;;  %v4864_v50 = vor.u32 %v5161_v44, %v4861_v11  ;;  %v6941_v31 = vld [vmem:[%s7255_s16 + $0x18] sm:$0x3] }
 0xe36   : > { %3011 = vmatpush.bf16.msrb.mxu0 %v4892_v58  ;;  %3025 = vmatpush.bf16.msra.mxu1 %v4956_v39  ;;  %v4928_v58 = vor.u32 %v5177_v33, %v4925_v45 }
 0xe37   : > { %3039 = vmatpush.bf16.msrb.mxu2 %v4896_v51  ;;  %3053 = vmatpush.bf16.msrb.mxu3 %v4960_v4 }
 0xe38   : > { %2779 = vmatmul.bf16.vlgmr.msra.gmra.mxu0 %v6850_v12  ;;  %2807 = vmatmul.bf16.vlgmr.msra.gmra.mxu2 %v6850_v12 }
 0xe39   : > { %2793 = vmatmul.bf16.vlgmr.msrb.gmra.mxu1 %v6854_v29  ;;  %2821 = vmatmul.bf16.vlgmr.msra.gmra.mxu3 %v6854_v29 }
 0xe3a   : > { %3012 = vmatpush.bf16.msrb.mxu0 %v4884_v62  ;;  %3026 = vmatpush.bf16.msra.mxu1 %v4948_v61 }
 0xe3b   : > { %3040 = vmatpush.bf16.msrb.mxu2 %v4888_v8  ;;  %3054 = vmatpush.bf16.msrb.mxu3 %v4952_v32 }
 0xe3e   : > { %3013 = vmatpush.bf16.msrb.mxu0 %v4876_v26  ;;  %3027 = vmatpush.bf16.msra.mxu1 %v4940_v13 }
 0xe3f   : > { %3041 = vmatpush.bf16.msrb.mxu2 %v4880_v35  ;;  %3055 = vmatpush.bf16.msrb.mxu3 %v4944_v55 }
 0xe42   : > { %3014 = vmatpush.bf16.msrb.mxu0 %v4868_v40  ;;  %3028 = vmatpush.bf16.msra.mxu1 %v4932_v24  ;;  %v6949_v40 = vld [vmem:[%s7255_s16] sm:$0xff]  ;;  %v6954_v24 = vld [vmem:[%s7255_s16 + $0x8] sm:$0xff] }
 0xe43   : > { %3042 = vmatpush.bf16.msrb.mxu2 %v4872_v28  ;;  %3056 = vmatpush.bf16.msrb.mxu3 %v4936_v60 }
 0xe46   : > { %3015 = vmatpush.bf16.msrb.mxu0 %v4860_v27  ;;  %3029 = vmatpush.bf16.msra.mxu1 %v4924_v3 }
 0xe47   : > { %3043 = vmatpush.bf16.msrb.mxu2 %v4864_v50  ;;  %3057 = vmatpush.bf16.msrb.mxu3 %v4928_v58 }
 0xe49   : > { %3016 = vmatmul.bf16.vlgmr.msrb.gmra.mxu0 %v6850_v12  ;;  %3030 = vmatmul.bf16.vlgmr.msra.gmra.mxu1 %v6854_v29 }
 0xe4a   : > { %3044 = vmatmul.bf16.vlgmr.msrb.gmra.mxu2 %v6850_v12  ;;  %3058 = vmatmul.bf16.vlgmr.msrb.gmra.mxu3 %v6854_v29 }
 0xe4b   : > { %3197 = vmatpush.xpose.msra.mxu2 %v6936_v2  ;;  %3217 = vmatpush.xpose.msra.mxu3 %v6941_v31 }
 0xe4f   : > { %3198 = vmatpush.xpose.msra.mxu2 %v6949_v40  ;;  %3218 = vmatpush.xpose.msra.mxu3 %v6954_v24 }
 0xe53   : > { %4989 = vmatpush.msk.msrb.mxu2 %vm763_vm10, %v6936_v2  ;;  %4991 = vmatpush.msk.msrb.mxu3 %vm763_vm10, %v6941_v31 }
 0xe55   : > { %3291 = vmatpush.msrb.mxu2 %v6949_v40  ;;  %3311 = vmatpush.msrb.mxu3 %v6954_v24 }
 0xe8d   : > { %v802_v59 = vpop.xlane.xlu1 %801 }
 0xe8e   : > { %v806_v32 = vsub.f32 1.0, %v802_v59 }
 0xe91   : > { %v6929_v12 = vpop.xlane.xlu0 %804 }
 0xe92   : > { %v807_v21 = vsub.f32 1.0, %v6929_v12 }
 0xea3   : > { %v817_v55 = vpop.xlane.xlu0 %816  ;;  %v820_v56 = vpop.xlane.xlu2 %819 }
 0xea4   : > { %v821_v19 = vsub.f32 1.0, %v817_v55  ;;  %v822_v28 = vsub.f32 1.0, %v820_v56 }
 0xea5   : > { %v2498_v39 = vpop.f32.mrf.mxu0 }
 0xea6   : > { %v2512_v51 = vpop.f32.mrf.mxu1 }
 0xea7   : > { %v2513_v61 = vadd.f32 %v2512_v51, %v2498_v39 }
 0xea9   : > { %v2832_v42 = vrot.slane %v2513_v61, 7 }
 0xeab   : > { %v2526_v48 = vpop.f32.mrf.mxu2  ;;  %v2842_v23 = vsel %vm2831_vm12, 0.0, %v2832_v42 }
 0xeac   : > { %v2540_v16 = vpop.f32.mrf.mxu3  ;;  %v2844_v26 = vmul.f32 %v2842_v23, %v806_v32 }
 0xead   : > { %v2500_v4 = vpop.f32.mrf.mxu0  ;;  %v2541_v14 = vadd.f32 %v2540_v16, %v2526_v48 }
 0xeae   : > { %v2514_v37 = vpop.f32.mrf.mxu1 }
 0xeaf   : > { %v2515_v29 = vadd.f32 %v2514_v37, %v2500_v4  ;;  %v2833_v13 = vrot.slane %v2541_v14, 7 }
 0xeb1   : > { %v2834_v30 = vrot.slane %v2515_v29, 7  ;;  %v2843_v17 = vsel %vm2831_vm12, 0.0, %v2833_v13 }
 0xeb2   : > { %v2845_v51 = vmul.f32 %v2843_v17, %v806_v32 }
 0xeb3   : > { %v2528_v57 = vpop.f32.mrf.mxu2  ;;  %v2835_v46 = vsel %vm2831_vm12, %v2832_v42, %v2834_v30 }
 0xeb4   : > { %v2542_v53 = vpop.f32.mrf.mxu3  ;;  %v2846_v33 = vmul.f32 %v2835_v46, %v807_v21 }
 0xeb5   : > { %v2780_v1 = vpop.f32.mrf.mxu0  ;;  %v2543_v34 = vadd.f32 %v2542_v53, %v2528_v57 }
 0xeb6   : > { %v2794_v54 = vpop.f32.mrf.mxu1 }
 0xeb7   : > { %v2795_v20 = vadd.f32 %v2794_v54, %v2780_v1  ;;  %v2836_v60 = vrot.slane %v2543_v34, 7  ;;  %v6969_v54 = vld [vmem:[%s6124_s3] sm:$0x3f] }
 0xeb9   : > { %v3069_v25 = vrot.slane %v2795_v20, 1  ;;  %v2837_v57 = vsel %vm2831_vm12, %v2833_v13, %v2836_v60  ;;  %v6983_v20 = vld [vmem:[%s6124_s3 + $0x8] sm:$0x3f] }
 0xebb   : > { %v2808_v18 = vpop.f32.mrf.mxu2 }
 0xebc   : > { %v2822_v62 = vpop.f32.mrf.mxu3 }
 0xebd   : > { %v2782_v63 = vpop.f32.mrf.mxu0  ;;  %v2823_v50 = vadd.f32 %v2822_v62, %v2808_v18  ;;  %v3089_v18 = vperm.slane %v6969_v54, 3 }
 0xebe   : > { %v2796_v0 = vpop.f32.mrf.mxu1 }
 0xebf   : > { %v2797_v38 = vadd.f32 %v2796_v0, %v2782_v63  ;;  %v3072_v62 = vrot.slane %v2823_v50, 1  ;;  %v2847_v63 = vmul.f32 %v2837_v57, %v807_v21 }
 0xec1   : > { %v3070_v35 = vrot.slane %v2797_v38, 1 }
 0xec3   : > { %v2810_v8 = vpop.f32.mrf.mxu2  ;;  %v3071_v10 = vsel %vm3068_vm13, %v3069_v25, %v3070_v35  ;;  %v3079_v45 = vsel %vm3068_vm13, %v3070_v35, 0.0 }
 0xec4   : > { %v2824_v47 = vpop.f32.mrf.mxu3  ;;  %v3081_v39 = vmul.f32 %v3071_v10, %v821_v19  ;;  %v3083_v16 = vmul.f32 %v3079_v45, %v822_v28 }
 0xec5   : > { %v2825_v15 = vadd.f32 %v2824_v47, %v2810_v8 }
 0xec6   : > { %v3017_v22 = vpop.f32.mrf.mxu0  ;;  %v3031_v5 = vpop.f32.mrf.mxu1 }
 0xec7   : > { %v3018_v49 = vadd.f32 %v3017_v22, %v2844_v26  ;;  %v3073_v4 = vrot.slane %v2825_v15, 1  ;;  %v3090_v26 = vperm.slane %v6983_v20, 3 }
 0xec9   : > { %v3032_v27 = vadd.f32 %v3031_v5, %v3018_v49  ;;  %v3080_v0 = vsel %vm3068_vm13, %v3073_v4, 0.0  ;;  %v3074_v42 = vsel %vm3068_vm13, %v3072_v62, %v3073_v4 }
 0xeca   : > { %v3084_v23 = vmul.f32 %v3080_v0, %v822_v28  ;;  %v3082_v38 = vmul.f32 %v3074_v42, %v821_v19 }
 0xecb   : > { %v3085_v53 = vadd.f32 %v3081_v39, %v3032_v27 }
 0xecd   : > { %v3045_v44 = vpop.f32.mrf.mxu2  ;;  %v3059_v11 = vpop.f32.mrf.mxu3  ;;  %v6976_v32 = vadd.f32 %v3089_v18, %v3085_v53 }
 0xece   : > { %v3019_v3 = vpop.f32.mrf.mxu0  ;;  %v3033_v48 = vpop.f32.mrf.mxu1  ;;  %v3046_v1 = vadd.f32 %v3045_v44, %v2845_v51 }
 0xecf   : > { %v3020_v58 = vadd.f32 %v3019_v3, %v2846_v33  ;;  %v3139_v13 = vmul.f32 %v6976_v32, %v6976_v32 }
 0xed0   : > { %v3060_v29 = vadd.f32 %v3059_v11, %v3046_v1 }
 0xed1   : > { %v3034_v37 = vadd.f32 %v3033_v48, %v3020_v58 }
 0xed2   : > { %v3086_v22 = vadd.f32 %v3082_v38, %v3060_v29 }
 0xed3   : > { %v3087_v61 = vadd.f32 %v3083_v16, %v3034_v37 }
 0xed4   : > { %v6994_v34 = vadd.f32 %v3090_v26, %v3086_v22 }
 0xed5   : > { %v6974_v59 = vadd.f32 %v3089_v18, %v3087_v61  ;;  %v3047_v12 = vpop.f32.mrf.mxu2  ;;  %v3061_v14 = vpop.f32.mrf.mxu3 }
 0xed6   : > { %v3048_v8 = vadd.f32 %v3047_v12, %v2847_v63  ;;  %v3140_v55 = vmul.f32 %v6994_v34, %v6994_v34 }
 0xed7   : > { %3113 = vmatpush.msra.mxu0 %v6974_v59  ;;  %v3141_v47 = vmul.f32 %v6974_v59, %v6974_v59 }
 0xed8   : > { %v3062_v30 = vadd.f32 %v3061_v14, %v3048_v8 }
 0xed9   : > { %3114 = vmatpush.msra.mxu0 %v6976_v32 }
 0xeda   : > { %v3088_v5 = vadd.f32 %v3084_v23, %v3062_v30  ;;  %4985 = vmatmul.msk.f32.vlgmr.msra.gmra.mxu0 %vm952_vm2, %v6179_v6  ;;  %v3511_v23 = vperm.slane %v6969_v54, 4 }
 0xedb   : > { %3157 = vmatpush.msrb.mxu0 %v3141_v47 }
 0xedc   : > { %v6990_v21 = vadd.f32 %v3090_v26, %v3088_v5  ;;  %v3512_v26 = vperm.slane %v6983_v20, 4 }
 0xedd   : > { %3158 = vmatpush.msrb.mxu0 %v3139_v13 }
 0xede   : > { %3133 = vmatpush.msrb.mxu1 %v6990_v21  ;;  %v3142_v35 = vmul.f32 %v6990_v21, %v6990_v21 }
 0xedf   : > { %3237 = vmatpush.xpose.msra.mxu0 %v6936_v2 }
 0xee0   : > { %3134 = vmatpush.msrb.mxu1 %v6994_v34 }
 0xee1   : > { %4986 = vmatmul.msk.f32.vlgmr.msrb.gmra.mxu1 %vm952_vm2, %v6179_v6 }
 0xee2   : > { %3177 = vmatpush.msra.mxu1 %v3142_v35  ;;  %4987 = vmatmul.msk.f32.vlgmr.msrb.gmra.mxu0 %vm952_vm2, %v6179_v6  ;;  %v3517_v35 = vperm.slane %v6969_v54, 5 }
 0xee3   : > { %3238 = vmatpush.xpose.msra.mxu0 %v6949_v40 }
 0xee4   : > { %3178 = vmatpush.msra.mxu1 %v3140_v55 }
 0xee6   : > { %3257 = vmatpush.xpose.msrb.mxu1 %v6941_v31 }
 0xee9   : > { %4988 = vmatmul.msk.f32.vlgmr.msra.gmra.mxu1 %vm952_vm2, %v6179_v6 }
 0xeea   : > { %3258 = vmatpush.xpose.msrb.mxu1 %v6954_v24 }
 0xf57   : > { %v3116_v56 = vpop.f32.mrf.mxu0 }
 0xf58   : > { %3199 = vmatmul.f32.vlgmr.msra.gmra.mxu2 %v3116_v56 }
 0xf59   : > { %4999 = vmatpush.msk.msra.mxu2 %vm763_vm10, %v6936_v2 }
 0xf5b   : > { %3386 = vmatpush.msra.mxu2 %v6949_v40 }
 0xf5e   : > { %v3136_v49 = vpop.f32.mrf.mxu1 }
 0xf5f   : > { %3219 = vmatmul.f32.vlgmr.msra.gmra.mxu3 %v3136_v49  ;;  %v3160_v46 = vpop.f32.mrf.mxu0  ;;  %v5232_v49 = vld [vmem:[%s6108_s24 + $0x38] sm:$0xff] }
 0xf60   : > { %5001 = vmatpush.msk.msra.mxu3 %vm763_vm10, %v6941_v31  ;;  %3239 = vmatmul.f32.vlgmr.msra.gmra.mxu0 %v3160_v46  ;;  %v5240_v46 = vld [vmem:[%s6108_s24 + $0x78] sm:$0xff] }
 0xf62   : > { %3406 = vmatpush.msra.mxu3 %v6954_v24 }
 0xf66   : > { %v3180_v25 = vpop.f32.mrf.mxu1 }
 0xf67   : > { %3259 = vmatmul.f32.vlgmr.msrb.gmra.mxu1 %v3180_v25 }
 0xfdb   : > { %v3200_v17 = vpop.f32.mrf.mxu2 }
 0xfdd   : > { %v3240_v28 = vpop.f32.mrf.mxu0 }
 0xfe2   : > { %v3220_v19 = vpop.f32.mrf.mxu3 }
 0xfe3   : > { %v3221_v60 = vadd.f32 %v3220_v19, %v3200_v17  ;;  %v3518_v17 = vperm.slane %v6983_v20, 5 }
 0xfe4   : > { %v3260_v10 = vpop.f32.mrf.mxu1 }
 0xfe5   : > { %v3263_v2 = vmul.f32 %v3221_v60, %v6376_v43  ;;  %v3261_v15 = vadd.f32 %v3260_v10, %v3240_v28  ;;  %v5231_v60 = vld [vmem:[%s6108_s24 + $0x30] sm:$0xff] }
 0xfe6   : > { %v5239_v10 = vld [vmem:[%s6108_s24 + $0x70] sm:$0xff] }
 0xfe7   : > { %4990 = vmatmul.msk.f32.vlgmr.msrb.gmra.mxu2 %vm1878_vm11, %v3263_v2  ;;  %4992 = vmatmul.msk.f32.vlgmr.msrb.gmra.mxu3 %vm1878_vm11, %v3263_v2  ;;  %v3264_v40 = vmul.f32 %v3261_v15, %v6376_v43  ;;  %v3265_v31 = vmul.f32 %v3263_v2, %v3263_v2 }
 0xfe9   : > { %v3266_v44 = vsub.f32 %v3264_v40, %v3265_v31 }
 0xfef   : > { %5000 = vmatmul.msk.f32.vlgmr.msra.gmra.mxu2 %vm1878_vm11, %v3266_v44  ;;  %5002 = vmatmul.msk.f32.vlgmr.msra.gmra.mxu3 %vm1878_vm11, %v3266_v44 }
0x106a   : > { %v3293_v24 = vpop.f32.mrf.mxu2  ;;  %v3313_v11 = vpop.f32.mrf.mxu3 }
0x106b   : > { %4993 = vmatpush.msk.msrb.mxu0 %vm763_vm10, %v3293_v24  ;;  %4996 = vmatpush.msk.msra.mxu1 %vm763_vm10, %v3313_v11 }
0x106c   : > { %4994 = vmatmul.msk.f32.vlgmr.msrb.gmra.mxu0 %vm756_vm14, %v6184_v7  ;;  %4997 = vmatmul.msk.f32.vlgmr.msra.gmra.mxu1 %vm756_vm14, %v6184_v7 }
0x106d   : > { %3814 = vmatpush.bf16.msra.mxu0 %v5232_v49  ;;  %3828 = vmatpush.bf16.msrb.mxu1 %v5240_v46  ;;  %v5234_v49 = vld [vmem:[%s6108_s24 + $0x48] sm:$0xff] }
0x1071   : > { %3815 = vmatpush.bf16.msra.mxu0 %v5231_v60  ;;  %3829 = vmatpush.bf16.msrb.mxu1 %v5239_v10  ;;  %v5225_v10 = vld [vmem:[%s6108_s24] sm:$0xff] }
0x1072   : > { %v3388_v33 = vpop.f32.mrf.mxu2  ;;  %v3408_v43 = vpop.f32.mrf.mxu3 }
0x1073   : > { %5003 = vmatpush.msk.msrb.mxu2 %vm763_vm10, %v3388_v33  ;;  %5006 = vmatpush.msk.msrb.mxu3 %vm763_vm10, %v3408_v43 }
0x1074   : > { %4995 = vmatmul.msk.f32.gmra.mxu0 %vm756_vm14, %v6195_v9  ;;  %4998 = vmatmul.msk.f32.gmra.mxu1 %vm756_vm14, %v6195_v9 }
0x1075   : > { %5004 = vmatmul.msk.f32.vlgmr.msrb.gmra.mxu2 %vm756_vm14, %v6184_v7  ;;  %5007 = vmatmul.msk.f32.vlgmr.msrb.gmra.mxu3 %vm756_vm14, %v6184_v7 }
0x107d   : > { %5005 = vmatmul.msk.f32.gmra.mxu2 %vm756_vm14, %v6195_v9  ;;  %5008 = vmatmul.msk.f32.gmra.mxu3 %vm756_vm14, %v6195_v9 }
0x10e9   : > { %v3339_v18 = vpop.f32.mrf.mxu0  ;;  %v3362_v61 = vpop.f32.mrf.mxu1 }
0x10ea   : > { %v3411_v8 = vsub.f32 %v6976_v32, %v3339_v18  ;;  %v3412_v22 = vsub.f32 %v6994_v34, %v3362_v61 }
0x10f1   : > { %v3342_v2 = vpop.f32.mrf.mxu0  ;;  %v3365_v54 = vpop.f32.mrf.mxu1 }
0x10f2   : > { %v3413_v11 = vsub.f32 %v6974_v59, %v3342_v2  ;;  %v5233_v2 = vld [vmem:[%s6108_s24 + $0x40] sm:$0xff] }
0x10f8   : > { %v3438_v45 = vpop.f32.mrf.mxu2  ;;  %v3461_v27 = vpop.f32.mrf.mxu3 }
0x10f9   : > { %v3439_v3 = vadd.f32 1e-05, %v3438_v45  ;;  %v3462_v50 = vadd.f32 1e-05, %v3461_v27  ;;  %v5230_v45 = vld [vmem:[%s6108_s24 + $0x28] sm:$0xff] }
0x10fa   : > { %v5238_v27 = vld [vmem:[%s6108_s24 + $0x68] sm:$0xff]  ;;  %3816 = vmatpush.bf16.msra.mxu0 %v5230_v45 }
0x10fb   : > { %5410 = vrsqrt.f32 %v3439_v3  ;;  %vm3473_vm1 = vweird.f32 %v3439_v3  ;;  %vm3483_vm4 = vweird.f32 %v3462_v50  ;;  %3830 = vmatpush.bf16.msrb.mxu1 %v5238_v27 }
0x10fc   : > { %5412 = vrsqrt.f32 %v3462_v50 }
0x1100   : > { %v3441_v58 = vpop.f32.mrf.mxu2  ;;  %v3464_v39 = vpop.f32.mrf.mxu3 }
0x1101   : > { %v5411_v51 = vpop.eup %5410  ;;  %v3442_v48 = vadd.f32 1e-05, %v3441_v58  ;;  %v7042_v16 = vadd.f32 1e-05, %v3464_v39 }
0x1102   : > { %v5413_v4 = vpop.eup %5412  ;;  %v3468_v37 = vmul.f32 %v5411_v51, %v3439_v3  ;;  %vm3474_vm15 = vweird.f32 %v5411_v51  ;;  %v3414_v3 = vsub.f32 %v6990_v21, %v3365_v54  ;;  %v5229_v21 = vld [vmem:[%s6108_s24 + $0x20] sm:$0xff] }
0x1103   : > { %v3478_v57 = vmul.f32 %v5413_v4, %v3462_v50  ;;  %5414 = vrsqrt.f32 %v3442_v48  ;;  %vm3484_vm0 = vweird.f32 %v5413_v4  ;;  %vm3475_vm3 = vmor %vm3473_vm1, %vm3474_vm15  ;;  %vm3493_vm8 = vweird.f32 %v3442_v48  ;;  %3817 = vmatpush.bf16.msra.mxu0 %v5229_v21 }
0x1104   : > { %v3469_v53 = vmul.f32 %v5411_v51, %v3468_v37  ;;  %5416 = vrsqrt.f32 %v7042_v16  ;;  %vm3485_vm5 = vmor %vm3483_vm4, %vm3484_vm0  ;;  %vm3503_vm12 = vweird.f32 %v7042_v16 }
0x1105   : > { %v3479_v1 = vmul.f32 %v5413_v4, %v3478_v57  ;;  %v5237_v57 = vld [vmem:[%s6108_s24 + $0x60] sm:$0xff] }
0x1106   : > { %v3470_v62 = vmul.f32 0.5, %v3469_v53  ;;  %3831 = vmatpush.bf16.msrb.mxu1 %v5237_v57 }
0x1107   : > { %v3480_v63 = vmul.f32 0.5, %v3479_v1 }
0x1108   : > { %v3471_v0 = vsub.f32 1.5, %v3470_v62 }
0x1109   : > { %v5415_v42 = vpop.eup %5414  ;;  %v3481_v12 = vsub.f32 1.5, %v3480_v63 }
0x110a   : > { %v5417_v29 = vpop.eup %5416  ;;  %v3472_v14 = vmul.f32 %v5411_v51, %v3471_v0  ;;  %v3488_v47 = vmul.f32 %v5415_v42, %v3442_v48  ;;  %vm3494_vm6 = vweird.f32 %v5415_v42 }
0x110b   : > { %v3482_v38 = vmul.f32 %v5413_v4, %v3481_v12  ;;  %v3498_v30 = vmul.f32 %v5417_v29, %v7042_v16  ;;  %vm3504_vm7 = vweird.f32 %v5417_v29  ;;  %vm3495_vm9 = vmor %vm3493_vm8, %vm3494_vm6  ;;  %v5236_v12 = vld [vmem:[%s6108_s24 + $0x58] sm:$0xff] }
0x110c   : > { %v3476_v5 = vsel %vm3475_vm3, %v5411_v51, %v3472_v14  ;;  %v3489_v32 = vmul.f32 %v5415_v42, %v3488_v47  ;;  %vm3505_vm13 = vmor %vm3503_vm12, %vm3504_vm7  ;;  %3832 = vmatpush.bf16.msrb.mxu1 %v5236_v12 }
0x110d   : > { %v3507_v13 = vmul.f32 %v3476_v5, %v3411_v8  ;;  %v3486_v55 = vsel %vm3485_vm5, %v5413_v4, %v3482_v38  ;;  %v3499_v56 = vmul.f32 %v5417_v29, %v3498_v30  ;;  %v5235_v38 = vld [vmem:[%s6108_s24 + $0x50] sm:$0xff] }
0x110e   : > { %v3508_v25 = vmul.f32 %v3486_v55, %v3412_v22  ;;  %v3490_v19 = vmul.f32 0.5, %v3489_v32 }
0x110f   : > { %v3513_v28 = vmul.f32 %v3511_v23, %v3507_v13  ;;  %v3500_v34 = vmul.f32 0.5, %v3499_v56  ;;  %v5226_v56 = vld [vmem:[%s6108_s24 + $0x8] sm:$0xff] }
0x1110   : > { %v3514_v15 = vmul.f32 %v3512_v26, %v3508_v25  ;;  %v3491_v40 = vsub.f32 1.5, %v3490_v19  ;;  %3833 = vmatpush.bf16.msrb.mxu1 %v5235_v38 }
0x1111   : > { %v7056_v31 = vadd.f32 %v3517_v35, %v3513_v28  ;;  %v3501_v44 = vsub.f32 1.5, %v3500_v34 }
0x1112   : > { %v7058_v24 = vadd.f32 %v3518_v17, %v3514_v15  ;;  %v3492_v20 = vmul.f32 %v5415_v42, %v3491_v40 }
0x1113   : > { %v7062_v33 = vmul.f32 0.70710677, %v7056_v31  ;;  %v3502_v43 = vmul.f32 %v5417_v29, %v3501_v44 }
0x1114   : > { %v7069_v50 = vmul.f32 0.70710677, %v7058_v24  ;;  %v3496_v58 = vsel %vm3495_vm9, %v5415_v42, %v3492_v20  ;;  %v5228_v42 = vld [vmem:[%s6108_s24 + $0x18] sm:$0xff]  ;;  %3834 = vmatpush.bf16.msrb.mxu1 %v5234_v49 }
0x1115   : > { %v3539_v59 = vand.u32 2147483647, %v7062_v33  ;;  %v3509_v39 = vmul.f32 %v3496_v58, %v3413_v11  ;;  %v3506_v51 = vsel %vm3505_vm13, %v5417_v29, %v3502_v43  ;;  %3818 = vmatpush.bf16.msra.mxu0 %v5228_v42 }
0x1116   : > { %v3540_v48 = vand.u32 2147483647, %v7069_v50  ;;  %v3510_v16 = vmul.f32 %v3506_v51, %v3414_v3 }
0x1117   : > { %v3543_v4 = vmul.f32 0.3275911, %v3539_v59  ;;  %v3515_v37 = vmul.f32 %v3511_v23, %v3509_v39  ;;  %v5227_v23 = vld [vmem:[%s6108_s24 + $0x10] sm:$0xff]  ;;  %v3647_v5 = vsub.f32 0.0, %v3539_v59 }
0x1118   : > { %v3544_v53 = vmul.f32 0.3275911, %v3540_v48  ;;  %v3516_v1 = vmul.f32 %v3512_v26, %v3510_v16  ;;  %v3648_v25 = vsub.f32 0.0, %v3540_v48  ;;  %3835 = vmatpush.bf16.msrb.mxu1 %v5233_v2 }
0x1119   : > { %v3547_v18 = vadd.f32 1.0, %v3543_v4  ;;  %v7076_v62 = vadd.f32 %v3517_v35, %v3515_v37  ;;  %3819 = vmatpush.bf16.msra.mxu0 %v5227_v23 }
0x111a   : > { %v7078_v61 = vadd.f32 1.0, %v3544_v53  ;;  %v7080_v63 = vadd.f32 %v3518_v17, %v3516_v1  ;;  %v3651_v17 = vmul.f32 %v3647_v5, %v3539_v59  ;;  %v3652_v44 = vmul.f32 %v3648_v25, %v3540_v48 }
0x111b   : > { %5418 = vrcp.f32 %v3547_v18  ;;  %v7083_v0 = vmul.f32 0.70710677, %v7076_v62  ;;  %v3562_v28 = vand.u32 2147483648, %v3547_v18  ;;  %v3560_v60 = vand.u32 2147483647, %v3547_v18 }
0x111c   : > { %5420 = vrcp.f32 %v7078_v61  ;;  %v7089_v29 = vmul.f32 0.70710677, %v7080_v63  ;;  %v3575_v40 = vand.u32 2147483647, %v7078_v61  ;;  %v3577_v54 = vand.u32 2147483648, %v7078_v61 }
0x111d   : > { %v7092_v8 = vand.u32 2147483647, %v7083_v0  ;;  %3820 = vmatpush.bf16.msra.mxu0 %v5226_v56  ;;  %vm3556_vm1 = vweird.f32 %v3547_v18  ;;  %v3655_v43 = vmul.f32 1.442695, %v3651_v17  ;;  %v3563_v45 = vor.u32 1.1754944e-38, %v3562_v28 }
0x111e   : > { %v7095_v14 = vand.u32 2147483647, %v7089_v29  ;;  %vm3571_vm4 = vweird.f32 %v7078_v61  ;;  %vm3561_vm5 = vcmp.eq.f32.partialorder %v3560_v60, 8.507059e+37  ;;  %v3578_v39 = vor.u32 1.1754944e-38, %v3577_v54 }
0x111f   : > { %v3545_v47 = vmul.f32 0.3275911, %v7092_v8  ;;  %vm3576_vm7 = vcmp.eq.f32.partialorder %v3575_v40, 8.507059e+37  ;;  %v3657_v4 = vmul.f32 1.442695, %v3652_v44 }
0x1120   : > { %v3546_v30 = vmul.f32 0.3275911, %v7095_v14 }
0x1121   : > { %v5419_v22 = vpop.eup %5418  ;;  %v7101_v26 = vadd.f32 1.0, %v3545_v47  ;;  %3821 = vmatpush.bf16.msra.mxu0 %v5225_v10 }
0x1122   : > { %v5421_v32 = vpop.eup %5420  ;;  %v3552_v13 = vmul.f32 %v5419_v22, %v3547_v18  ;;  %v7103_v35 = vadd.f32 1.0, %v3546_v30  ;;  %vm3557_vm15 = vweird.f32 %v5419_v22 }
0x1123   : > { %v3567_v55 = vmul.f32 %v5421_v32, %v7078_v61  ;;  %5422 = vrcp.f32 %v7101_v26  ;;  %vm3572_vm0 = vweird.f32 %v5421_v32  ;;  %vm3558_vm3 = vmor %vm3556_vm1, %vm3557_vm15  ;;  %v3590_v1 = vand.u32 2147483647, %v7101_v26 }
0x1124   : > { %v3553_v46 = vsub.f32 1.0, %v3552_v13  ;;  %5424 = vrcp.f32 %v7103_v35  ;;  %vm3573_vm6 = vmor %vm3571_vm4, %vm3572_vm0  ;;  %v3592_v18 = vand.u32 2147483648, %v7101_v26  ;;  %v3607_v47 = vand.u32 2147483648, %v7103_v35 }
0x1125   : > { %v3568_v19 = vsub.f32 1.0, %v3567_v55  ;;  %v3605_v38 = vand.u32 2147483647, %v7103_v35  ;;  %vm3586_vm12 = vweird.f32 %v7101_v26  ;;  %vm3601_vm15 = vweird.f32 %v7103_v35 }
0x1126   : > { %v3554_v34 = vmul.f32 %v5419_v22, %v3553_v46  ;;  %v3593_v13 = vor.u32 1.1754944e-38, %v3592_v18  ;;  %vm3591_vm0 = vcmp.eq.f32.partialorder %v3590_v1, 8.507059e+37  ;;  %v3608_v25 = vor.u32 1.1754944e-38, %v3607_v47 }
0x1127   : > { %v3569_v15 = vmul.f32 %v5421_v32, %v3568_v19  ;;  %5426 = vpow2.f32 %v3655_v43  ;;  %vm3531_vm4 = vcmp.ge.f32.partialorder %v7062_v33, 0.0 }
0x1128   : > { %v3555_v20 = vadd.f32 %v5419_v22, %v3554_v34  ;;  %v3650_v34 = vsub.f32 0.0, %v7095_v14  ;;  %5428 = vpow2.f32 %v3657_v4 }
0x1129   : > { %v5423_v11 = vpop.eup %5422  ;;  %v3570_v27 = vadd.f32 %v5421_v32, %v3569_v15 }
0x112a   : > { %v5425_v3 = vpop.eup %5424  ;;  %v3582_v58 = vmul.f32 %v5423_v11, %v7101_v26  ;;  %v3559_v59 = vsel %vm3558_vm3, %v5419_v22, %v3555_v20  ;;  %vm3587_vm8 = vweird.f32 %v5423_v11  ;;  %v3649_v22 = vsub.f32 0.0, %v7092_v8 }
0x112b   : > { %v3597_v51 = vmul.f32 %v5425_v3, %v7103_v35  ;;  %v3564_v48 = vsel %vm3561_vm5, %v3563_v45, %v3559_v59  ;;  %v3574_v16 = vsel %vm3573_vm6, %v5421_v32, %v3570_v27  ;;  %vm3602_vm9 = vweird.f32 %v5425_v3  ;;  %vm3588_vm13 = vmor %vm3586_vm12, %vm3587_vm8 }
0x112c   : > { %v3583_v37 = vsub.f32 1.0, %v3582_v58  ;;  %v3611_v21 = vmul.f32 1.0614054, %v3564_v48  ;;  %v3579_v57 = vsel %vm3576_vm7, %v3578_v39, %v3574_v16  ;;  %vm3603_vm1 = vmor %vm3601_vm15, %vm3602_vm9  ;;  %vm3606_vm3 = vcmp.eq.f32.partialorder %v3605_v38, 8.507059e+37 }
0x112d   : > { %v3598_v53 = vsub.f32 1.0, %v3597_v51  ;;  %v3612_v61 = vmul.f32 1.0614054, %v3579_v57  ;;  %v3653_v54 = vmul.f32 %v3649_v22, %v7092_v8  ;;  %v5427_v43 = vpop.eup %5426  ;;  %vm3532_vm5 = vcmp.ge.f32.partialorder %v7069_v50, 0.0 }
0x112e   : > { %v3584_v42 = vmul.f32 %v5423_v11, %v3583_v37  ;;  %v3615_v12 = vadd.f32 -1.4531521, %v3611_v21  ;;  %vm3533_vm6 = vcmp.ge.f32.partialorder %v7083_v0, 0.0  ;;  %vm3534_vm7 = vcmp.ge.f32.partialorder %v7089_v29, 0.0 }
0x112f   : > { %v3599_v23 = vmul.f32 %v5425_v3, %v3598_v53  ;;  %v3616_v30 = vadd.f32 -1.4531521, %v3612_v61  ;;  %v3659_v51 = vmul.f32 1.442695, %v3653_v54  ;;  %v5429_v61 = vpop.eup %5428  ;;  %v3537_v50 = vsel %vm3533_vm6, 1.0, %v5775_v52 }
0x1130   : > { %v3585_v5 = vadd.f32 %v5423_v11, %v3584_v42  ;;  %v3619_v32 = vmul.f32 %v3615_v12, %v3564_v48  ;;  %v3523_v0 = vmul.f32 0.5, %v7056_v31  ;;  %v3526_v29 = vmul.f32 0.5, %v7080_v63  ;;  %v3842_v31 = vld [vmem:[#allocation15] sm:$0xff] }
0x1131   : > { %v3600_v55 = vadd.f32 %v5425_v3, %v3599_v23  ;;  %v3620_v56 = vmul.f32 %v3616_v30, %v3579_v57  ;;  %5430 = vpow2.f32 %v3659_v51 }
0x1132   : > { %v3589_v49 = vsel %vm3588_vm13, %v5423_v11, %v3585_v5  ;;  %v3623_v46 = vadd.f32 1.4214138, %v3619_v32  ;;  %v3654_v11 = vmul.f32 %v3650_v34, %v7095_v14 }
0x1133   : > { %v3594_v17 = vsel %vm3591_vm0, %v3593_v13, %v3589_v49  ;;  %v3604_v19 = vsel %vm3603_vm1, %v5425_v3, %v3600_v55  ;;  %v3624_v28 = vadd.f32 1.4214138, %v3620_v56 }
0x1134   : > { %v3613_v26 = vmul.f32 1.0614054, %v3594_v17  ;;  %v3627_v60 = vmul.f32 %v3623_v46, %v3564_v48  ;;  %v3609_v10 = vsel %vm3606_vm3, %v3608_v25, %v3604_v19  ;;  %v3661_v21 = vmul.f32 1.442695, %v3654_v11 }
0x1135   : > { %v3614_v2 = vmul.f32 1.0614054, %v3609_v10  ;;  %v3628_v15 = vmul.f32 %v3624_v28, %v3579_v57  ;;  %v3536_v46 = vsel %vm3532_vm5, 1.0, %v5775_v52 }
0x1136   : > { %v3617_v40 = vadd.f32 -1.4531521, %v3613_v26  ;;  %v3631_v35 = vadd.f32 -0.28449672, %v3627_v60  ;;  %5432 = vpow2.f32 %v3661_v21  ;;  %v3538_v26 = vsel %vm3534_vm7, 1.0, %v5775_v52 }
0x1137   : > { %v3618_v44 = vadd.f32 -1.4531521, %v3614_v2  ;;  %v3632_v20 = vadd.f32 -0.28449672, %v3628_v15  ;;  %v5431_v32 = vpop.eup %5430  ;;  %v3525_v2 = vmul.f32 0.5, %v7076_v62 }
0x1138   : > { %v3621_v45 = vmul.f32 %v3617_v40, %v3594_v17  ;;  %v3635_v27 = vmul.f32 %v3631_v35, %v3564_v48  ;;  %v3524_v40 = vmul.f32 0.5, %v7058_v24  ;;  %v7144_v24 = vld [vmem:[%s6119_s25] sm:$0x3f] }
0x1139   : > { %v3622_v3 = vmul.f32 %v3618_v44, %v3609_v10  ;;  %v3636_v58 = vmul.f32 %v3632_v20, %v3579_v57  ;;  %v3717_v63 = vperm.slane %v7144_v24, 3 }
0x113a   : > { %v3625_v59 = vadd.f32 1.4214138, %v3621_v45  ;;  %v3639_v39 = vadd.f32 0.2548296, %v3635_v27 }
0x113b   : > { %v3626_v16 = vadd.f32 1.4214138, %v3622_v3  ;;  %v3640_v37 = vadd.f32 0.2548296, %v3636_v58 }
0x113c   : > { %v3629_v53 = vmul.f32 %v3625_v59, %v3594_v17  ;;  %v3643_v1 = vmul.f32 %v3639_v39, %v3564_v48  ;;  %v5433_v55 = vpop.eup %5432 }
0x113d   : > { %v3630_v18 = vmul.f32 %v3626_v16, %v3609_v10  ;;  %v3644_v8 = vmul.f32 %v3640_v37, %v3579_v57  ;;  %v3535_v57 = vsel %vm3531_vm4, 1.0, %v5775_v52  ;;  %v3843_v52 = vld [vmem:[#allocation15 + $0x8] sm:$0x3] }
0x113e   : > { %v3633_v42 = vadd.f32 -0.28449672, %v3629_v53  ;;  %v3663_v4 = vmul.f32 %v5427_v43, %v3643_v1  ;;  %5080 = vmatpush.msk.msrb.mxu0 %vm763_vm10, %v3843_v52 }
0x113f   : > { %v3634_v14 = vadd.f32 -0.28449672, %v3630_v18  ;;  %v3664_v12 = vmul.f32 %v5429_v61, %v3644_v8  ;;  %v5776_v18 = vmov 32.0  }
0x1140   : > { %v3637_v47 = vmul.f32 %v3633_v42, %v3594_v17  ;;  %v3667_v30 = vsub.f32 1.0, %v3663_v4  ;;  %4007 = vmatpush.msrb.mxu0 %v3842_v31  ;;  %5434 = vrcp.f32 %v5776_v18 }
0x1141   : > { %v3638_v23 = vmul.f32 %v3634_v14, %v3609_v10  ;;  %v3668_v48 = vsub.f32 1.0, %v3664_v12 }
0x1142   : > { %v3641_v38 = vadd.f32 0.2548296, %v3637_v47  ;;  %v3671_v49 = vmul.f32 %v3667_v30, %v3535_v57 }
0x1143   : > { %v3642_v22 = vadd.f32 0.2548296, %v3638_v23  ;;  %v3672_v25 = vmul.f32 %v3668_v48, %v3536_v46 }
0x1144   : > { %v3645_v5 = vmul.f32 %v3641_v38, %v3594_v17  ;;  %v3675_v34 = vadd.f32 1.0, %v3671_v49 }
0x1145   : > { %v3646_v13 = vmul.f32 %v3642_v22, %v3609_v10  ;;  %v3676_v10 = vadd.f32 1.0, %v3672_v25 }
0x1146   : > { %v3665_v56 = vmul.f32 %v5431_v32, %v3645_v5  ;;  %v3679_v54 = vmul.f32 %v3675_v34, %v3523_v0  ;;  %v5435_v8 = vpop.eup %5434 }
0x1147   : > { %v3666_v33 = vmul.f32 %v5433_v55, %v3646_v13  ;;  %v3680_v20 = vmul.f32 %v3676_v10, %v3524_v40  ;;  %v3927_v61 = vmul.f32 32.0, %v5435_v8  ;;  %vm3931_vm8 = vweird.f32 %v5435_v8 }
0x1148   : > { %v3669_v19 = vsub.f32 1.0, %v3665_v56  ;;  %v4065_v10 = vperm.slane %v7144_v24, 5 }
0x1149   : > { %v3670_v28 = vsub.f32 1.0, %v3666_v33  ;;  %v3928_v42 = vsub.f32 1.0, %v3927_v61 }
0x114a   : > { %v3673_v17 = vmul.f32 %v3669_v19, %v3537_v50 }
0x114b   : > { %v3674_v60 = vmul.f32 %v3670_v28, %v3538_v26  ;;  %v3929_v4 = vmul.f32 %v5435_v8, %v3928_v42 }
0x114c   : > { %v3677_v15 = vadd.f32 1.0, %v3673_v17 }
0x114d   : > { %v3678_v35 = vadd.f32 1.0, %v3674_v60  ;;  %v3930_v14 = vadd.f32 %v5435_v8, %v3929_v4 }
0x114e   : > { %v3681_v44 = vmul.f32 %v3677_v15, %v3525_v2 }
0x114f   : > { %v3682_v11 = vmul.f32 %v3678_v35, %v3526_v29  ;;  %v3932_v12 = vsel %vm3931_vm8, %v5435_v8, %v3930_v14 }
0x1150   : > { %v3715_v45 = vpack.c.bf16 %v3681_v44, %v3679_v54 }
0x1151   : > { %v3716_v27 = vpack.c.bf16 %v3682_v11, %v3680_v20 }
0x1152   : > { %3822 = vmatmul.bf16.vlgmr.msra.gmra.mxu0 %v3715_v45 }
0x1153   : > { %3836 = vmatmul.bf16.vlgmr.msrb.gmra.mxu1 %v3716_v27 }
0x11cf   : > { %v3823_v62 = vpop.f32.mrf.mxu0 }
0x11d0   : > { %v3837_v3 = vpop.f32.mrf.mxu1  ;;  %v3824_v58 = vadd.f32 %v3823_v62, %v3717_v63 }
0x11d2   : > { %v7147_v16 = vadd.f32 %v3837_v3, %v3824_v58 }
0x11d4   : > { %v3864_v53 = vmul.f32 %v7147_v16, %v7147_v16 }
0x11d7   : > { %v3825_v59 = vpop.f32.mrf.mxu0 }
0x11d8   : > { %v3826_v39 = vadd.f32 %v3825_v59, %v3717_v63  ;;  %v3839_v51 = vpop.f32.mrf.mxu1 }
0x11da   : > { %v7149_v37 = vadd.f32 %v3839_v51, %v3826_v39 }
0x11dc   : > { %v3865_v21 = vmul.f32 %v7149_v37, %v7149_v37  ;;  %3858 = vmatpush.msra.mxu2 %v7149_v37 }
0x11de   : > { %3859 = vmatpush.msra.mxu2 %v7147_v16  ;;  %3880 = vmatpush.msra.mxu3 %v3865_v21 }
0x11df   : > { %5073 = vmatmul.msk.f32.vlgmr.msra.gmra.mxu2 %vm952_vm2, %v6179_v6 }
0x11e0   : > { %3881 = vmatpush.msra.mxu3 %v3864_v53  ;;  %3900 = vmatpush.xpose.msrb.mxu2 %v3843_v52 }
0x11e1   : > { %5074 = vmatmul.msk.f32.vlgmr.msra.gmra.mxu3 %vm952_vm2, %v6179_v6 }
0x11e2   : > { %3920 = vmatpush.xpose.msrb.mxu3 %v3843_v52 }
0x11e4   : > { %3901 = vmatpush.xpose.msrb.mxu2 %v3842_v31 }
0x11e6   : > { %3921 = vmatpush.xpose.msrb.mxu3 %v3842_v31 }
0x11e8   : > { %5075 = vmatpush.msk.msra.mxu2 %vm763_vm10, %v3843_v52 }
0x11ea   : > { %3958 = vmatpush.msra.mxu2 %v3842_v31 }
0x1262   : > { %v3861_v1 = vpop.f32.mrf.mxu2 }
0x1263   : > { %3902 = vmatmul.f32.vlgmr.msrb.gmra.mxu2 %v3861_v1 }
0x1264   : > { %v3883_v43 = vpop.f32.mrf.mxu3 }
0x1265   : > { %3922 = vmatmul.f32.vlgmr.msrb.gmra.mxu3 %v3883_v43 }
0x12e6   : > { %v3903_v6 = vpop.f32.mrf.mxu2 }
0x12e7   : > { %v3933_v47 = vmul.f32 %v3932_v12, %v3903_v6 }
0x12e8   : > { %v3923_v23 = vpop.f32.mrf.mxu3 }
0x12e9   : > { %v3935_v38 = vmul.f32 %v3933_v47, %v3933_v47  ;;  %v3934_v30 = vmul.f32 %v3932_v12, %v3923_v23  ;;  %5076 = vmatmul.msk.f32.vlgmr.msra.gmra.mxu2 %vm1878_vm11, %v3933_v47 }
0x12eb   : > { %v3936_v22 = vsub.f32 %v3934_v30, %v3935_v38 }
0x12ed   : > { %5081 = vmatmul.msk.f32.vlgmr.msrb.gmra.mxu0 %vm1878_vm11, %v3936_v22 }
0x136a   : > { %v4009_v48 = vpop.f32.mrf.mxu0 }
0x136b   : > { %5082 = vmatpush.msk.msra.mxu1 %vm763_vm10, %v4009_v48 }
0x136c   : > { %v3960_v5 = vpop.f32.mrf.mxu2  ;;  %5083 = vmatmul.msk.f32.vlgmr.msra.gmra.mxu1 %vm756_vm14, %v6184_v7 }
0x136d   : > { %5077 = vmatpush.msk.msra.mxu3 %vm763_vm10, %v3960_v5 }
0x136e   : > { %5078 = vmatmul.msk.f32.vlgmr.msra.gmra.mxu3 %vm756_vm14, %v6184_v7 }
0x1374   : > { %5084 = vmatmul.msk.f32.gmra.mxu1 %vm756_vm14, %v6195_v9 }
0x1376   : > { %5079 = vmatmul.msk.f32.gmra.mxu3 %vm756_vm14, %v6195_v9  ;;  %v4062_v9 = vperm.slane %v7144_v24, 4 }
0x13e9   : > { %v4034_v32 = vpop.f32.mrf.mxu1 }
0x13ea   : > { %v4035_v57 = vadd.f32 1e-05, %v4034_v32 }
0x13ec   : > { %5436 = vrsqrt.f32 %v4035_v57  ;;  %vm4046_vm2 = vweird.f32 %v4035_v57 }
0x13f1   : > { %v4037_v13 = vpop.f32.mrf.mxu1  ;;  %v3983_v25 = vpop.f32.mrf.mxu3 }
0x13f2   : > { %v5437_v55 = vpop.eup %5436  ;;  %v4038_v56 = vadd.f32 1e-05, %v4037_v13  ;;  %v4012_v17 = vsub.f32 %v7147_v16, %v3983_v25 }
0x13f3   : > { %v4041_v49 = vmul.f32 %v5437_v55, %v4035_v57  ;;  %vm4047_vm10 = vweird.f32 %v5437_v55 }
0x13f4   : > { %5438 = vrsqrt.f32 %v4038_v56  ;;  %vm4048_vm14 = vmor %vm4046_vm2, %vm4047_vm10  ;;  %vm4056_vm9 = vweird.f32 %v4038_v56 }
0x13f5   : > { %v4042_v46 = vmul.f32 %v5437_v55, %v4041_v49 }
0x13f7   : > { %v4043_v33 = vmul.f32 0.5, %v4042_v46 }
0x13f9   : > { %v4044_v19 = vsub.f32 1.5, %v4043_v33  ;;  %v3986_v40 = vpop.f32.mrf.mxu3 }
0x13fa   : > { %v5439_v7 = vpop.eup %5438  ;;  %v4013_v44 = vsub.f32 %v7149_v37, %v3986_v40 }
0x13fb   : > { %v4045_v50 = vmul.f32 %v5437_v55, %v4044_v19  ;;  %v4051_v28 = vmul.f32 %v5439_v7, %v4038_v56  ;;  %vm4057_vm11 = vweird.f32 %v5439_v7 }
0x13fc   : > { %vm4058_vm12 = vmor %vm4056_vm9, %vm4057_vm11 }
0x13fd   : > { %v4049_v34 = vsel %vm4048_vm14, %v5437_v55, %v4045_v50  ;;  %v4052_v26 = vmul.f32 %v5439_v7, %v4051_v28 }
0x13fe   : > { %v4060_v60 = vmul.f32 %v4049_v34, %v4012_v17 }
0x13ff   : > { %v4053_v0 = vmul.f32 0.5, %v4052_v26 }
0x1400   : > { %v4063_v2 = vmul.f32 %v4062_v9, %v4060_v60 }
0x1401   : > { %v4054_v15 = vsub.f32 1.5, %v4053_v0 }
0x1402   : > { %v4066_v29 = vadd.f32 %v4065_v10, %v4063_v2 }
0x1403   : > { %v4055_v35 = vmul.f32 %v5439_v7, %v4054_v15 }
0x1404   : > { %v4068_v54 = vadd.f32 %v4066_v29, %v6275_v36 }
0x1405   : > { %v4059_v20 = vsel %vm4058_vm12, %v5439_v7, %v4055_v35 }
0x1406   : > { %4070 = vst [vmem:[#allocation2] sm:$0xff] %v4068_v54  ;;  %v4061_v11 = vmul.f32 %v4059_v20, %v4013_v44 }
0x1408   : > { %v4064_v45 = vmul.f32 %v4062_v9, %v4061_v11 }
0x140a   : > { %v4067_v27 = vadd.f32 %v4065_v10, %v4064_v45  ;;  %4075 = sbr.rel (%p5085_p7) target bundleno = 5137 (0x1411), region = 108 }
0x140c   : > { %v4069_v52 = vadd.f32 %v4067_v27, %v6281_v41 }
0x140e   : > { %4071 = vst [vmem:[#allocation2 + $0x8] sm:$0xff] %v4069_v52 }
0x140f   : > { %4076 = vst [vmem:[#allocation17] sm:$0xff] %v4068_v54 }
0x1410   : > { %4077 = vst [vmem:[#allocation17 + $0x8] sm:$0xff] %v4069_v52 }
0x1411 PF: > { %p5295_p3 = scmp.eq.s32.totalorder %s5945_s2, 1  ;;  %s5777_s24 = smov [#allocation17]  }
0x1412   : > { %s4083_s25 = sshll.u32 %s5777_s24, 4  ;;  %s7274_s27 = sld [smem:[#allocation35_spill]]  ;;  %s4084_s25 = int_to_ptr.vmem [resolvable:$true] %s4083_s25 }
0x1413   : > { %s5778_s30 = smov 128   ;;  %s5779_s23 = smov 8  }
0x1418   : > { %s4085_s9 = sshll.u32 %s7274_s27, 4  ;;  %s4086_s9 = int_to_ptr.hbm [resolvable:$true] %s4085_s9 }
0x1419   : > { %5263 = dma.vmem_to_hbm [thread:$0]  (%p5295_p3), %s4084_s25, 256, %s4086_s9, [#allocation5], %s5778_s30, %s5778_s30, %s5779_s23  }
0x141a   : > { %5748 = dma.done.wait (%p5295_p3), [#allocation5], 256  }
0x141b   : > { %5750 = vsyncadd (%p5295_p3), [#allocation5], 4294967040 }
0x141c PF: > { %s7275_s24 = sld [smem:[#allocation25_spill]]  ;;  %s7278_s21 = smov %s5757_s22 }
0x141d   : > { %s7276_s12 = sld [smem:[#allocation24_spill]] }
0x141e   : > { %s7277_s23 = sld [smem:[#allocation26_spill]] }
0x1422   : > { %p33_p8 = scmp.ge.s32.totalorder %s7275_s24, 4  }
0x1423   : > { %s7279_s22 = smov %s7276_s12 }
0x1424   :  { %35 = sbr.rel (!%p33_p8) target bundleno = 21 (0x15), region = 209 }
0x1429   :  { %4102 = vsyncpa [#allocation4], 1 }
0x142a   :  { %4104 = vsyncpa [#allocation4 + $0x1], 1 }
0x142b   :  { %4105 = vsyncpa [#allocation7], 1 }
0x142c   :  { %4107 = vsyncpa [#allocation7 + $0x1], 1 }
0x142d   :  { %4108 = vsyncpa [#allocation10], 1 }
0x142e   :  { %4110 = vsyncpa [#allocation10 + $0x1], 1 }
0x142f   :  { %4111 = vsyncpa [#allocation13], 1 }
0x1430   :  { %4113 = vsyncpa [#allocation13 + $0x1], 1 }
0x1431   :  { %4114 = vsyncpa [#allocation16], 1 }
0x1432   :  { %4115 = vsyncpa [#allocation5], 1 }
0x1433   :  { %4117 = vsyncpa [#allocation5 + $0x1], 1 }

</bundles_post_ra>
